<compile_context>
chip_gen: v7x
topology: tpu7x:2x2x1
jax: 0.10.0
libtpu: 0.0.40
codegen_flags: <defaults>
</compile_context>

<pallas_src>
import jax
import jax.numpy as jnp
from jax.experimental import pallas as pl
from jax.experimental.pallas import tpu as pltpu

FC1_IN = 3136        # 64 * 7 * 7, fixed by nn.Linear(3136, 512)
FC_HIDDEN = 512


# ---------------------------------------------------------------------------
# helpers
# ---------------------------------------------------------------------------
def _round_up(x, m):
    return ((x + m - 1) // m) * m


def _choose_m_tiling(m, *, target=256, min_steps=2, mult=16):
    """Pick an M tile (multiple of `mult`, <= ~target) and the padded M.

    Guarantees >= min_steps grid steps whenever m allows, so both TensorCores
    (v7x megacore) get work and the DMA/compute pipeline has steps to overlap.
    """
    steps = max(min_steps, pl.cdiv(m, target))
    tm = _round_up(pl.cdiv(m, steps), mult)
    m_pad = _round_up(m, tm)
    return tm, m_pad


def _vmem_limit(block_bytes, headroom=4 << 20):
    # The Pallas pipeline double-buffers every block by default; add headroom
    # for Mosaic's internal scratch.
    return int(min(max(2 * block_bytes + headroom, 8 << 20), 64 << 20))


# ---------------------------------------------------------------------------
# Pallas kernel 1: conv-as-matmul   out = relu(cols @ w + b)     (M-tiled)
# ---------------------------------------------------------------------------
def _matmul_bias_relu_kernel(x_ref, w_ref, b_ref, o_ref):
    acc = jnp.dot(x_ref[...], w_ref[...], preferred_element_type=jnp.float32)
    o_ref[...] = jnp.maximum(acc + b_ref[...], 0.0).astype(o_ref.dtype)


def matmul_bias_relu(x, w, b_row, *, target_tm=256, min_steps=4):
    """relu(x @ w + b).  x: (M, K) bf16, w: (K, N) bf16, b: (1, N) f32 -> (M, N) bf16."""
    m, k = x.shape
    k2, n = w.shape
    assert k == k2, (k, k2)
    tm, m_pad = _choose_m_tiling(m, target=target_tm, min_steps=min_steps)
    if m_pad != m:
        x = jnp.pad(x, ((0, m_pad - m), (0, 0)))          # fuses with im2col under jit
    grid = (m_pad // tm,)
    block_bytes = (tm * k * 2) + (k * n * 2) + (n * 4) + (tm * n * 2)
    out = pl.pallas_call(
        _matmul_bias_relu_kernel,
        out_shape=jax.ShapeDtypeStruct((m_pad, n), jnp.bfloat16),
        grid=grid,
        in_specs=[
            pl.BlockSpec((tm, k), lambda i: (i, 0)),
            pl.BlockSpec((k, n), lambda i: (0, 0)),        # constant index -> fetched once
            pl.BlockSpec((1, n), lambda i: (0, 0)),
        ],
        out_specs=pl.BlockSpec((tm, n), lambda i: (i, 0)),
        compiler_params=pltpu.CompilerParams(
            dimension_semantics=("parallel",),
            vmem_limit_bytes=_vmem_limit(block_bytes),
        ),
    )(x, w, b_row)
    return out if m_pad == m else out[:m]


# ---------------------------------------------------------------------------
# Pallas kernel 2: fused FC1 + ReLU + FC2, fc1/fc2 weights resident in VMEM
# ---------------------------------------------------------------------------
def _fc_fused_kernel(x_ref, w1_ref, b1_ref, w2_ref, b2_ref, o_ref):
    h = jnp.dot(x_ref[...], w1_ref[...], preferred_element_type=jnp.float32)
    h = jnp.maximum(h + b1_ref[...], 0.0)                  # (tm, 512) f32, never leaves VMEM
    out = jnp.dot(h.astype(jnp.bfloat16), w2_ref[...],
                  preferred_element_type=jnp.float32) + b2_ref[...]
    o_ref[...] = out.astype(o_ref.dtype)


def fc1_fc2_fused(x, w1, b1_row, w2, b2_row, *, target_tm=256, min_steps=2):
    """relu(x @ w1 + b1) @ w2 + b2.  x: (M, 3136) bf16; w1 (3136,512), w2 (512,N) bf16."""
    m, k = x.shape
    k2, hdim = w1.shape
    h2, n = w2.shape
    assert k == k2 and hdim == h2, (x.shape, w1.shape, w2.shape)
    tm, m_pad = _choose_m_tiling(m, target=target_tm, min_steps=min_steps)
    if m_pad != m:
        x = jnp.pad(x, ((0, m_pad - m), (0, 0)))
    grid = (m_pad // tm,)
    block_bytes = ((tm * k * 2) + (k * hdim * 2) + (hdim * 4)
                   + (hdim * n * 2) + (n * 4) + (tm * n * 4))
    out = pl.pallas_call(
        _fc_fused_kernel,
        out_shape=jax.ShapeDtypeStruct((m_pad, n), jnp.float32),
        grid=grid,
        in_specs=[
            pl.BlockSpec((tm, k), lambda i: (i, 0)),
            pl.BlockSpec((k, hdim), lambda i: (0, 0)),     # full fc1 weight, resident
            pl.BlockSpec((1, hdim), lambda i: (0, 0)),
            pl.BlockSpec((hdim, n), lambda i: (0, 0)),
            pl.BlockSpec((1, n), lambda i: (0, 0)),
        ],
        out_specs=pl.BlockSpec((tm, n), lambda i: (i, 0)),
        compiler_params=pltpu.CompilerParams(
            dimension_semantics=("parallel",),
            vmem_limit_bytes=_vmem_limit(block_bytes, headroom=8 << 20),
        ),
    )(x, w1, b1_row, w2, b2_row)
    return out if m_pad == m else out[:m]


# ---------------------------------------------------------------------------
# Conv2d (valid padding, square stride) = im2col (XLA glue) + Pallas matmul
# ---------------------------------------------------------------------------
def _im2col(x_nhwc, kh, kw, stride):
    n, h, w, c = x_nhwc.shape
    oh = (h - kh) // stride + 1
    ow = (w - kw) // stride + 1
    patches = []
    for i in range(kh):
        for j in range(kw):
            patches.append(
                x_nhwc[:, i:i + stride * oh:stride,
                          j:j + stride * ow:stride, :])
    cols = jnp.stack(patches, axis=3)                      # (n, oh, ow, kh*kw, c)
    return cols.reshape(n * oh * ow, kh * kw * c), oh, ow


def conv2d_relu(x_nhwc, w_mat, b_row, kh, kw, stride):
    """PyTorch-semantics Conv2d(stride, no padding) + ReLU (NHWC in/out, bf16)."""
    n = x_nhwc.shape[0]
    cols, oh, ow = _im2col(x_nhwc, kh, kw, stride)
    out = matmul_bias_relu(cols, w_mat, b_row)
    return out.reshape(n, oh, ow, w_mat.shape[1])


# ---------------------------------------------------------------------------
# MarioNet parameters (PyTorch layout), one-time prep, forward
# ---------------------------------------------------------------------------
def init_params(key, c, output_dim):
    ks = jax.random.split(key, 10)

    def n(k, shape, scale):
        return jax.random.normal(k, shape, jnp.float32) * scale

    return {
        "c1_w": n(ks[0], (32, c, 8, 8), 0.05),      "c1_b": n(ks[1], (32,), 0.05),
        "c2_w": n(ks[2], (64, 32, 4, 4), 0.05),     "c2_b": n(ks[3], (64,), 0.05),
        "c3_w": n(ks[4], (64, 64, 3, 3), 0.05),     "c3_b": n(ks[5], (64,), 0.05),
        "fc1_w": n(ks[6], (512, 3136), 0.02),       "fc1_b": n(ks[7], (512,), 0.02),
        "fc2_w": n(ks[8], (output_dim, 512), 0.02), "fc2_b": n(ks[9], (output_dim,), 0.02),
    }


def prepare_params(p):
    """One-time weight re-layout + bf16 cast (hoisted out of the forward)."""
    def conv_w(w):
        # PyTorch (oc, ic, kh, kw) -> (kh*kw*ic, oc), matching im2col (i, j, c) order.
        oc, ic, kh, kw = w.shape
        return jnp.transpose(w, (2, 3, 1, 0)).reshape(kh * kw * ic, oc).astype(jnp.bfloat16)

    # fc1: fold torch.nn.Flatten's NCHW ordering into the weight so the kernel
    # consumes the NHWC conv3 output flattened as-is (no runtime transpose).
    fc1 = p["fc1_w"].reshape(FC_HIDDEN, 64, 7, 7)                         # (out, c, h, w)
    fc1 = jnp.transpose(fc1, (2, 3, 1, 0)).reshape(FC1_IN, FC_HIDDEN)     # (h*w*c, out)
    return {
        "c1_w": conv_w(p["c1_w"]), "c1_b": p["c1_b"].reshape(1, -1),
        "c2_w": conv_w(p["c2_w"]), "c2_b": p["c2_b"].reshape(1, -1),
        "c3_w": conv_w(p["c3_w"]), "c3_b": p["c3_b"].reshape(1, -1),
        "fc1_w": fc1.astype(jnp.bfloat16), "fc1_b": p["fc1_b"].reshape(1, -1),
        "fc2_w": p["fc2_w"].T.astype(jnp.bfloat16), "fc2_b": p["fc2_b"].reshape(1, -1),
    }


def mario_net_forward(prepped, x_nchw):
    n = x_nchw.shape[0]
    x = jnp.transpose(x_nchw, (0, 2, 3, 1)).astype(jnp.bfloat16)        # NCHW -> NHWC bf16
    x = conv2d_relu(x, prepped["c1_w"], prepped["c1_b"], 8, 8, 4)       # (n, 20, 20, 32)
    x = conv2d_relu(x, prepped["c2_w"], prepped["c2_b"], 4, 4, 2)       # (n,  9,  9, 64)
    x = conv2d_relu(x, prepped["c3_w"], prepped["c3_b"], 3, 3, 1)       # (n,  7,  7, 64)
    x = x.reshape(n, FC1_IN)               # NHWC flatten; fc1_w is pre-permuted to match
    return fc1_fc2_fused(x, prepped["fc1_w"], prepped["fc1_b"],
                         prepped["fc2_w"], prepped["fc2_b"])            # (n, output_dim)


def reference_forward(p, x_nchw):
    """Pure-JAX f32 reference with exact PyTorch semantics (validation only)."""
    y = x_nchw
    for name, stride in (("c1", 4), ("c2", 2), ("c3", 1)):
        y = jax.lax.conv_general_dilated(
            y, p[f"{name}_w"], window_strides=(stride, stride), padding="VALID",
            dimension_numbers=("NCHW", "OIHW", "NCHW"),
            precision=jax.lax.Precision.HIGHEST)
        y = jnp.maximum(y + p[f"{name}_b"][None, :, None, None], 0.0)
    y = y.reshape(y.shape[0], -1)                                       # torch Flatten (NCHW)
    y = jnp.maximum(jnp.dot(y, p["fc1_w"].T, precision=jax.lax.Precision.HIGHEST)
                    + p["fc1_b"], 0.0)
    return jnp.dot(y, p["fc2_w"].T, precision=jax.lax.Precision.HIGHEST) + p["fc2_b"]


if __name__ == "__main__":
    batch, c, h, w = 2, 4, 84, 84    # 84x84 required so the flatten size == 3136
    output_dim = 8

    key = jax.random.PRNGKey(0)
    k_params, k_x = jax.random.split(key)
    params = init_params(k_params, c, output_dim)
    prepped = prepare_params(params)
    x = jax.random.normal(k_x, (batch, c, h, w), jnp.float32)

    fwd = jax.jit(mario_net_forward)
    out = jax.block_until_ready(fwd(prepped, x))
    assert out.shape == (batch, output_dim), out.shape
    assert bool(jnp.all(jnp.isfinite(out)))

    # Loose check vs. the f32 reference (activations/weights run in bf16 on MXU).
    ref = reference_forward(params, x)
    max_err = float(jnp.max(jnp.abs(out - ref)))
    tol = 5e-2 + 5e-2 * float(jnp.max(jnp.abs(ref)))
    assert max_err < tol, (max_err, tol)
    print("KERNEL_OK")
</pallas_src>

<mosaic_0001>
module attributes {stable_mosaic.version = 11 : i64} {
  func.func @_matmul_bias_relu_kernel(%arg0: i32, %arg1: memref<208x256xbf16, #tpu.memory_space<vmem>>, %arg2: memref<256x32xbf16, #tpu.memory_space<vmem>>, %arg3: memref<1x32xf32, #tpu.memory_space<vmem>>, %arg4: memref<208x32xbf16, #tpu.memory_space<vmem>>) attributes {dimension_semantics = [#tpu.dimension_semantics<parallel>], iteration_bounds = array<i64: 4>, scalar_prefetch = 0 : i64, scratch_operands = 0 : i64, tpu.core_type = #tpu.core_type<tc>, window_params = [{transform_indices = @transform_0, window_bounds = array<i64: 208, 256>}, {pipeline_mode = #tpu.pipeline_mode<synchronous>, transform_indices = @transform_1, window_bounds = array<i64: 256, 32>}, {pipeline_mode = #tpu.pipeline_mode<synchronous>, transform_indices = @transform_2, window_bounds = array<i64: 1, 32>}, {transform_indices = @transform_3, window_bounds = array<i64: 208, 32>}]} {
    %c0 = arith.constant 0 : index
    %c0_0 = arith.constant 0 : index
    %0 = vector.load %arg1[%c0, %c0_0] : memref<208x256xbf16, #tpu.memory_space<vmem>>, vector<208x256xbf16>
    %c0_1 = arith.constant 0 : index
    %c0_2 = arith.constant 0 : index
    %1 = vector.load %arg2[%c0_1, %c0_2] : memref<256x32xbf16, #tpu.memory_space<vmem>>, vector<256x32xbf16>
    %cst = arith.constant dense<0.000000e+00> : vector<208x32xf32>
    %2 = tpu.matmul %0, %1, %cst {dimension_numbers = #tpu.dot_dimension_numbers<[1], [0], [0], [1], [0, 0, 1, 1], [], []>} : vector<208x256xbf16>, vector<256x32xbf16>, vector<208x32xf32> -> vector<208x32xf32>
    %c0_3 = arith.constant 0 : index
    %c0_4 = arith.constant 0 : index
    %3 = vector.load %arg3[%c0_3, %c0_4] : memref<1x32xf32, #tpu.memory_space<vmem>>, vector<1x32xf32>
    %4 = vector.broadcast %3 : vector<1x32xf32> to vector<208x32xf32>
    %5 = arith.addf %2, %4 : vector<208x32xf32>
    %cst_5 = arith.constant 0.000000e+00 : f32
    %6 = vector.broadcast %cst_5 : f32 to vector<208x32xf32>
    %7 = arith.maximumf %5, %6 : vector<208x32xf32>
    %8 = arith.truncf %7 : vector<208x32xf32> to vector<208x32xbf16>
    %c0_6 = arith.constant 0 : index
    %c0_7 = arith.constant 0 : index
    %9 = vector.load %arg4[%c0_6, %c0_7] : memref<208x32xbf16, #tpu.memory_space<vmem>>, vector<208x32xbf16>
    tpu.vector_store %arg4[%c0_6, %c0_7], %8 {strides = array<i32>} : memref<208x32xbf16, #tpu.memory_space<vmem>>, vector<208x32xbf16>,
    return
  }
  func.func @transform_0(%arg0: i32) -> (i32, i32) {
    %c0_i32 = arith.constant 0 : i32
    %c0_i32_0 = arith.constant 0 : i32
    return %arg0, %c0_i32 : i32, i32
  }
  func.func @transform_1(%arg0: i32) -> (i32, i32) {
    %c0_i32 = arith.constant 0 : i32
    %c0_i32_0 = arith.constant 0 : i32
    %c0_i32_1 = arith.constant 0 : i32
    return %c0_i32, %c0_i32_0 : i32, i32
  }
  func.func @transform_2(%arg0: i32) -> (i32, i32) {
    %c0_i32 = arith.constant 0 : i32
    %c0_i32_0 = arith.constant 0 : i32
    %c0_i32_1 = arith.constant 0 : i32
    return %c0_i32, %c0_i32_0 : i32, i32
  }
  func.func @transform_3(%arg0: i32) -> (i32, i32) {
    %c0_i32 = arith.constant 0 : i32
    %c0_i32_0 = arith.constant 0 : i32
    return %arg0, %c0_i32 : i32, i32
  }
}

module attributes {stable_mosaic.version = 11 : i64} {
  func.func @_matmul_bias_relu_kernel(%arg0: i32, %arg1: memref<48x512xbf16, #tpu.memory_space<vmem>>, %arg2: memref<512x64xbf16, #tpu.memory_space<vmem>>, %arg3: memref<1x64xf32, #tpu.memory_space<vmem>>, %arg4: memref<48x64xbf16, #tpu.memory_space<vmem>>) attributes {dimension_semantics = [#tpu.dimension_semantics<parallel>], iteration_bounds = array<i64: 4>, scalar_prefetch = 0 : i64, scratch_operands = 0 : i64, tpu.core_type = #tpu.core_type<tc>, window_params = [{transform_indices = @transform_0, window_bounds = array<i64: 48, 512>}, {pipeline_mode = #tpu.pipeline_mode<synchronous>, transform_indices = @transform_1, window_bounds = array<i64: 512, 64>}, {pipeline_mode = #tpu.pipeline_mode<synchronous>, transform_indices = @transform_2, window_bounds = array<i64: 1, 64>}, {transform_indices = @transform_3, window_bounds = array<i64: 48, 64>}]} {
    %c0 = arith.constant 0 : index
    %c0_0 = arith.constant 0 : index
    %0 = vector.load %arg1[%c0, %c0_0] : memref<48x512xbf16, #tpu.memory_space<vmem>>, vector<48x512xbf16>
    %c0_1 = arith.constant 0 : index
    %c0_2 = arith.constant 0 : index
    %1 = vector.load %arg2[%c0_1, %c0_2] : memref<512x64xbf16, #tpu.memory_space<vmem>>, vector<512x64xbf16>
    %cst = arith.constant dense<0.000000e+00> : vector<48x64xf32>
    %2 = tpu.matmul %0, %1, %cst {dimension_numbers = #tpu.dot_dimension_numbers<[1], [0], [0], [1], [0, 0, 1, 1], [], []>} : vector<48x512xbf16>, vector<512x64xbf16>, vector<48x64xf32> -> vector<48x64xf32>
    %c0_3 = arith.constant 0 : index
    %c0_4 = arith.constant 0 : index
    %3 = vector.load %arg3[%c0_3, %c0_4] : memref<1x64xf32, #tpu.memory_space<vmem>>, vector<1x64xf32>
    %4 = vector.broadcast %3 : vector<1x64xf32> to vector<48x64xf32>
    %5 = arith.addf %2, %4 : vector<48x64xf32>
    %cst_5 = arith.constant 0.000000e+00 : f32
    %6 = vector.broadcast %cst_5 : f32 to vector<48x64xf32>
    %7 = arith.maximumf %5, %6 : vector<48x64xf32>
    %8 = arith.truncf %7 : vector<48x64xf32> to vector<48x64xbf16>
    %c0_6 = arith.constant 0 : index
    %c0_7 = arith.constant 0 : index
    %9 = vector.load %arg4[%c0_6, %c0_7] : memref<48x64xbf16, #tpu.memory_space<vmem>>, vector<48x64xbf16>
    tpu.vector_store %arg4[%c0_6, %c0_7], %8 {strides = array<i32>} : memref<48x64xbf16, #tpu.memory_space<vmem>>, vector<48x64xbf16>,
    return
  }
  func.func @transform_0(%arg0: i32) -> (i32, i32) {
    %c0_i32 = arith.constant 0 : i32
    %c0_i32_0 = arith.constant 0 : i32
    return %arg0, %c0_i32 : i32, i32
  }
  func.func @transform_1(%arg0: i32) -> (i32, i32) {
    %c0_i32 = arith.constant 0 : i32
    %c0_i32_0 = arith.constant 0 : i32
    %c0_i32_1 = arith.constant 0 : i32
    return %c0_i32, %c0_i32_0 : i32, i32
  }
  func.func @transform_2(%arg0: i32) -> (i32, i32) {
    %c0_i32 = arith.constant 0 : i32
    %c0_i32_0 = arith.constant 0 : i32
    %c0_i32_1 = arith.constant 0 : i32
    return %c0_i32, %c0_i32_0 : i32, i32
  }
  func.func @transform_3(%arg0: i32) -> (i32, i32) {
    %c0_i32 = arith.constant 0 : i32
    %c0_i32_0 = arith.constant 0 : i32
    return %arg0, %c0_i32 : i32, i32
  }
}

module attributes {stable_mosaic.version = 11 : i64} {
  func.func @_matmul_bias_relu_kernel(%arg0: i32, %arg1: memref<32x576xbf16, #tpu.memory_space<vmem>>, %arg2: memref<576x64xbf16, #tpu.memory_space<vmem>>, %arg3: memref<1x64xf32, #tpu.memory_space<vmem>>, %arg4: memref<32x64xbf16, #tpu.memory_space<vmem>>) attributes {dimension_semantics = [#tpu.dimension_semantics<parallel>], iteration_bounds = array<i64: 4>, scalar_prefetch = 0 : i64, scratch_operands = 0 : i64, tpu.core_type = #tpu.core_type<tc>, window_params = [{transform_indices = @transform_0, window_bounds = array<i64: 32, 576>}, {pipeline_mode = #tpu.pipeline_mode<synchronous>, transform_indices = @transform_1, window_bounds = array<i64: 576, 64>}, {pipeline_mode = #tpu.pipeline_mode<synchronous>, transform_indices = @transform_2, window_bounds = array<i64: 1, 64>}, {transform_indices = @transform_3, window_bounds = array<i64: 32, 64>}]} {
    %c0 = arith.constant 0 : index
    %c0_0 = arith.constant 0 : index
    %0 = vector.load %arg1[%c0, %c0_0] : memref<32x576xbf16, #tpu.memory_space<vmem>>, vector<32x576xbf16>
    %c0_1 = arith.constant 0 : index
    %c0_2 = arith.constant 0 : index
    %1 = vector.load %arg2[%c0_1, %c0_2] : memref<576x64xbf16, #tpu.memory_space<vmem>>, vector<576x64xbf16>
    %cst = arith.constant dense<0.000000e+00> : vector<32x64xf32>
    %2 = tpu.matmul %0, %1, %cst {dimension_numbers = #tpu.dot_dimension_numbers<[1], [0], [0], [1], [0, 0, 1, 1], [], []>} : vector<32x576xbf16>, vector<576x64xbf16>, vector<32x64xf32> -> vector<32x64xf32>
    %c0_3 = arith.constant 0 : index
    %c0_4 = arith.constant 0 : index
    %3 = vector.load %arg3[%c0_3, %c0_4] : memref<1x64xf32, #tpu.memory_space<vmem>>, vector<1x64xf32>
    %4 = vector.broadcast %3 : vector<1x64xf32> to vector<32x64xf32>
    %5 = arith.addf %2, %4 : vector<32x64xf32>
    %cst_5 = arith.constant 0.000000e+00 : f32
    %6 = vector.broadcast %cst_5 : f32 to vector<32x64xf32>
    %7 = arith.maximumf %5, %6 : vector<32x64xf32>
    %8 = arith.truncf %7 : vector<32x64xf32> to vector<32x64xbf16>
    %c0_6 = arith.constant 0 : index
    %c0_7 = arith.constant 0 : index
    %9 = vector.load %arg4[%c0_6, %c0_7] : memref<32x64xbf16, #tpu.memory_space<vmem>>, vector<32x64xbf16>
    tpu.vector_store %arg4[%c0_6, %c0_7], %8 {strides = array<i32>} : memref<32x64xbf16, #tpu.memory_space<vmem>>, vector<32x64xbf16>,
    return
  }
  func.func @transform_0(%arg0: i32) -> (i32, i32) {
    %c0_i32 = arith.constant 0 : i32
    %c0_i32_0 = arith.constant 0 : i32
    return %arg0, %c0_i32 : i32, i32
  }
  func.func @transform_1(%arg0: i32) -> (i32, i32) {
    %c0_i32 = arith.constant 0 : i32
    %c0_i32_0 = arith.constant 0 : i32
    %c0_i32_1 = arith.constant 0 : i32
    return %c0_i32, %c0_i32_0 : i32, i32
  }
  func.func @transform_2(%arg0: i32) -> (i32, i32) {
    %c0_i32 = arith.constant 0 : i32
    %c0_i32_0 = arith.constant 0 : i32
    %c0_i32_1 = arith.constant 0 : i32
    return %c0_i32, %c0_i32_0 : i32, i32
  }
  func.func @transform_3(%arg0: i32) -> (i32, i32) {
    %c0_i32 = arith.constant 0 : i32
    %c0_i32_0 = arith.constant 0 : i32
    return %arg0, %c0_i32 : i32, i32
  }
}

module attributes {stable_mosaic.version = 11 : i64} {
  func.func @_fc_fused_kernel(%arg0: i32, %arg1: memref<16x3136xbf16, #tpu.memory_space<vmem>>, %arg2: memref<3136x512xbf16, #tpu.memory_space<vmem>>, %arg3: memref<1x512xf32, #tpu.memory_space<vmem>>, %arg4: memref<512x8xbf16, #tpu.memory_space<vmem>>, %arg5: memref<1x8xf32, #tpu.memory_space<vmem>>, %arg6: memref<16x8xf32, #tpu.memory_space<vmem>>) attributes {dimension_semantics = [#tpu.dimension_semantics<parallel>], iteration_bounds = array<i64: 1>, scalar_prefetch = 0 : i64, scratch_operands = 0 : i64, tpu.core_type = #tpu.core_type<tc>, window_params = [{transform_indices = @transform_0, window_bounds = array<i64: 16, 3136>}, {pipeline_mode = #tpu.pipeline_mode<synchronous>, transform_indices = @transform_1, window_bounds = array<i64: 3136, 512>}, {pipeline_mode = #tpu.pipeline_mode<synchronous>, transform_indices = @transform_2, window_bounds = array<i64: 1, 512>}, {pipeline_mode = #tpu.pipeline_mode<synchronous>, transform_indices = @transform_3, window_bounds = array<i64: 512, 8>}, {pipeline_mode = #tpu.pipeline_mode<synchronous>, transform_indices = @transform_4, window_bounds = array<i64: 1, 8>}, {transform_indices = @transform_5, window_bounds = array<i64: 16, 8>}]} {
    %c0 = arith.constant 0 : index
    %c0_0 = arith.constant 0 : index
    %0 = vector.load %arg1[%c0, %c0_0] : memref<16x3136xbf16, #tpu.memory_space<vmem>>, vector<16x3136xbf16>
    %c0_1 = arith.constant 0 : index
    %c0_2 = arith.constant 0 : index
    %1 = vector.load %arg2[%c0_1, %c0_2] : memref<3136x512xbf16, #tpu.memory_space<vmem>>, vector<3136x512xbf16>
    %cst = arith.constant dense<0.000000e+00> : vector<16x512xf32>
    %2 = tpu.matmul %0, %1, %cst {dimension_numbers = #tpu.dot_dimension_numbers<[1], [0], [0], [1], [0, 0, 1, 1], [], []>} : vector<16x3136xbf16>, vector<3136x512xbf16>, vector<16x512xf32> -> vector<16x512xf32>
    %c0_3 = arith.constant 0 : index
    %c0_4 = arith.constant 0 : index
    %3 = vector.load %arg3[%c0_3, %c0_4] : memref<1x512xf32, #tpu.memory_space<vmem>>, vector<1x512xf32>
    %4 = vector.broadcast %3 : vector<1x512xf32> to vector<16x512xf32>
    %5 = arith.addf %2, %4 : vector<16x512xf32>
    %cst_5 = arith.constant 0.000000e+00 : f32
    %6 = vector.broadcast %cst_5 : f32 to vector<16x512xf32>
    %7 = arith.maximumf %5, %6 : vector<16x512xf32>
    %8 = arith.truncf %7 : vector<16x512xf32> to vector<16x512xbf16>
    %c0_6 = arith.constant 0 : index
    %c0_7 = arith.constant 0 : index
    %9 = vector.load %arg4[%c0_6, %c0_7] : memref<512x8xbf16, #tpu.memory_space<vmem>>, vector<512x8xbf16>
    %cst_8 = arith.constant dense<0.000000e+00> : vector<16x8xf32>
    %10 = tpu.matmul %8, %9, %cst_8 {dimension_numbers = #tpu.dot_dimension_numbers<[1], [0], [0], [1], [0, 0, 1, 1], [], []>} : vector<16x512xbf16>, vector<512x8xbf16>, vector<16x8xf32> -> vector<16x8xf32>
    %c0_9 = arith.constant 0 : index
    %c0_10 = arith.constant 0 : index
    %11 = vector.load %arg5[%c0_9, %c0_10] : memref<1x8xf32, #tpu.memory_space<vmem>>, vector<1x8xf32>
    %12 = vector.broadcast %11 : vector<1x8xf32> to vector<16x8xf32>
    %13 = arith.addf %10, %12 : vector<16x8xf32>
    %c0_11 = arith.constant 0 : index
    %c0_12 = arith.constant 0 : index
    %14 = vector.load %arg6[%c0_11, %c0_12] : memref<16x8xf32, #tpu.memory_space<vmem>>, vector<16x8xf32>
    tpu.vector_store %arg6[%c0_11, %c0_12], %13 {strides = array<i32>} : memref<16x8xf32, #tpu.memory_space<vmem>>, vector<16x8xf32>,
    return
  }
  func.func @transform_0(%arg0: i32) -> (i32, i32) {
    %c0_i32 = arith.constant 0 : i32
    %c0_i32_0 = arith.constant 0 : i32
    return %arg0, %c0_i32 : i32, i32
  }
  func.func @transform_1(%arg0: i32) -> (i32, i32) {
    %c0_i32 = arith.constant 0 : i32
    %c0_i32_0 = arith.constant 0 : i32
    %c0_i32_1 = arith.constant 0 : i32
    return %c0_i32, %c0_i32_0 : i32, i32
  }
  func.func @transform_2(%arg0: i32) -> (i32, i32) {
    %c0_i32 = arith.constant 0 : i32
    %c0_i32_0 = arith.constant 0 : i32
    %c0_i32_1 = arith.constant 0 : i32
    return %c0_i32, %c0_i32_0 : i32, i32
  }
  func.func @transform_3(%arg0: i32) -> (i32, i32) {
    %c0_i32 = arith.constant 0 : i32
    %c0_i32_0 = arith.constant 0 : i32
    %c0_i32_1 = arith.constant 0 : i32
    return %c0_i32, %c0_i32_0 : i32, i32
  }
  func.func @transform_4(%arg0: i32) -> (i32, i32) {
    %c0_i32 = arith.constant 0 : i32
    %c0_i32_0 = arith.constant 0 : i32
    %c0_i32_1 = arith.constant 0 : i32
    return %c0_i32, %c0_i32_0 : i32, i32
  }
  func.func @transform_5(%arg0: i32) -> (i32, i32) {
    %c0_i32 = arith.constant 0 : i32
    %c0_i32_0 = arith.constant 0 : i32
    return %arg0, %c0_i32 : i32, i32
  }
}

</mosaic_0001>

<bundles_post_ra>
// kernel: mario_net_forward.4
= control target key start
LH: loop header
LB: loop body
LE: loop exit
PB: predicated region body
PF: predicated region fallthrough
CT: control target
= control target key end

     0   :  { %s1126_s12 = smov 0   ;;  %s1308_s0 = inlined_call_operand.vmem [shape: bf16[832,256], index: 0, kind: input, shape index: {}]   ;;  %s1309_s1 = inlined_call_operand.vmem [shape: bf16[256,32], index: 1, kind: input, shape index: {}]   ;;  %s1310_s2 = inlined_call_operand.vmem [shape: f32[1,32], index: 2, kind: input, shape index: {}]   ;;  %s1311_s3 = inlined_call_operand.vmem [shape: bf16[832,32], index: 3, kind: output, shape index: {}]  }
   0x1 LB: > { %s819_s13 = sadd.s32 4294967295, %s1104_s12   ;;  %p823_p0 = scmp.ge.s32.totalorder %s1104_s12, 1  ;;  %s1104_s12 = sphi %s1126_s12, %s13_s12  }
   0x2   : > { %p139_p1 = scmp.lt.s32.totalorder %s1104_s12, 5 }
   0x4   : > { %p140_p2 = pnand %p823_p0, %p139_p1 }
   0x5   : > { %v1043_v0 = vld [vmem:[%s1309_s1 + $0x40] sm:$0xff] (!%p140_p2)   ;;  %s164_s16 = smul.u32 (!%p140_p2), 26, %s819_s13  ;;  %v1045_v2 = vld [vmem:[%s1309_s1 + $0x48] sm:$0xff] (!%p140_p2)   ;;  %v1047_v4 = vld [vmem:[%s1309_s1 + $0x50] sm:$0xff] (!%p140_p2)   ;;  %vm736_vm0 = vcmask (!%p140_p2), 257024  }
   0x6   : > { %143 = sbr.rel (%p140_p2) target bundleno = 310 (0x136), region = 32  ;;  %v1044_v1 = vld [vmem:[%s1309_s1] sm:$0xff] (!%p140_p2)   ;;  %925 = vmatprep.subr.bf16.mxu0 (!%p140_p2), %v1043_v0  ;;  %1019 = vmatprep.subr.bf16.mxu1 (!%p140_p2), %v1043_v0  ;;  %v1046_v3 = vld [vmem:[%s1309_s1 + $0x8] sm:$0xff] (!%p140_p2)   ;;  %v1048_v5 = vld [vmem:[%s1309_s1 + $0x10] sm:$0xff] (!%p140_p2)  }
   0x7   : > { %926 = vmatpush3.bf16.msra.mxu0 (!%p140_p2), %v1044_v1  ;;  %1027 = vmatpush3.bf16.msra.mxu1 (!%p140_p2), %v1044_v1  ;;  %p165_p3 = scmp.lt.s32.totalorder (!%p140_p2), %s164_s16, 103  ;;  %v1049_v6 = vld [vmem:[%s1309_s1 + $0x58] sm:$0xff] (!%p140_p2)   ;;  %v1051_v8 = vld [vmem:[%s1309_s1 + $0x60] sm:$0xff] (!%p140_p2)   ;;  %v1053_v10 = vld [vmem:[%s1309_s1 + $0x68] sm:$0xff] (!%p140_p2)  }
   0x8   : > { %927 = vmatprep.subr.bf16.mxu0 (!%p140_p2), %v1045_v2  ;;  %1020 = vmatprep.subr.bf16.mxu1 (!%p140_p2), %v1045_v2  ;;  %v1050_v7 = vld [vmem:[%s1309_s1 + $0x18] sm:$0xff] (!%p140_p2)   ;;  %v1052_v9 = vld [vmem:[%s1309_s1 + $0x20] sm:$0xff] (!%p140_p2)   ;;  %v1054_v13 = vld [vmem:[%s1309_s1 + $0x28] sm:$0xff] (!%p140_p2)  }
   0x9   : > { %v1055_v14 = vld [vmem:[%s1309_s1 + $0x70] sm:$0xff] (!%p140_p2)   ;;  %v1057_v16 = vld [vmem:[%s1309_s1 + $0x78] sm:$0xff] (!%p140_p2)   ;;  %v1219_v44 = vld [vmem:[%s1310_s2] ss:$0 sm:$0xff] (!%p140_p2) }
   0xa   : > { %v1056_v15 = vld [vmem:[%s1309_s1 + $0x30] sm:$0xff] (!%p140_p2)   ;;  %v1058_v17 = vld [vmem:[%s1309_s1 + $0x38] sm:$0xff] (!%p140_p2)  }
   0xb   : > { %928 = vmatpush3.bf16.msra.mxu0 (!%p140_p2), %v1046_v3  ;;  %1028 = vmatpush3.bf16.msra.mxu1 (!%p140_p2), %v1046_v3 }
   0xc   : > { %929 = vmatprep.subr.bf16.mxu0 (!%p140_p2), %v1047_v4  ;;  %1021 = vmatprep.subr.bf16.mxu1 (!%p140_p2), %v1047_v4 }
   0xd   : > { %s1313_s16 = smov (!%p165_p3, %s164_s16), 103 }
   0xe   : > { %s898_s4 = sshll.u32 %s1313_s16, 3  ;;  %s826_s28 = sshll.u32 %s1313_s16, 2 }
   0xf   : > { %930 = vmatpush3.bf16.msra.mxu0 %v1048_v5  ;;  %1029 = vmatpush3.bf16.msra.mxu1 %v1048_v5  ;;  %s1167_s9 = scalar_lea.vmem %s1308_s0, %s898_s4  ;;  %s1229_s4 = scalar_lea.vmem %s1311_s3, %s826_s28 }
  0x10   : > { %931 = vmatprep.subr.bf16.mxu0 %v1049_v6  ;;  %1022 = vmatprep.subr.bf16.mxu1 %v1049_v6  ;;  %v1061_v11 = vld [vmem:[%s1167_s9 + $0x4] ss:$8 sps:$4 sm:$0xff]   ;;  %v1064_v12 = vld [vmem:[%s1167_s9 + $0x74] ss:$8 sps:$4 sm:$0xff]   ;;  %v1059_v18 = vld [vmem:[%s1167_s9] ss:$8 sps:$4 sm:$0xff]  }
  0x11   : > { %501 = vmatprep.mubr.bf16.mxu0 %v1061_v11  ;;  %557 = vmatprep.mubr.bf16.mxu1 %v1064_v12  ;;  %v1062_v19 = vld [vmem:[%s1167_s9 + $0x70] ss:$8 sps:$4 sm:$0xff]   ;;  %v1065_v20 = vld [vmem:[%s1167_s9 + $0x14] ss:$8 sps:$4 sm:$0xff]   ;;  %v1068_v21 = vld [vmem:[%s1167_s9 + $0x84] ss:$8 sps:$4 sm:$0xff]  }
  0x12   : > { %v1067_v22 = vld [vmem:[%s1167_s9 + $0x10] ss:$8 sps:$4 sm:$0xff]   ;;  %v1070_v23 = vld [vmem:[%s1167_s9 + $0x80] ss:$8 sps:$4 sm:$0xff]   ;;  %v1071_v24 = vld [vmem:[%s1167_s9 + $0x24] ss:$8 sps:$4 sm:$0xff]  }
  0x13   : > { %932 = vmatpush3.bf16.msra.mxu0 %v1050_v7  ;;  %1030 = vmatpush3.bf16.msra.mxu1 %v1050_v7  ;;  %v1074_v25 = vld [vmem:[%s1167_s9 + $0x94] ss:$8 sps:$4 sm:$0xff]   ;;  %v1073_v26 = vld [vmem:[%s1167_s9 + $0x20] ss:$8 sps:$4 sm:$0xff]   ;;  %v1076_v27 = vld [vmem:[%s1167_s9 + $0x90] ss:$8 sps:$4 sm:$0xff]  }
  0x14   : > { %933 = vmatprep.subr.bf16.mxu0 %v1051_v8  ;;  %1023 = vmatprep.subr.bf16.mxu1 %v1051_v8  ;;  %v1077_v28 = vld [vmem:[%s1167_s9 + $0x34] ss:$8 sps:$4 sm:$0xff]   ;;  %v1080_v29 = vld [vmem:[%s1167_s9 + $0xa4] ss:$8 sps:$4 sm:$0xff]   ;;  %v1079_v30 = vld [vmem:[%s1167_s9 + $0x30] ss:$8 sps:$4 sm:$0xff]  }
  0x15   : > { %v1082_v31 = vld [vmem:[%s1167_s9 + $0xa0] ss:$8 sps:$4 sm:$0xff]   ;;  %v1083_v32 = vld [vmem:[%s1167_s9 + $0x44] ss:$8 sps:$4 sm:$0xff]   ;;  %v1086_v33 = vld [vmem:[%s1167_s9 + $0xb4] ss:$8 sps:$4 sm:$0xff]  }
  0x16   : > { %v1085_v34 = vld [vmem:[%s1167_s9 + $0x40] ss:$8 sps:$4 sm:$0xff]   ;;  %v1088_v35 = vld [vmem:[%s1167_s9 + $0xb0] ss:$8 sps:$4 sm:$0xff]   ;;  %v1089_v36 = vld [vmem:[%s1167_s9 + $0x54] ss:$8 sps:$4 sm:$0xff]  }
  0x17   : > { %934 = vmatpush3.bf16.msra.mxu0 %v1052_v9  ;;  %1031 = vmatpush3.bf16.msra.mxu1 %v1052_v9  ;;  %v1092_v37 = vld [vmem:[%s1167_s9 + $0xc4] ss:$8 sps:$4 sm:$0xff]   ;;  %v1091_v38 = vld [vmem:[%s1167_s9 + $0x50] ss:$8 sps:$4 sm:$0xff]   ;;  %v1094_v39 = vld [vmem:[%s1167_s9 + $0xc0] ss:$8 sps:$4 sm:$0xff]  }
  0x18   : > { %935 = vmatprep.subr.bf16.mxu0 %v1053_v10  ;;  %1024 = vmatprep.subr.bf16.mxu1 %v1053_v10  ;;  %v1095_v40 = vld [vmem:[%s1167_s9 + $0x64] ss:$8 sps:$4 sm:$0xff]   ;;  %v1097_v41 = vld [vmem:[%s1167_s9 + $0x60] ss:$8 sps:$4 sm:$0xff]  }
  0x1b   : > { %936 = vmatpush3.bf16.msra.mxu0 %v1054_v13  ;;  %1032 = vmatpush3.bf16.msra.mxu1 %v1054_v13 }
  0x1c   : > { %937 = vmatprep.subr.bf16.mxu0 %v1055_v14  ;;  %1025 = vmatprep.subr.bf16.mxu1 %v1055_v14 }
  0x1f   : > { %938 = vmatpush3.bf16.msra.mxu0 %v1056_v15  ;;  %1033 = vmatpush3.bf16.msra.mxu1 %v1056_v15 }
  0x20   : > { %939 = vmatprep.subr.bf16.mxu0 %v1057_v16  ;;  %1026 = vmatprep.subr.bf16.mxu1 %v1057_v16 }
  0x23   : > { %940 = vmatpush3.bf16.msra.mxu0 %v1058_v17  ;;  %1034 = vmatpush3.bf16.msra.mxu1 %v1058_v17 }
  0x26   : > { %502 = vmatmul.mubr.bf16.vlgmr.msra.gmra.mrb[0].mxu0 %v1059_v18  ;;  %558 = vmatmul.mubr.bf16.vlgmr.msra.gmra.mrb[0].mxu1 %v1062_v19 }
  0x27   : > { %509 = vmatprep.mubr.bf16.mxu0 %v1065_v20  ;;  %565 = vmatprep.mubr.bf16.mxu1 %v1068_v21 }
  0x2e   : > { %510 = vmatmul.mubr.bf16.gmra.mrb[4].mxu0 %v1067_v22  ;;  %566 = vmatmul.mubr.bf16.gmra.mrb[4].mxu1 %v1070_v23 }
  0x2f   : > { %517 = vmatprep.mubr.bf16.mxu0 %v1071_v24  ;;  %573 = vmatprep.mubr.bf16.mxu1 %v1074_v25 }
  0x36   : > { %518 = vmatmul.mubr.bf16.gmra.mrb[8].mxu0 %v1073_v26  ;;  %574 = vmatmul.mubr.bf16.gmra.mrb[8].mxu1 %v1076_v27 }
  0x37   : > { %525 = vmatprep.mubr.bf16.mxu0 %v1077_v28  ;;  %581 = vmatprep.mubr.bf16.mxu1 %v1080_v29 }
  0x3e   : > { %526 = vmatmul.mubr.bf16.gmra.mrb[12].mxu0 %v1079_v30  ;;  %582 = vmatmul.mubr.bf16.gmra.mrb[12].mxu1 %v1082_v31 }
  0x3f   : > { %533 = vmatprep.mubr.bf16.mxu0 %v1083_v32  ;;  %589 = vmatprep.mubr.bf16.mxu1 %v1086_v33 }
  0x46   : > { %534 = vmatmul.mubr.bf16.gmra.mrb[16].mxu0 %v1085_v34  ;;  %590 = vmatmul.mubr.bf16.gmra.mrb[16].mxu1 %v1088_v35 }
  0x47   : > { %541 = vmatprep.mubr.bf16.mxu0 %v1089_v36  ;;  %597 = vmatprep.mubr.bf16.mxu1 %v1092_v37 }
  0x4e   : > { %542 = vmatmul.mubr.bf16.gmra.mrb[20].mxu0 %v1091_v38  ;;  %598 = vmatmul.mubr.bf16.gmra.mrb[20].mxu1 %v1094_v39 }
  0x4f   : > { %549 = vmatprep.mubr.bf16.mxu0 %v1095_v40 }
  0x56   : > { %550 = vmatmul.mubr.bf16.gmra.mrb[24].mxu0 %v1097_v41 }
  0xf9   : > { %v941_v42 = vpop.f32.mrb[0].mxu0  ;;  %v983_v43 = vpop.f32.mrb[0].mxu1 }
  0xfa   : > { %v942_v45 = vpop.f32.mrb[1].mxu0  ;;  %v984_v46 = vpop.f32.mrb[1].mxu1 }
  0xfb   : > { %v943_v47 = vadd.f32 %v942_v45, %v941_v42  ;;  %v944_v48 = vpop.f32.mrb[2].mxu0  ;;  %v985_v49 = vadd.f32 %v984_v46, %v983_v43  ;;  %v986_v50 = vpop.f32.mrb[2].mxu1 }
  0xfc   : > { %v945_v51 = vpop.f32.mrb[3].mxu0  ;;  %v987_v52 = vpop.f32.mrb[3].mxu1 }
  0xfd   : > { %v504_v53 = vadd.f32 %v943_v47, %v1219_v44  ;;  %v946_v54 = vadd.f32 %v945_v51, %v944_v48  ;;  %v560_v55 = vadd.f32 %v985_v49, %v1219_v44  ;;  %v988_v56 = vadd.f32 %v987_v52, %v986_v50 }
  0xff   : > { %v606_v57 = vmax.f32 %v504_v53, 0.0  ;;  %v507_v58 = vadd.f32 %v946_v54, %v1219_v44  ;;  %v620_v59 = vmax.f32 %v560_v55, 0.0  ;;  %v563_v60 = vadd.f32 %v988_v56, %v1219_v44 }
 0x101   : > { %v899_v61 = vpack.c.bf16 %v606_v57, %v606_v57  ;;  %v607_v62 = vmax.f32 %v507_v58, 0.0  ;;  %v913_v63 = vpack.c.bf16 %v620_v59, %v620_v59  ;;  %v947_v0 = vpop.f32.mrb[4].mxu0  ;;  %v621_v1 = vmax.f32 %v563_v60, 0.0  ;;  %v989_v2 = vpop.f32.mrb[4].mxu1 }
 0x102   : > { %v948_v3 = vpop.f32.mrb[5].mxu0  ;;  %v990_v4 = vpop.f32.mrb[5].mxu1 }
 0x103   : > { %737 = vst.msk [vmem:[%s1229_s4] sm:$0xf] %vm736_vm0, %v899_v61  ;;  %v900_v5 = vpack.c.bf16 %v607_v62, %v607_v62  ;;  %751 = vst.msk [vmem:[%s1229_s4 + $0x38] sm:$0xf] %vm736_vm0, %v913_v63  ;;  %v914_v6 = vpack.c.bf16 %v621_v1, %v621_v1  ;;  %v949_v7 = vadd.f32 %v948_v3, %v947_v0  ;;  %v950_v8 = vpop.f32.mrb[6].mxu0  ;;  %v992_v10 = vpop.f32.mrb[6].mxu1 }
 0x104   : > { %v991_v9 = vadd.f32 %v990_v4, %v989_v2  ;;  %v951_v11 = vpop.f32.mrb[7].mxu0  ;;  %v993_v12 = vpop.f32.mrb[7].mxu1 }
 0x105   : > { %738 = vst.msk [vmem:[%s1229_s4 + $0x4] sm:$0xf] %vm736_vm0, %v900_v5  ;;  %752 = vst.msk [vmem:[%s1229_s4 + $0x3c] sm:$0xf] %vm736_vm0, %v914_v6  ;;  %v512_v13 = vadd.f32 %v949_v7, %v1219_v44  ;;  %v952_v14 = vadd.f32 %v951_v11, %v950_v8  ;;  %v994_v16 = vadd.f32 %v993_v12, %v992_v10 }
 0x106   : > { %v568_v15 = vadd.f32 %v991_v9, %v1219_v44 }
 0x107   : > { %v608_v17 = vmax.f32 %v512_v13, 0.0  ;;  %v515_v18 = vadd.f32 %v952_v14, %v1219_v44  ;;  %v571_v20 = vadd.f32 %v994_v16, %v1219_v44 }
 0x108   : > { %v622_v19 = vmax.f32 %v568_v15, 0.0 }
 0x109   : > { %v901_v21 = vpack.c.bf16 %v608_v17, %v608_v17  ;;  %v609_v22 = vmax.f32 %v515_v18, 0.0  ;;  %v953_v24 = vpop.f32.mrb[8].mxu0  ;;  %v623_v25 = vmax.f32 %v571_v20, 0.0  ;;  %v995_v26 = vpop.f32.mrb[8].mxu1 }
 0x10a   : > { %v915_v23 = vpack.c.bf16 %v622_v19, %v622_v19  ;;  %v954_v27 = vpop.f32.mrb[9].mxu0  ;;  %v996_v28 = vpop.f32.mrb[9].mxu1 }
 0x10b   : > { %739 = vst.msk [vmem:[%s1229_s4 + $0x8] sm:$0xf] %vm736_vm0, %v901_v21  ;;  %v902_v29 = vpack.c.bf16 %v609_v22, %v609_v22  ;;  %v916_v30 = vpack.c.bf16 %v623_v25, %v623_v25  ;;  %v955_v31 = vadd.f32 %v954_v27, %v953_v24  ;;  %v956_v32 = vpop.f32.mrb[10].mxu0  ;;  %v997_v33 = vadd.f32 %v996_v28, %v995_v26  ;;  %v998_v34 = vpop.f32.mrb[10].mxu1 }
 0x10c   : > { %753 = vst.msk [vmem:[%s1229_s4 + $0x40] sm:$0xf] %vm736_vm0, %v915_v23  ;;  %v957_v35 = vpop.f32.mrb[11].mxu0  ;;  %v999_v36 = vpop.f32.mrb[11].mxu1 }
 0x10d   : > { %740 = vst.msk [vmem:[%s1229_s4 + $0xc] sm:$0xf] %vm736_vm0, %v902_v29  ;;  %754 = vst.msk [vmem:[%s1229_s4 + $0x44] sm:$0xf] %vm736_vm0, %v916_v30  ;;  %v520_v37 = vadd.f32 %v955_v31, %v1219_v44  ;;  %v958_v38 = vadd.f32 %v957_v35, %v956_v32  ;;  %v576_v39 = vadd.f32 %v997_v33, %v1219_v44 }
 0x10e   : > { %v1000_v40 = vadd.f32 %v999_v36, %v998_v34 }
 0x10f   : > { %v610_v41 = vmax.f32 %v520_v37, 0.0  ;;  %v523_v42 = vadd.f32 %v958_v38, %v1219_v44  ;;  %v624_v43 = vmax.f32 %v576_v39, 0.0 }
 0x110   : > { %v579_v45 = vadd.f32 %v1000_v40, %v1219_v44 }
 0x111   : > { %v903_v46 = vpack.c.bf16 %v610_v41, %v610_v41  ;;  %v611_v47 = vmax.f32 %v523_v42, 0.0  ;;  %v917_v48 = vpack.c.bf16 %v624_v43, %v624_v43  ;;  %v959_v49 = vpop.f32.mrb[12].mxu0  ;;  %v1001_v51 = vpop.f32.mrb[12].mxu1 }
 0x112   : > { %v625_v50 = vmax.f32 %v579_v45, 0.0  ;;  %v960_v52 = vpop.f32.mrb[13].mxu0  ;;  %v1002_v53 = vpop.f32.mrb[13].mxu1 }
 0x113   : > { %741 = vst.msk [vmem:[%s1229_s4 + $0x10] sm:$0xf] %vm736_vm0, %v903_v46  ;;  %v904_v54 = vpack.c.bf16 %v611_v47, %v611_v47  ;;  %755 = vst.msk [vmem:[%s1229_s4 + $0x48] sm:$0xf] %vm736_vm0, %v917_v48  ;;  %v961_v56 = vadd.f32 %v960_v52, %v959_v49  ;;  %v962_v57 = vpop.f32.mrb[14].mxu0  ;;  %v1003_v58 = vadd.f32 %v1002_v53, %v1001_v51  ;;  %v1004_v59 = vpop.f32.mrb[14].mxu1 }
 0x114   : > { %v918_v55 = vpack.c.bf16 %v625_v50, %v625_v50  ;;  %v963_v60 = vpop.f32.mrb[15].mxu0  ;;  %v1005_v61 = vpop.f32.mrb[15].mxu1 }
 0x115   : > { %742 = vst.msk [vmem:[%s1229_s4 + $0x14] sm:$0xf] %vm736_vm0, %v904_v54  ;;  %v528_v62 = vadd.f32 %v961_v56, %v1219_v44  ;;  %v964_v63 = vadd.f32 %v963_v60, %v962_v57  ;;  %v584_v0 = vadd.f32 %v1003_v58, %v1219_v44  ;;  %v1006_v1 = vadd.f32 %v1005_v61, %v1004_v59 }
 0x116   : > { %756 = vst.msk [vmem:[%s1229_s4 + $0x4c] sm:$0xf] %vm736_vm0, %v918_v55 }
 0x117   : > { %v612_v2 = vmax.f32 %v528_v62, 0.0  ;;  %v531_v3 = vadd.f32 %v964_v63, %v1219_v44  ;;  %v626_v4 = vmax.f32 %v584_v0, 0.0  ;;  %v587_v5 = vadd.f32 %v1006_v1, %v1219_v44 }
 0x119   : > { %v905_v6 = vpack.c.bf16 %v612_v2, %v612_v2  ;;  %v613_v7 = vmax.f32 %v531_v3, 0.0  ;;  %v919_v8 = vpack.c.bf16 %v626_v4, %v626_v4  ;;  %v965_v9 = vpop.f32.mrb[16].mxu0  ;;  %v627_v10 = vmax.f32 %v587_v5, 0.0  ;;  %v1007_v11 = vpop.f32.mrb[16].mxu1 }
 0x11a   : > { %v966_v12 = vpop.f32.mrb[17].mxu0  ;;  %v1008_v13 = vpop.f32.mrb[17].mxu1 }
 0x11b   : > { %743 = vst.msk [vmem:[%s1229_s4 + $0x18] sm:$0xf] %vm736_vm0, %v905_v6  ;;  %v906_v14 = vpack.c.bf16 %v613_v7, %v613_v7  ;;  %757 = vst.msk [vmem:[%s1229_s4 + $0x50] sm:$0xf] %vm736_vm0, %v919_v8  ;;  %v920_v15 = vpack.c.bf16 %v627_v10, %v627_v10  ;;  %v967_v16 = vadd.f32 %v966_v12, %v965_v9  ;;  %v968_v17 = vpop.f32.mrb[18].mxu0  ;;  %v1010_v19 = vpop.f32.mrb[18].mxu1 }
 0x11c   : > { %v1009_v18 = vadd.f32 %v1008_v13, %v1007_v11  ;;  %v969_v20 = vpop.f32.mrb[19].mxu0  ;;  %v1011_v21 = vpop.f32.mrb[19].mxu1 }
 0x11d   : > { %744 = vst.msk [vmem:[%s1229_s4 + $0x1c] sm:$0xf] %vm736_vm0, %v906_v14  ;;  %758 = vst.msk [vmem:[%s1229_s4 + $0x54] sm:$0xf] %vm736_vm0, %v920_v15  ;;  %v536_v22 = vadd.f32 %v967_v16, %v1219_v44  ;;  %v970_v23 = vadd.f32 %v969_v20, %v968_v17  ;;  %v1012_v25 = vadd.f32 %v1011_v21, %v1010_v19 }
 0x11e   : > { %v592_v24 = vadd.f32 %v1009_v18, %v1219_v44 }
 0x11f   : > { %v614_v26 = vmax.f32 %v536_v22, 0.0  ;;  %v539_v27 = vadd.f32 %v970_v23, %v1219_v44  ;;  %v595_v29 = vadd.f32 %v1012_v25, %v1219_v44 }
 0x120   : > { %v628_v28 = vmax.f32 %v592_v24, 0.0 }
 0x121   : > { %v907_v30 = vpack.c.bf16 %v614_v26, %v614_v26  ;;  %v615_v31 = vmax.f32 %v539_v27, 0.0  ;;  %v971_v33 = vpop.f32.mrb[20].mxu0  ;;  %v629_v34 = vmax.f32 %v595_v29, 0.0  ;;  %v1013_v35 = vpop.f32.mrb[20].mxu1 }
 0x122   : > { %v921_v32 = vpack.c.bf16 %v628_v28, %v628_v28  ;;  %v972_v36 = vpop.f32.mrb[21].mxu0  ;;  %v1014_v37 = vpop.f32.mrb[21].mxu1 }
 0x123   : > { %745 = vst.msk [vmem:[%s1229_s4 + $0x20] sm:$0xf] %vm736_vm0, %v907_v30  ;;  %v908_v38 = vpack.c.bf16 %v615_v31, %v615_v31  ;;  %v922_v39 = vpack.c.bf16 %v629_v34, %v629_v34  ;;  %v973_v40 = vadd.f32 %v972_v36, %v971_v33  ;;  %v974_v41 = vpop.f32.mrb[22].mxu0  ;;  %v1015_v42 = vadd.f32 %v1014_v37, %v1013_v35  ;;  %v1016_v43 = vpop.f32.mrb[22].mxu1 }
 0x124   : > { %759 = vst.msk [vmem:[%s1229_s4 + $0x58] sm:$0xf] %vm736_vm0, %v921_v32  ;;  %v975_v45 = vpop.f32.mrb[23].mxu0  ;;  %v1017_v46 = vpop.f32.mrb[23].mxu1 }
 0x125   : > { %746 = vst.msk [vmem:[%s1229_s4 + $0x24] sm:$0xf] %vm736_vm0, %v908_v38  ;;  %760 = vst.msk [vmem:[%s1229_s4 + $0x5c] sm:$0xf] %vm736_vm0, %v922_v39  ;;  %v544_v47 = vadd.f32 %v973_v40, %v1219_v44  ;;  %v976_v48 = vadd.f32 %v975_v45, %v974_v41  ;;  %v600_v49 = vadd.f32 %v1015_v42, %v1219_v44 }
 0x126   : > { %v1018_v50 = vadd.f32 %v1017_v46, %v1016_v43 }
 0x127   : > { %v616_v51 = vmax.f32 %v544_v47, 0.0  ;;  %v547_v52 = vadd.f32 %v976_v48, %v1219_v44  ;;  %v630_v53 = vmax.f32 %v600_v49, 0.0 }
 0x128   : > { %v603_v54 = vadd.f32 %v1018_v50, %v1219_v44 }
 0x129   : > { %v909_v55 = vpack.c.bf16 %v616_v51, %v616_v51  ;;  %v617_v56 = vmax.f32 %v547_v52, 0.0  ;;  %v923_v57 = vpack.c.bf16 %v630_v53, %v630_v53  ;;  %v977_v58 = vpop.f32.mrb[24].mxu0 }
 0x12a   : > { %v631_v59 = vmax.f32 %v603_v54, 0.0  ;;  %v978_v60 = vpop.f32.mrb[25].mxu0 }
 0x12b   : > { %747 = vst.msk [vmem:[%s1229_s4 + $0x28] sm:$0xf] %vm736_vm0, %v909_v55  ;;  %v910_v61 = vpack.c.bf16 %v617_v56, %v617_v56  ;;  %761 = vst.msk [vmem:[%s1229_s4 + $0x60] sm:$0xf] %vm736_vm0, %v923_v57  ;;  %v979_v63 = vadd.f32 %v978_v60, %v977_v58  ;;  %v980_v0 = vpop.f32.mrb[26].mxu0 }
 0x12c   : > { %v924_v62 = vpack.c.bf16 %v631_v59, %v631_v59  ;;  %v981_v1 = vpop.f32.mrb[27].mxu0 }
 0x12d   : > { %748 = vst.msk [vmem:[%s1229_s4 + $0x2c] sm:$0xf] %vm736_vm0, %v910_v61  ;;  %v552_v2 = vadd.f32 %v979_v63, %v1219_v44  ;;  %v982_v3 = vadd.f32 %v981_v1, %v980_v0 }
 0x12e   : > { %762 = vst.msk [vmem:[%s1229_s4 + $0x64] sm:$0xf] %vm736_vm0, %v924_v62 }
 0x12f   : > { %v618_v4 = vmax.f32 %v552_v2, 0.0  ;;  %v555_v5 = vadd.f32 %v982_v3, %v1219_v44 }
 0x131   : > { %v911_v6 = vpack.c.bf16 %v618_v4, %v618_v4  ;;  %v619_v7 = vmax.f32 %v555_v5, 0.0 }
 0x133   : > { %749 = vst.msk [vmem:[%s1229_s4 + $0x30] sm:$0xf] %vm736_vm0, %v911_v6  ;;  %v912_v8 = vpack.c.bf16 %v619_v7, %v619_v7 }
 0x135   : > { %750 = vst.msk [vmem:[%s1229_s4 + $0x34] sm:$0xf] %vm736_vm0, %v912_v8 }
 0x136 PF: > { %s13_s12 = sadd.s32 1, %s1104_s12  }
 0x137   : > { %p10_p4 = scmp.ge.s32.totalorder %s13_s12, 6  }
 0x139   :  { %12 = sbr.rel (!%p10_p4) target bundleno = 1 (0x1), region = 62 }

// kernel: mario_net_forward.5
= control target key start
LH: loop header
LB: loop body
LE: loop exit
PB: predicated region body
PF: predicated region fallthrough
CT: control target
= control target key end

     0   :  { %s942_s12 = smov 0   ;;  %s1078_s0 = inlined_call_operand.vmem [shape: bf16[192,512], index: 0, kind: input, shape index: {}]   ;;  %s1079_s1 = inlined_call_operand.vmem [shape: bf16[512,64], index: 1, kind: input, shape index: {}]   ;;  %s1080_s2 = inlined_call_operand.vmem [shape: f32[1,64], index: 2, kind: input, shape index: {}]   ;;  %s1081_s3 = inlined_call_operand.vmem [shape: bf16[192,64], index: 3, kind: output, shape index: {}]  }
   0x1 LB: > { %s720_s13 = sadd.s32 4294967295, %s920_s12   ;;  %p724_p0 = scmp.ge.s32.totalorder %s920_s12, 1  ;;  %s920_s12 = sphi %s942_s12, %s13_s12  }
   0x2   : > { %p139_p1 = scmp.lt.s32.totalorder %s920_s12, 5 }
   0x4   : > { %p140_p2 = pnand %p724_p0, %p139_p1 }
   0x5   : > { %v864_v0 = vld [vmem:[%s1079_s1 + $0x40] sm:$0xff] (!%p140_p2)   ;;  %v868_v4 = vld [vmem:[%s1079_s1 + $0x48] sm:$0xff] (!%p140_p2)   ;;  %v872_v8 = vld [vmem:[%s1079_s1 + $0x50] sm:$0xff] (!%p140_p2)   ;;  %s164_s19 = smul.u32 (!%p140_p2), 6, %s720_s13  ;;  %vm657_vm0 = vcmask (!%p140_p2), 519168  }
   0x6   : > { %143 = sbr.rel (%p140_p2) target bundleno = 281 (0x119), region = 32  ;;  %v865_v1 = vld [vmem:[%s1079_s1 + $0xc0] sm:$0xff] (!%p140_p2)   ;;  %788 = vmatprep.subr.bf16.mxu0 (!%p140_p2), %v864_v0  ;;  %v869_v5 = vld [vmem:[%s1079_s1 + $0xc8] sm:$0xff] (!%p140_p2)   ;;  %v873_v9 = vld [vmem:[%s1079_s1 + $0xd0] sm:$0xff] (!%p140_p2)  }
   0x7   : > { %v866_v2 = vld [vmem:[%s1079_s1] sm:$0xff] (!%p140_p2)   ;;  %822 = vmatprep.subr.bf16.mxu1 (!%p140_p2), %v865_v1  ;;  %v870_v6 = vld [vmem:[%s1079_s1 + $0x8] sm:$0xff] (!%p140_p2)   ;;  %v874_v10 = vld [vmem:[%s1079_s1 + $0x10] sm:$0xff] (!%p140_p2)   ;;  %p165_p3 = scmp.lt.s32.totalorder (!%p140_p2), %s164_s19, 23 }
   0x8   : > { %v867_v3 = vld [vmem:[%s1079_s1 + $0x80] sm:$0xff] (!%p140_p2)   ;;  %789 = vmatpush3.bf16.msra.mxu0 (!%p140_p2), %v866_v2  ;;  %v871_v7 = vld [vmem:[%s1079_s1 + $0x88] sm:$0xff] (!%p140_p2)   ;;  %v875_v11 = vld [vmem:[%s1079_s1 + $0x90] sm:$0xff] (!%p140_p2)  }
   0x9   : > { %823 = vmatpush3.bf16.msra.mxu1 (!%p140_p2), %v867_v3  ;;  %790 = vmatprep.subr.bf16.mxu0 (!%p140_p2), %v868_v4  ;;  %v876_v12 = vld [vmem:[%s1079_s1 + $0x58] sm:$0xff] (!%p140_p2)   ;;  %v880_v16 = vld [vmem:[%s1079_s1 + $0x60] sm:$0xff] (!%p140_p2)   ;;  %v884_v20 = vld [vmem:[%s1079_s1 + $0x68] sm:$0xff] (!%p140_p2)  }
   0xa   : > { %824 = vmatprep.subr.bf16.mxu1 (!%p140_p2), %v869_v5  ;;  %v877_v13 = vld [vmem:[%s1079_s1 + $0xd8] sm:$0xff] (!%p140_p2)   ;;  %v881_v17 = vld [vmem:[%s1079_s1 + $0xe0] sm:$0xff] (!%p140_p2)   ;;  %v885_v21 = vld [vmem:[%s1079_s1 + $0xe8] sm:$0xff] (!%p140_p2)  }
   0xb   : > { %v878_v14 = vld [vmem:[%s1079_s1 + $0x18] sm:$0xff] (!%p140_p2)   ;;  %v882_v18 = vld [vmem:[%s1079_s1 + $0x20] sm:$0xff] (!%p140_p2)   ;;  %v886_v22 = vld [vmem:[%s1079_s1 + $0x28] sm:$0xff] (!%p140_p2)  }
   0xc   : > { %791 = vmatpush3.bf16.msra.mxu0 (!%p140_p2), %v870_v6  ;;  %v879_v15 = vld [vmem:[%s1079_s1 + $0x98] sm:$0xff] (!%p140_p2)   ;;  %v883_v19 = vld [vmem:[%s1079_s1 + $0xa0] sm:$0xff] (!%p140_p2)   ;;  %v887_v23 = vld [vmem:[%s1079_s1 + $0xa8] sm:$0xff] (!%p140_p2)  }
   0xd   : > { %825 = vmatpush3.bf16.msra.mxu1 %v871_v7  ;;  %792 = vmatprep.subr.bf16.mxu0 %v872_v8  ;;  %s1083_s19 = smov (!%p165_p3, %s164_s19), 23  ;;  %v888_v24 = vld [vmem:[%s1079_s1 + $0x70] sm:$0xff]   ;;  %v892_v28 = vld [vmem:[%s1079_s1 + $0x78] sm:$0xff]   ;;  %v728_v46 = vld [vmem:[%s1080_s2] ss:$0 sm:$0xff] }
   0xe   : > { %826 = vmatprep.subr.bf16.mxu1 %v873_v9  ;;  %v889_v25 = vld [vmem:[%s1079_s1 + $0xf0] sm:$0xff]   ;;  %s781_s18 = sshll.u32 %s1083_s19, 4  ;;  %v893_v29 = vld [vmem:[%s1079_s1 + $0xf8] sm:$0xff]   ;;  %s727_s7 = sshll.u32 %s1083_s19, 2 }
   0xf   : > { %v890_v26 = vld [vmem:[%s1079_s1 + $0x30] sm:$0xff]   ;;  %s169_s13 = scalar_lea.vmem %s1078_s0, %s781_s18  ;;  %v894_v30 = vld [vmem:[%s1079_s1 + $0x38] sm:$0xff]   ;;  %s1061_s10 = scalar_lea.vmem %s1081_s3, %s727_s7 }
  0x10   : > { %793 = vmatpush3.bf16.msra.mxu0 %v874_v10  ;;  %v891_v27 = vld [vmem:[%s1079_s1 + $0xb0] sm:$0xff]   ;;  %v895_v31 = vld [vmem:[%s1079_s1 + $0xb8] sm:$0xff]  }
  0x11   : > { %827 = vmatpush3.bf16.msra.mxu1 %v875_v11  ;;  %794 = vmatprep.subr.bf16.mxu0 %v876_v12  ;;  %v896_v32 = vld [vmem:[%s169_s13] ss:$16 sps:$4 sm:$0xff]   ;;  %v898_v33 = vld [vmem:[%s169_s13 + $0x4] ss:$16 sps:$4 sm:$0xff]   ;;  %v899_v34 = vld [vmem:[%s169_s13 + $0x8] ss:$16 sps:$4 sm:$0xff]  }
  0x12   : > { %828 = vmatprep.subr.bf16.mxu1 %v877_v13  ;;  %v901_v35 = vld [vmem:[%s169_s13 + $0xc] ss:$16 sps:$4 sm:$0xff]   ;;  %545 = vmatprep.mubr.bf16.mxu0 %v898_v33  ;;  %v902_v36 = vld [vmem:[%s169_s13 + $0x24] ss:$16 sps:$4 sm:$0xff]   ;;  %v906_v38 = vld [vmem:[%s169_s13 + $0x20] ss:$16 sps:$4 sm:$0xff]  }
  0x13   : > { %602 = vmatprep.mubr.bf16.mxu1 %v901_v35  ;;  %v904_v37 = vld [vmem:[%s169_s13 + $0x2c] ss:$16 sps:$4 sm:$0xff]   ;;  %v907_v39 = vld [vmem:[%s169_s13 + $0x28] ss:$16 sps:$4 sm:$0xff]   ;;  %v908_v40 = vld [vmem:[%s169_s13 + $0x44] ss:$16 sps:$4 sm:$0xff]  }
  0x14   : > { %795 = vmatpush3.bf16.msra.mxu0 %v878_v14  ;;  %v910_v41 = vld [vmem:[%s169_s13 + $0x4c] ss:$16 sps:$4 sm:$0xff]   ;;  %v912_v42 = vld [vmem:[%s169_s13 + $0x40] ss:$16 sps:$4 sm:$0xff]   ;;  %v913_v43 = vld [vmem:[%s169_s13 + $0x48] ss:$16 sps:$4 sm:$0xff]  }
  0x15   : > { %829 = vmatpush3.bf16.msra.mxu1 %v879_v15  ;;  %796 = vmatprep.subr.bf16.mxu0 %v880_v16 }
  0x16   : > { %830 = vmatprep.subr.bf16.mxu1 %v881_v17 }
  0x18   : > { %797 = vmatpush3.bf16.msra.mxu0 %v882_v18 }
  0x19   : > { %831 = vmatpush3.bf16.msra.mxu1 %v883_v19  ;;  %798 = vmatprep.subr.bf16.mxu0 %v884_v20 }
  0x1a   : > { %832 = vmatprep.subr.bf16.mxu1 %v885_v21 }
  0x1c   : > { %799 = vmatpush3.bf16.msra.mxu0 %v886_v22 }
  0x1d   : > { %833 = vmatpush3.bf16.msra.mxu1 %v887_v23  ;;  %800 = vmatprep.subr.bf16.mxu0 %v888_v24 }
  0x1e   : > { %834 = vmatprep.subr.bf16.mxu1 %v889_v25 }
  0x20   : > { %801 = vmatpush3.bf16.msra.mxu0 %v890_v26 }
  0x21   : > { %835 = vmatpush3.bf16.msra.mxu1 %v891_v27  ;;  %802 = vmatprep.subr.bf16.mxu0 %v892_v28 }
  0x22   : > { %836 = vmatprep.subr.bf16.mxu1 %v893_v29 }
  0x24   : > { %803 = vmatpush3.bf16.msra.mxu0 %v894_v30 }
  0x25   : > { %837 = vmatpush3.bf16.msra.mxu1 %v895_v31 }
  0x27   : > { %546 = vmatmul.mubr.bf16.vlgmr.msra.gmra.mrb[0].mxu0 %v896_v32 }
  0x28   : > { %603 = vmatmul.mubr.bf16.vlgmr.msra.gmra.mrb[0].mxu1 %v899_v34  ;;  %553 = vmatprep.mubr.bf16.mxu0 %v902_v36 }
  0x29   : > { %610 = vmatprep.mubr.bf16.mxu1 %v904_v37 }
  0x2f   : > { %554 = vmatmul.mubr.bf16.gmra.mrb[4].mxu0 %v906_v38 }
  0x30   : > { %611 = vmatmul.mubr.bf16.gmra.mrb[4].mxu1 %v907_v39  ;;  %561 = vmatprep.mubr.bf16.mxu0 %v908_v40 }
  0x31   : > { %618 = vmatprep.mubr.bf16.mxu1 %v910_v41 }
  0x37   : > { %562 = vmatmul.mubr.bf16.gmra.mrb[8].mxu0 %v912_v42 }
  0x38   : > { %619 = vmatmul.mubr.bf16.gmra.mrb[8].mxu1 %v913_v43 }
  0xfa   : > { %v804_v44 = vpop.f32.mrb[0].mxu0 }
  0xfb   : > { %v838_v45 = vpop.f32.mrb[0].mxu1  ;;  %v805_v47 = vpop.f32.mrb[1].mxu0 }
  0xfc   : > { %v806_v48 = vadd.f32 %v805_v47, %v804_v44  ;;  %v839_v49 = vpop.f32.mrb[1].mxu1  ;;  %v807_v50 = vpop.f32.mrb[2].mxu0 }
  0xfd   : > { %v840_v51 = vadd.f32 %v839_v49, %v838_v45  ;;  %v841_v52 = vpop.f32.mrb[2].mxu1  ;;  %v808_v53 = vpop.f32.mrb[3].mxu0 }
  0xfe   : > { %v548_v54 = vadd.f32 %v806_v48, %v728_v46  ;;  %v809_v55 = vadd.f32 %v808_v53, %v807_v50  ;;  %v842_v56 = vpop.f32.mrb[3].mxu1 }
  0xff   : > { %v843_v57 = vadd.f32 %v842_v56, %v841_v52 }
 0x100   : > { %v605_v58 = vadd.f32 %v840_v51, %v548_v54  ;;  %v551_v59 = vadd.f32 %v809_v55, %v728_v46 }
 0x102   : > { %v627_v60 = vmax.f32 %v605_v58, 0.0  ;;  %v608_v61 = vadd.f32 %v843_v57, %v551_v59  ;;  %v810_v62 = vpop.f32.mrb[4].mxu0 }
 0x103   : > { %v844_v63 = vpop.f32.mrb[4].mxu1  ;;  %v811_v0 = vpop.f32.mrb[5].mxu0 }
 0x104   : > { %v782_v1 = vpack.c.bf16 %v627_v60, %v627_v60  ;;  %v628_v2 = vmax.f32 %v608_v61, 0.0  ;;  %v812_v3 = vadd.f32 %v811_v0, %v810_v62  ;;  %v845_v4 = vpop.f32.mrb[5].mxu1  ;;  %v813_v5 = vpop.f32.mrb[6].mxu0 }
 0x105   : > { %v846_v6 = vadd.f32 %v845_v4, %v844_v63  ;;  %v847_v7 = vpop.f32.mrb[6].mxu1  ;;  %v814_v8 = vpop.f32.mrb[7].mxu0 }
 0x106   : > { %658 = vst.msk [vmem:[%s1061_s10] sm:$0xf] %vm657_vm0, %v782_v1  ;;  %v783_v9 = vpack.c.bf16 %v628_v2, %v628_v2  ;;  %v556_v10 = vadd.f32 %v812_v3, %v728_v46  ;;  %v815_v11 = vadd.f32 %v814_v8, %v813_v5  ;;  %v848_v12 = vpop.f32.mrb[7].mxu1 }
 0x107   : > { %v849_v13 = vadd.f32 %v848_v12, %v847_v7 }
 0x108   : > { %659 = vst.msk [vmem:[%s1061_s10 + $0x4] sm:$0xf] %vm657_vm0, %v783_v9  ;;  %v613_v14 = vadd.f32 %v846_v6, %v556_v10  ;;  %v559_v15 = vadd.f32 %v815_v11, %v728_v46 }
 0x10a   : > { %v629_v16 = vmax.f32 %v613_v14, 0.0  ;;  %v616_v17 = vadd.f32 %v849_v13, %v559_v15  ;;  %v816_v18 = vpop.f32.mrb[8].mxu0 }
 0x10b   : > { %v850_v19 = vpop.f32.mrb[8].mxu1  ;;  %v817_v20 = vpop.f32.mrb[9].mxu0 }
 0x10c   : > { %v784_v21 = vpack.c.bf16 %v629_v16, %v629_v16  ;;  %v630_v22 = vmax.f32 %v616_v17, 0.0  ;;  %v818_v23 = vadd.f32 %v817_v20, %v816_v18  ;;  %v851_v24 = vpop.f32.mrb[9].mxu1  ;;  %v819_v25 = vpop.f32.mrb[10].mxu0 }
 0x10d   : > { %v852_v26 = vadd.f32 %v851_v24, %v850_v19  ;;  %v853_v27 = vpop.f32.mrb[10].mxu1  ;;  %v820_v28 = vpop.f32.mrb[11].mxu0 }
 0x10e   : > { %660 = vst.msk [vmem:[%s1061_s10 + $0x8] sm:$0xf] %vm657_vm0, %v784_v21  ;;  %v785_v29 = vpack.c.bf16 %v630_v22, %v630_v22  ;;  %v564_v30 = vadd.f32 %v818_v23, %v728_v46  ;;  %v821_v31 = vadd.f32 %v820_v28, %v819_v25  ;;  %v854_v32 = vpop.f32.mrb[11].mxu1 }
 0x10f   : > { %v855_v33 = vadd.f32 %v854_v32, %v853_v27 }
 0x110   : > { %661 = vst.msk [vmem:[%s1061_s10 + $0xc] sm:$0xf] %vm657_vm0, %v785_v29  ;;  %v621_v34 = vadd.f32 %v852_v26, %v564_v30  ;;  %v567_v35 = vadd.f32 %v821_v31, %v728_v46 }
 0x112   : > { %v631_v36 = vmax.f32 %v621_v34, 0.0  ;;  %v624_v37 = vadd.f32 %v855_v33, %v567_v35 }
 0x114   : > { %v786_v38 = vpack.c.bf16 %v631_v36, %v631_v36  ;;  %v632_v39 = vmax.f32 %v624_v37, 0.0 }
 0x116   : > { %662 = vst.msk [vmem:[%s1061_s10 + $0x10] sm:$0xf] %vm657_vm0, %v786_v38  ;;  %v787_v40 = vpack.c.bf16 %v632_v39, %v632_v39 }
 0x118   : > { %663 = vst.msk [vmem:[%s1061_s10 + $0x14] sm:$0xf] %vm657_vm0, %v787_v40 }
 0x119 PF: > { %s13_s12 = sadd.s32 1, %s920_s12  }
 0x11a   : > { %p10_p4 = scmp.ge.s32.totalorder %s13_s12, 6  }
 0x11c   :  { %12 = sbr.rel (!%p10_p4) target bundleno = 1 (0x1), region = 62 }

// kernel: mario_net_forward.6
= control target key start
LH: loop header
LB: loop body
LE: loop exit
PB: predicated region body
PF: predicated region fallthrough
CT: control target
= control target key end

     0   :  { %s999_s12 = smov 0   ;;  %s1145_s0 = inlined_call_operand.vmem [shape: bf16[128,576], index: 0, kind: input, shape index: {}]   ;;  %s1146_s1 = inlined_call_operand.vmem [shape: bf16[576,64], index: 1, kind: input, shape index: {}]   ;;  %s1147_s2 = inlined_call_operand.vmem [shape: f32[1,64], index: 2, kind: input, shape index: {}]   ;;  %s1148_s3 = inlined_call_operand.vmem [shape: bf16[128,64], index: 3, kind: output, shape index: {}]  }
   0x1 LB: > { %s770_s13 = sadd.s32 4294967295, %s977_s12   ;;  %p774_p0 = scmp.ge.s32.totalorder %s977_s12, 1  ;;  %s977_s12 = sphi %s999_s12, %s13_s12  }
   0x2   : > { %p139_p1 = scmp.lt.s32.totalorder %s977_s12, 5 }
   0x4   : > { %p140_p2 = pnand %p774_p0, %p139_p1 }
   0x5   : > { %v921_v0 = vld [vmem:[%s1146_s1 + $0x40] sm:$0xff] (!%p140_p2)   ;;  %v925_v4 = vld [vmem:[%s1146_s1 + $0x48] sm:$0xff] (!%p140_p2)   ;;  %v929_v8 = vld [vmem:[%s1146_s1 + $0x50] sm:$0xff] (!%p140_p2)   ;;  %s775_s17 = sshll.u32 (!%p140_p2), %s770_s13, 2  ;;  %vm535_vm0 = vcmask (!%p140_p2), 523264   ;;  %vm709_vm1 = vcmask (!%p140_p2), 519168  }
   0x6   : > { %143 = sbr.rel (%p140_p2) target bundleno = 276 (0x114), region = 32  ;;  %v922_v1 = vld [vmem:[%s1146_s1] sm:$0xff] (!%p140_p2)   ;;  %838 = vmatprep.subr.bf16.mxu0 (!%p140_p2), %v921_v0  ;;  %v926_v5 = vld [vmem:[%s1146_s1 + $0x8] sm:$0xff] (!%p140_p2)   ;;  %v930_v9 = vld [vmem:[%s1146_s1 + $0x10] sm:$0xff] (!%p140_p2)   ;;  %p165_p3 = scmp.lt.s32.totalorder (!%p140_p2), %s775_s17, 15 }
   0x7   : > { %v923_v2 = vld [vmem:[%s1146_s1 + $0xc0] sm:$0xff] (!%p140_p2)   ;;  %839 = vmatpush3.bf16.msra.mxu0 (!%p140_p2), %v922_v1  ;;  %v927_v6 = vld [vmem:[%s1146_s1 + $0xc8] sm:$0xff] (!%p140_p2)   ;;  %v931_v10 = vld [vmem:[%s1146_s1 + $0xd0] sm:$0xff] (!%p140_p2)  }
   0x8   : > { %v924_v3 = vld [vmem:[%s1146_s1 + $0x80] sm:$0xff] (!%p140_p2)   ;;  %866 = vmatprep.subr.bf16.mxu1 (!%p140_p2), %v923_v2  ;;  %840 = vmatprep.subr.bf16.mxu0 (!%p140_p2), %v925_v4  ;;  %v928_v7 = vld [vmem:[%s1146_s1 + $0x88] sm:$0xff] (!%p140_p2)   ;;  %v932_v11 = vld [vmem:[%s1146_s1 + $0x90] sm:$0xff] (!%p140_p2)  }
   0x9   : > { %867 = vmatpush3.bf16.msra.mxu1 (!%p140_p2), %v924_v3  ;;  %v933_v12 = vld [vmem:[%s1146_s1 + $0x58] sm:$0xff] (!%p140_p2)   ;;  %v937_v16 = vld [vmem:[%s1146_s1 + $0x60] sm:$0xff] (!%p140_p2)   ;;  %v941_v20 = vld [vmem:[%s1146_s1 + $0x68] sm:$0xff] (!%p140_p2)  }
   0xa   : > { %868 = vmatprep.subr.bf16.mxu1 (!%p140_p2), %v927_v6  ;;  %v934_v13 = vld [vmem:[%s1146_s1 + $0x18] sm:$0xff] (!%p140_p2)   ;;  %v938_v17 = vld [vmem:[%s1146_s1 + $0x20] sm:$0xff] (!%p140_p2)   ;;  %v942_v21 = vld [vmem:[%s1146_s1 + $0x28] sm:$0xff] (!%p140_p2)  }
   0xb   : > { %841 = vmatpush3.bf16.msra.mxu0 (!%p140_p2), %v926_v5  ;;  %v935_v14 = vld [vmem:[%s1146_s1 + $0xd8] sm:$0xff] (!%p140_p2)   ;;  %v939_v18 = vld [vmem:[%s1146_s1 + $0xe0] sm:$0xff] (!%p140_p2)   ;;  %v943_v22 = vld [vmem:[%s1146_s1 + $0xe8] sm:$0xff] (!%p140_p2)  }
   0xc   : > { %842 = vmatprep.subr.bf16.mxu0 (!%p140_p2), %v929_v8  ;;  %v936_v15 = vld [vmem:[%s1146_s1 + $0x98] sm:$0xff] (!%p140_p2)   ;;  %v940_v19 = vld [vmem:[%s1146_s1 + $0xa0] sm:$0xff] (!%p140_p2)   ;;  %v944_v23 = vld [vmem:[%s1146_s1 + $0xa8] sm:$0xff] (!%p140_p2)  }
   0xd   : > { %869 = vmatpush3.bf16.msra.mxu1 %v928_v7  ;;  %s1150_s17 = smov (!%p165_p3, %s775_s17), 15  ;;  %v945_v24 = vld [vmem:[%s1146_s1 + $0x70] sm:$0xff]   ;;  %v949_v28 = vld [vmem:[%s1146_s1 + $0x78] sm:$0xff]   ;;  %v956_v34 = vld [vmem:[%s1146_s1 + $0x100] sm:$0xff]  }
   0xe   : > { %870 = vmatprep.subr.bf16.mxu1 %v931_v10  ;;  %s912_s14 = smul.u32 20, %s1150_s17  ;;  %v946_v25 = vld [vmem:[%s1146_s1 + $0x30] sm:$0xff]   ;;  %v950_v29 = vld [vmem:[%s1146_s1 + $0x38] sm:$0xff]   ;;  %v960_v37 = vld [vmem:[%s1146_s1 + $0x108] sm:$0xff]   ;;  %s778_s18 = sshll.u32 %s1150_s17, 2 }
   0xf   : > { %843 = vmatpush3.bf16.msra.mxu0 %v930_v9  ;;  %v947_v26 = vld [vmem:[%s1146_s1 + $0xf0] sm:$0xff]   ;;  %v951_v30 = vld [vmem:[%s1146_s1 + $0xf8] sm:$0xff]   ;;  %v779_v47 = vld [vmem:[%s1147_s2] ss:$0 sm:$0xff]  ;;  %s175_s21 = scalar_lea.vmem %s1148_s3, %s778_s18 }
  0x10   : > { %844 = vmatprep.subr.bf16.mxu0 %v933_v12  ;;  %v948_v27 = vld [vmem:[%s1146_s1 + $0xb0] sm:$0xff]   ;;  %s1102_s13 = scalar_lea.vmem %s1145_s0, %s912_s14  ;;  %v955_v33 = vld [vmem:[%s1146_s1 + $0xb8] sm:$0xff]  }
  0x11   : > { %871 = vmatpush3.bf16.msra.mxu1 %v932_v11  ;;  %v952_v31 = vld [vmem:[%s1102_s13] ss:$20 sps:$4 sm:$0xff]   ;;  %v954_v32 = vld [vmem:[%s1102_s13 + $0x4] ss:$20 sps:$4 sm:$0xff]   ;;  %v957_v35 = vld [vmem:[%s1102_s13 + $0x8] ss:$20 sps:$4 sm:$0xff]  }
  0x12   : > { %872 = vmatprep.subr.bf16.mxu1 %v935_v14  ;;  %574 = vmatprep.mubr.bf16.mxu0 %v954_v32  ;;  %v959_v36 = vld [vmem:[%s1102_s13 + $0xc] ss:$20 sps:$4 sm:$0xff]   ;;  %v963_v39 = vld [vmem:[%s1102_s13 + $0x28] ss:$20 sps:$4 sm:$0xff]   ;;  %v964_v40 = vld [vmem:[%s1146_s1 + $0x110] sm:$0xff]  }
  0x13   : > { %845 = vmatpush3.bf16.msra.mxu0 %v934_v13  ;;  %623 = vmatprep.mubr.bf16.mxu1 %v959_v36  ;;  %v961_v38 = vld [vmem:[%s1102_s13 + $0x2c] ss:$20 sps:$4 sm:$0xff]   ;;  %v965_v41 = vld [vmem:[%s1102_s13 + $0x34] ss:$20 sps:$4 sm:$0xff]   ;;  %v967_v42 = vld [vmem:[%s1102_s13 + $0x30] ss:$20 sps:$4 sm:$0xff]  }
  0x14   : > { %846 = vmatprep.subr.bf16.mxu0 %v937_v16  ;;  %v968_v43 = vld [vmem:[%s1146_s1 + $0x118] sm:$0xff]   ;;  %v969_v44 = vld [vmem:[%s1102_s13 + $0x10] ss:$20 sps:$4 sm:$0xff]  }
  0x15   : > { %873 = vmatpush3.bf16.msra.mxu1 %v936_v15  ;;  %v970_v45 = vld [vmem:[%s1102_s13 + $0x38] ss:$20 sps:$4 sm:$0xff]  }
  0x16   : > { %874 = vmatprep.subr.bf16.mxu1 %v939_v18 }
  0x17   : > { %847 = vmatpush3.bf16.msra.mxu0 %v938_v17 }
  0x18   : > { %848 = vmatprep.subr.bf16.mxu0 %v941_v20 }
  0x19   : > { %875 = vmatpush3.bf16.msra.mxu1 %v940_v19 }
  0x1a   : > { %876 = vmatprep.subr.bf16.mxu1 %v943_v22 }
  0x1b   : > { %849 = vmatpush3.bf16.msra.mxu0 %v942_v21 }
  0x1c   : > { %850 = vmatprep.subr.bf16.mxu0 %v945_v24 }
  0x1d   : > { %877 = vmatpush3.bf16.msra.mxu1 %v944_v23 }
  0x1e   : > { %878 = vmatprep.subr.bf16.mxu1 %v947_v26 }
  0x1f   : > { %851 = vmatpush3.bf16.msra.mxu0 %v946_v25 }
  0x20   : > { %852 = vmatprep.subr.bf16.mxu0 %v949_v28 }
  0x21   : > { %879 = vmatpush3.bf16.msra.mxu1 %v948_v27 }
  0x22   : > { %880 = vmatprep.subr.bf16.mxu1 %v951_v30 }
  0x23   : > { %853 = vmatpush3.bf16.msra.mxu0 %v950_v29 }
  0x24   : > { %900 = vmatprep.subr.bf16.mxu0 %v956_v34 }
  0x25   : > { %881 = vmatpush3.bf16.msra.mxu1 %v955_v33 }
  0x26   : > { %575 = vmatmul.mubr.bf16.vlgmr.msra.gmra.mrb[0].mxu0 %v952_v31 }
  0x27   : > { %901 = vmatpush3.bf16.msra.mxu0 %v956_v34  ;;  %582 = vmatprep.mubr.bf16.mxu0 %v961_v38 }
  0x28   : > { %624 = vmatmul.mubr.bf16.vlgmr.msra.gmra.mrb[0].mxu1 %v957_v35  ;;  %902 = vmatprep.subr.bf16.mxu0 %v960_v37 }
  0x29   : > { %631 = vmatprep.mubr.bf16.mxu1 %v965_v41 }
  0x2b   : > { %903 = vmatpush3.bf16.msra.mxu0 %v960_v37 }
  0x2c   : > { %904 = vmatprep.subr.bf16.mxu0 %v964_v40 }
  0x2e   : > { %583 = vmatmul.mubr.bf16.gmra.mrb[4].mxu0 %v963_v39 }
  0x2f   : > { %908 = vmatprep.mubr.msk.bf16.mxu0 %vm535_vm0, %v969_v44  ;;  %905 = vmatpush3.bf16.msra.mxu0 %v964_v40 }
  0x30   : > { %632 = vmatmul.mubr.bf16.gmra.mrb[4].mxu1 %v967_v42  ;;  %906 = vmatprep.subr.bf16.mxu0 %v968_v43 }
  0x33   : > { %907 = vmatpush3.bf16.msra.mxu0 %v968_v43 }
  0x36   : > { %909 = vmatmul.mubr.msk.bf16.vlgmr.msra.gmra.mrb[8].mxu0 %vm535_vm0, %v970_v45 }
  0xf9   : > { %v854_v46 = vpop.f32.mrb[0].mxu0 }
  0xfa   : > { %v855_v48 = vpop.f32.mrb[1].mxu0 }
  0xfb   : > { %v856_v49 = vadd.f32 %v855_v48, %v854_v46  ;;  %v857_v50 = vpop.f32.mrb[2].mxu0  ;;  %v882_v51 = vpop.f32.mrb[0].mxu1 }
  0xfc   : > { %v858_v52 = vpop.f32.mrb[3].mxu0  ;;  %v883_v55 = vpop.f32.mrb[1].mxu1 }
  0xfd   : > { %v577_v53 = vadd.f32 %v856_v49, %v779_v47  ;;  %v859_v54 = vadd.f32 %v858_v52, %v857_v50  ;;  %v884_v56 = vadd.f32 %v883_v55, %v882_v51  ;;  %v885_v57 = vpop.f32.mrb[2].mxu1 }
  0xfe   : > { %v886_v59 = vpop.f32.mrb[3].mxu1 }
  0xff   : > { %v580_v58 = vadd.f32 %v859_v54, %v779_v47  ;;  %v887_v60 = vadd.f32 %v886_v59, %v885_v57  ;;  %v626_v61 = vadd.f32 %v884_v56, %v577_v53 }
 0x101   : > { %v860_v62 = vpop.f32.mrb[4].mxu0  ;;  %v629_v0 = vadd.f32 %v887_v60, %v580_v58 }
 0x102   : > { %v861_v63 = vpop.f32.mrb[5].mxu0 }
 0x103   : > { %v862_v1 = vadd.f32 %v861_v63, %v860_v62  ;;  %v863_v2 = vpop.f32.mrb[6].mxu0  ;;  %v888_v3 = vpop.f32.mrb[4].mxu1 }
 0x104   : > { %v864_v4 = vpop.f32.mrb[7].mxu0  ;;  %v889_v7 = vpop.f32.mrb[5].mxu1 }
 0x105   : > { %v585_v5 = vadd.f32 %v862_v1, %v779_v47  ;;  %v865_v6 = vadd.f32 %v864_v4, %v863_v2  ;;  %v890_v8 = vadd.f32 %v889_v7, %v888_v3  ;;  %v891_v9 = vpop.f32.mrb[6].mxu1 }
 0x106   : > { %v892_v11 = vpop.f32.mrb[7].mxu1 }
 0x107   : > { %v588_v10 = vadd.f32 %v865_v6, %v779_v47  ;;  %v893_v12 = vadd.f32 %v892_v11, %v891_v9  ;;  %v634_v13 = vadd.f32 %v890_v8, %v585_v5 }
 0x109   : > { %v910_v14 = vpop.f32.mrb[8].mxu0  ;;  %v637_v15 = vadd.f32 %v893_v12, %v588_v10 }
 0x10a   : > { %v683_v16 = vadd.f32 %v910_v14, %v634_v13  ;;  %v674_v17 = vpop.f32.mrb[9].mxu0 }
 0x10b   : > { %v675_v18 = vadd.f32 %v674_v17, %v626_v61  ;;  %v911_v19 = vpop.f32.mrb[10].mxu0 }
 0x10c   : > { %v691_v20 = vmax.f32 %v683_v16, 0.0  ;;  %v686_v21 = vadd.f32 %v911_v19, %v637_v15  ;;  %v677_v22 = vpop.f32.mrb[11].mxu0 }
 0x10d   : > { %v689_v23 = vmax.f32 %v675_v18, 0.0  ;;  %v678_v24 = vadd.f32 %v677_v22, %v629_v0 }
 0x10e   : > { %v836_v25 = vpack.c.bf16 %v691_v20, %v691_v20  ;;  %v692_v26 = vmax.f32 %v686_v21, 0.0 }
 0x10f   : > { %v834_v27 = vpack.c.bf16 %v689_v23, %v689_v23  ;;  %v690_v28 = vmax.f32 %v678_v24, 0.0 }
 0x110   : > { %712 = vst.msk [vmem:[%s175_s21 + $0x8] sm:$0xf] %vm709_vm1, %v836_v25  ;;  %v837_v29 = vpack.c.bf16 %v692_v26, %v692_v26 }
 0x111   : > { %710 = vst.msk [vmem:[%s175_s21] sm:$0xf] %vm709_vm1, %v834_v27  ;;  %v835_v30 = vpack.c.bf16 %v690_v28, %v690_v28 }
 0x112   : > { %713 = vst.msk [vmem:[%s175_s21 + $0xc] sm:$0xf] %vm709_vm1, %v837_v29 }
 0x113   : > { %711 = vst.msk [vmem:[%s175_s21 + $0x4] sm:$0xf] %vm709_vm1, %v835_v30 }
 0x114 PF: > { %s13_s12 = sadd.s32 1, %s977_s12  }
 0x115   : > { %p10_p4 = scmp.ge.s32.totalorder %s13_s12, 6  }
 0x117   :  { %12 = sbr.rel (!%p10_p4) target bundleno = 1 (0x1), region = 62 }

// kernel: mario_net_forward.7
= control target key start
LH: loop header
LB: loop body
LE: loop exit
PB: predicated region body
PF: predicated region fallthrough
CT: control target
= control target key end

     0   :  { %vm4898_vm0 = vcmask 523264   ;;  %vm6377_vm1 = vcmask 64512   ;;  %s11188_s1 = inlined_call_operand.vmem [shape: bf16[3136,512], index: 1, kind: input, shape index: {}]   ;;  %s11189_s0 = inlined_call_operand.vmem [shape: bf16[16,3136], index: 0, kind: input, shape index: {}]   ;;  %s11190_s3 = inlined_call_operand.vmem [shape: bf16[512,8], index: 3, kind: input, shape index: {}]   ;;  %s11191_s2 = inlined_call_operand.vmem [shape: f32[1,512], index: 2, kind: input, shape index: {}]   ;;  %s11192_s4 = inlined_call_operand.vmem [shape: f32[1,8], index: 4, kind: input, shape index: {}]   ;;  %s11193_s5 = inlined_call_operand.vmem [shape: f32[16,8], index: 5, kind: output, shape index: {}]  }
   0x1   :  { %v7377_v0 = vld [vmem:[%s11188_s1 + $0x4] ss:$16 sps:$4 sm:$0xff]   ;;  %v7379_v1 = vld [vmem:[%s11188_s1 + $0xc] ss:$16 sps:$4 sm:$0xff]   ;;  %v7381_v2 = vld [vmem:[%s11188_s1] ss:$16 sps:$4 sm:$0xff]  }
   0x2   :  { %4902 = vmatprep.subr.bf16.mxu0 %v7377_v0  ;;  %v7382_v3 = vld [vmem:[%s11188_s1 + $0x8] ss:$16 sps:$4 sm:$0xff]   ;;  %5461 = vmatprep.subr.bf16.mxu1 %v7379_v1  ;;  %v7383_v4 = vld [vmem:[%s11188_s1 + $0x24] ss:$16 sps:$4 sm:$0xff]   ;;  %v7385_v5 = vld [vmem:[%s11188_s1 + $0x2c] ss:$16 sps:$4 sm:$0xff]  }
   0x3   :  { %4903 = vmatpush1.bf16.msra.mxu0 %v7381_v2  ;;  %5462 = vmatpush1.bf16.msra.mxu1 %v7382_v3  ;;  %v7387_v6 = vld [vmem:[%s11188_s1 + $0x20] ss:$16 sps:$4 sm:$0xff]   ;;  %v7388_v7 = vld [vmem:[%s11188_s1 + $0x28] ss:$16 sps:$4 sm:$0xff]   ;;  %v7389_v8 = vld [vmem:[%s11188_s1 + $0x44] ss:$16 sps:$4 sm:$0xff]  }
   0x4   :  { %4904 = vmatprep.subr.bf16.mxu0 %v7383_v4  ;;  %5463 = vmatprep.subr.bf16.mxu1 %v7385_v5  ;;  %v7391_v9 = vld [vmem:[%s11188_s1 + $0x4c] ss:$16 sps:$4 sm:$0xff]   ;;  %v7393_v10 = vld [vmem:[%s11188_s1 + $0x40] ss:$16 sps:$4 sm:$0xff]   ;;  %v7394_v11 = vld [vmem:[%s11188_s1 + $0x48] ss:$16 sps:$4 sm:$0xff]  }
   0x5   :  { %v7395_v12 = vld [vmem:[%s11188_s1 + $0x64] ss:$16 sps:$4 sm:$0xff]   ;;  %v7397_v13 = vld [vmem:[%s11188_s1 + $0x6c] ss:$16 sps:$4 sm:$0xff]   ;;  %v7399_v14 = vld [vmem:[%s11188_s1 + $0x60] ss:$16 sps:$4 sm:$0xff]  }
   0x6   :  { %v7400_v15 = vld [vmem:[%s11188_s1 + $0x68] ss:$16 sps:$4 sm:$0xff]   ;;  %v7401_v16 = vld [vmem:[%s11188_s1 + $0x84] ss:$16 sps:$4 sm:$0xff]   ;;  %v7403_v17 = vld [vmem:[%s11188_s1 + $0x8c] ss:$16 sps:$4 sm:$0xff]  }
   0x7   :  { %4905 = vmatpush1.bf16.msra.mxu0 %v7387_v6  ;;  %5464 = vmatpush1.bf16.msra.mxu1 %v7388_v7  ;;  %v7405_v18 = vld [vmem:[%s11188_s1 + $0x80] ss:$16 sps:$4 sm:$0xff]   ;;  %v7406_v19 = vld [vmem:[%s11188_s1 + $0x88] ss:$16 sps:$4 sm:$0xff]   ;;  %v7407_v20 = vld [vmem:[%s11188_s1 + $0xa4] ss:$16 sps:$4 sm:$0xff]  }
   0x8   :  { %4906 = vmatprep.subr.bf16.mxu0 %v7389_v8  ;;  %5465 = vmatprep.subr.bf16.mxu1 %v7391_v9  ;;  %v7409_v21 = vld [vmem:[%s11188_s1 + $0xac] ss:$16 sps:$4 sm:$0xff]   ;;  %v7411_v22 = vld [vmem:[%s11188_s1 + $0xa0] ss:$16 sps:$4 sm:$0xff]   ;;  %v7412_v23 = vld [vmem:[%s11188_s1 + $0xa8] ss:$16 sps:$4 sm:$0xff]  }
   0x9   :  { %v7413_v24 = vld [vmem:[%s11188_s1 + $0xc4] ss:$16 sps:$4 sm:$0xff]   ;;  %v7415_v25 = vld [vmem:[%s11188_s1 + $0xcc] ss:$16 sps:$4 sm:$0xff]   ;;  %v7417_v26 = vld [vmem:[%s11188_s1 + $0xc0] ss:$16 sps:$4 sm:$0xff]  }
   0xa   :  { %v7418_v27 = vld [vmem:[%s11188_s1 + $0xc8] ss:$16 sps:$4 sm:$0xff]   ;;  %v7419_v28 = vld [vmem:[%s11188_s1 + $0xe4] ss:$16 sps:$4 sm:$0xff]   ;;  %v7421_v29 = vld [vmem:[%s11188_s1 + $0xec] ss:$16 sps:$4 sm:$0xff]  }
   0xb   :  { %4907 = vmatpush1.bf16.msra.mxu0 %v7393_v10  ;;  %5466 = vmatpush1.bf16.msra.mxu1 %v7394_v11  ;;  %v7423_v30 = vld [vmem:[%s11188_s1 + $0xe0] ss:$16 sps:$4 sm:$0xff]   ;;  %v7424_v31 = vld [vmem:[%s11188_s1 + $0xe8] ss:$16 sps:$4 sm:$0xff]   ;;  %v7425_v32 = vld [vmem:[%s11188_s1 + $0x104] ss:$16 sps:$4 sm:$0xff]  }
   0xc   :  { %4908 = vmatprep.subr.bf16.mxu0 %v7395_v12  ;;  %5467 = vmatprep.subr.bf16.mxu1 %v7397_v13  ;;  %v7427_v33 = vld [vmem:[%s11188_s1 + $0x10c] ss:$16 sps:$4 sm:$0xff]   ;;  %v7429_v34 = vld [vmem:[%s11188_s1 + $0x100] ss:$16 sps:$4 sm:$0xff]   ;;  %v7430_v35 = vld [vmem:[%s11188_s1 + $0x108] ss:$16 sps:$4 sm:$0xff]  }
   0xd   :  { %v7431_v36 = vld [vmem:[%s11188_s1 + $0x124] ss:$16 sps:$4 sm:$0xff]   ;;  %v7433_v37 = vld [vmem:[%s11188_s1 + $0x12c] ss:$16 sps:$4 sm:$0xff]   ;;  %v7435_v38 = vld [vmem:[%s11188_s1 + $0x120] ss:$16 sps:$4 sm:$0xff]  }
   0xe   :  { %v7436_v39 = vld [vmem:[%s11188_s1 + $0x128] ss:$16 sps:$4 sm:$0xff]   ;;  %v7437_v40 = vld [vmem:[%s11188_s1 + $0x144] ss:$16 sps:$4 sm:$0xff]   ;;  %v7439_v41 = vld [vmem:[%s11188_s1 + $0x14c] ss:$16 sps:$4 sm:$0xff]  }
   0xf   :  { %4909 = vmatpush1.bf16.msra.mxu0 %v7399_v14  ;;  %5468 = vmatpush1.bf16.msra.mxu1 %v7400_v15  ;;  %v7441_v42 = vld [vmem:[%s11188_s1 + $0x140] ss:$16 sps:$4 sm:$0xff]   ;;  %v7442_v43 = vld [vmem:[%s11188_s1 + $0x148] ss:$16 sps:$4 sm:$0xff]   ;;  %v7443_v44 = vld [vmem:[%s11188_s1 + $0x164] ss:$16 sps:$4 sm:$0xff]  }
  0x10   :  { %4910 = vmatprep.subr.bf16.mxu0 %v7401_v16  ;;  %5469 = vmatprep.subr.bf16.mxu1 %v7403_v17  ;;  %v7445_v45 = vld [vmem:[%s11188_s1 + $0x16c] ss:$16 sps:$4 sm:$0xff]   ;;  %v7447_v46 = vld [vmem:[%s11188_s1 + $0x160] ss:$16 sps:$4 sm:$0xff]   ;;  %v7448_v47 = vld [vmem:[%s11188_s1 + $0x168] ss:$16 sps:$4 sm:$0xff]  }
  0x11   :  { %v7475_v48 = vld [vmem:[%s11189_s0 + $0x4] ss:$100 sps:$4 sm:$0xff]   ;;  %v7451_v50 = vld [vmem:[%s11188_s1 + $0x18c] ss:$16 sps:$4 sm:$0xff]   ;;  %v7453_v51 = vld [vmem:[%s11188_s1 + $0x180] ss:$16 sps:$4 sm:$0xff]  }
  0x12   :  { %v7449_v49 = vld [vmem:[%s11188_s1 + $0x184] ss:$16 sps:$4 sm:$0xff]   ;;  %4934 = vmatprep.mubr.bf16.mxu0 %v7475_v48  ;;  %5493 = vmatprep.mubr.bf16.mxu1 %v7475_v48  ;;  %v7454_v52 = vld [vmem:[%s11188_s1 + $0x188] ss:$16 sps:$4 sm:$0xff]   ;;  %v7457_v54 = vld [vmem:[%s11188_s1 + $0x1ac] ss:$16 sps:$4 sm:$0xff]  }
  0x13   :  { %4911 = vmatpush1.bf16.msra.mxu0 %v7405_v18  ;;  %5470 = vmatpush1.bf16.msra.mxu1 %v7406_v19  ;;  %v7455_v53 = vld [vmem:[%s11188_s1 + $0x1a4] ss:$16 sps:$4 sm:$0xff]   ;;  %v7459_v55 = vld [vmem:[%s11188_s1 + $0x1a0] ss:$16 sps:$4 sm:$0xff]   ;;  %v7460_v56 = vld [vmem:[%s11188_s1 + $0x1a8] ss:$16 sps:$4 sm:$0xff]  }
  0x14   :  { %4912 = vmatprep.subr.bf16.mxu0 %v7407_v20  ;;  %5471 = vmatprep.subr.bf16.mxu1 %v7409_v21  ;;  %v7461_v57 = vld [vmem:[%s11188_s1 + $0x1c4] ss:$16 sps:$4 sm:$0xff]   ;;  %v7463_v58 = vld [vmem:[%s11188_s1 + $0x1cc] ss:$16 sps:$4 sm:$0xff]   ;;  %v7465_v59 = vld [vmem:[%s11188_s1 + $0x1c0] ss:$16 sps:$4 sm:$0xff]  }
  0x15   :  { %v7466_v60 = vld [vmem:[%s11188_s1 + $0x1c8] ss:$16 sps:$4 sm:$0xff]   ;;  %v7467_v61 = vld [vmem:[%s11188_s1 + $0x1e4] ss:$16 sps:$4 sm:$0xff]   ;;  %v7469_v62 = vld [vmem:[%s11188_s1 + $0x1ec] ss:$16 sps:$4 sm:$0xff]  }
  0x16   :  { %v7471_v63 = vld [vmem:[%s11188_s1 + $0x1e0] ss:$16 sps:$4 sm:$0xff]   ;;  %v7472_v0 = vld [vmem:[%s11188_s1 + $0x1e8] ss:$16 sps:$4 sm:$0xff]   ;;  %v7478_v1 = vld [vmem:[%s11188_s1 + $0x204] ss:$16 sps:$4 sm:$0xff]  }
  0x17   :  { %4913 = vmatpush1.bf16.msra.mxu0 %v7411_v22  ;;  %5472 = vmatpush1.bf16.msra.mxu1 %v7412_v23  ;;  %v7481_v2 = vld [vmem:[%s11188_s1 + $0x20c] ss:$16 sps:$4 sm:$0xff]   ;;  %v7473_v3 = vld [vmem:[%s11189_s0] ss:$100 sps:$4 sm:$0xff]   ;;  %v7479_v5 = vld [vmem:[%s11188_s1 + $0x208] ss:$16 sps:$4 sm:$0xff]  }
  0x18   :  { %4914 = vmatprep.subr.bf16.mxu0 %v7413_v24  ;;  %5473 = vmatprep.subr.bf16.mxu1 %v7415_v25  ;;  %v7476_v4 = vld [vmem:[%s11188_s1 + $0x200] ss:$16 sps:$4 sm:$0xff]   ;;  %v7484_v6 = vld [vmem:[%s11188_s1 + $0x224] ss:$16 sps:$4 sm:$0xff]   ;;  %v7487_v7 = vld [vmem:[%s11188_s1 + $0x22c] ss:$16 sps:$4 sm:$0xff]  }
  0x19   :  { %v7482_v8 = vld [vmem:[%s11188_s1 + $0x220] ss:$16 sps:$4 sm:$0xff]   ;;  %v7485_v9 = vld [vmem:[%s11188_s1 + $0x228] ss:$16 sps:$4 sm:$0xff]   ;;  %v7490_v10 = vld [vmem:[%s11188_s1 + $0x244] ss:$16 sps:$4 sm:$0xff]  }
  0x1a   :  { %v7493_v11 = vld [vmem:[%s11188_s1 + $0x24c] ss:$16 sps:$4 sm:$0xff]   ;;  %v7488_v12 = vld [vmem:[%s11188_s1 + $0x240] ss:$16 sps:$4 sm:$0xff]   ;;  %v7491_v13 = vld [vmem:[%s11188_s1 + $0x248] ss:$16 sps:$4 sm:$0xff]  }
  0x1b   :  { %4915 = vmatpush1.bf16.msra.mxu0 %v7417_v26  ;;  %5474 = vmatpush1.bf16.msra.mxu1 %v7418_v27  ;;  %v7496_v14 = vld [vmem:[%s11188_s1 + $0x264] ss:$16 sps:$4 sm:$0xff]   ;;  %v7499_v15 = vld [vmem:[%s11188_s1 + $0x26c] ss:$16 sps:$4 sm:$0xff]   ;;  %v7494_v16 = vld [vmem:[%s11188_s1 + $0x260] ss:$16 sps:$4 sm:$0xff]  }
  0x1c   :  { %4916 = vmatprep.subr.bf16.mxu0 %v7419_v28  ;;  %5475 = vmatprep.subr.bf16.mxu1 %v7421_v29  ;;  %v7497_v17 = vld [vmem:[%s11188_s1 + $0x268] ss:$16 sps:$4 sm:$0xff]   ;;  %v7502_v18 = vld [vmem:[%s11188_s1 + $0x284] ss:$16 sps:$4 sm:$0xff]   ;;  %v7505_v19 = vld [vmem:[%s11188_s1 + $0x28c] ss:$16 sps:$4 sm:$0xff]  }
  0x1d   :  { %v7500_v20 = vld [vmem:[%s11188_s1 + $0x280] ss:$16 sps:$4 sm:$0xff]   ;;  %v7503_v21 = vld [vmem:[%s11188_s1 + $0x288] ss:$16 sps:$4 sm:$0xff]   ;;  %v7508_v22 = vld [vmem:[%s11188_s1 + $0x2a4] ss:$16 sps:$4 sm:$0xff]  }
  0x1e   :  { %v7511_v23 = vld [vmem:[%s11188_s1 + $0x2ac] ss:$16 sps:$4 sm:$0xff]   ;;  %v7506_v24 = vld [vmem:[%s11188_s1 + $0x2a0] ss:$16 sps:$4 sm:$0xff]   ;;  %v7509_v25 = vld [vmem:[%s11188_s1 + $0x2a8] ss:$16 sps:$4 sm:$0xff]  }
  0x1f   :  { %4917 = vmatpush1.bf16.msra.mxu0 %v7423_v30  ;;  %5476 = vmatpush1.bf16.msra.mxu1 %v7424_v31  ;;  %v7514_v26 = vld [vmem:[%s11188_s1 + $0x2c4] ss:$16 sps:$4 sm:$0xff]   ;;  %v7517_v27 = vld [vmem:[%s11188_s1 + $0x2cc] ss:$16 sps:$4 sm:$0xff]   ;;  %v7512_v28 = vld [vmem:[%s11188_s1 + $0x2c0] ss:$16 sps:$4 sm:$0xff]  }
  0x20   :  { %4918 = vmatprep.subr.bf16.mxu0 %v7425_v32  ;;  %5477 = vmatprep.subr.bf16.mxu1 %v7427_v33  ;;  %v7515_v29 = vld [vmem:[%s11188_s1 + $0x2c8] ss:$16 sps:$4 sm:$0xff]   ;;  %v7574_v30 = vld [vmem:[%s11189_s0 + $0xc] ss:$100 sps:$4 sm:$0xff]   ;;  %v7520_v31 = vld [vmem:[%s11188_s1 + $0x2e4] ss:$16 sps:$4 sm:$0xff]  }
  0x21   :  { %v7523_v32 = vld [vmem:[%s11188_s1 + $0x2ec] ss:$16 sps:$4 sm:$0xff]   ;;  %v7518_v33 = vld [vmem:[%s11188_s1 + $0x2e0] ss:$16 sps:$4 sm:$0xff]  }
  0x22   :  { %v7547_v48 = vld [vmem:[%s11188_s1 + $0x36c] ss:$16 sps:$4 sm:$0xff]  }
  0x23   :  { %4919 = vmatpush1.bf16.msra.mxu0 %v7429_v34  ;;  %5478 = vmatpush1.bf16.msra.mxu1 %v7430_v35  ;;  %v7521_v34 = vld [vmem:[%s11188_s1 + $0x2e8] ss:$16 sps:$4 sm:$0xff]   ;;  %v7526_v35 = vld [vmem:[%s11188_s1 + $0x304] ss:$16 sps:$4 sm:$0xff]  }
  0x24   :  { %4920 = vmatprep.subr.bf16.mxu0 %v7431_v36  ;;  %5479 = vmatprep.subr.bf16.mxu1 %v7433_v37  ;;  %v7529_v36 = vld [vmem:[%s11188_s1 + $0x30c] ss:$16 sps:$4 sm:$0xff]   ;;  %v7524_v37 = vld [vmem:[%s11188_s1 + $0x300] ss:$16 sps:$4 sm:$0xff]  }
  0x27   :  { %4921 = vmatpush1.bf16.msra.mxu0 %v7435_v38  ;;  %5480 = vmatpush1.bf16.msra.mxu1 %v7436_v39  ;;  %v7527_v38 = vld [vmem:[%s11188_s1 + $0x308] ss:$16 sps:$4 sm:$0xff]   ;;  %v7532_v39 = vld [vmem:[%s11188_s1 + $0x324] ss:$16 sps:$4 sm:$0xff]  }
  0x28   :  { %4922 = vmatprep.subr.bf16.mxu0 %v7437_v40  ;;  %5481 = vmatprep.subr.bf16.mxu1 %v7439_v41  ;;  %v7535_v40 = vld [vmem:[%s11188_s1 + $0x32c] ss:$16 sps:$4 sm:$0xff]   ;;  %v7530_v41 = vld [vmem:[%s11188_s1 + $0x320] ss:$16 sps:$4 sm:$0xff]  }
  0x2b   :  { %4923 = vmatpush1.bf16.msra.mxu0 %v7441_v42  ;;  %5482 = vmatpush1.bf16.msra.mxu1 %v7442_v43  ;;  %v7533_v42 = vld [vmem:[%s11188_s1 + $0x328] ss:$16 sps:$4 sm:$0xff]   ;;  %v7538_v43 = vld [vmem:[%s11188_s1 + $0x344] ss:$16 sps:$4 sm:$0xff]  }
  0x2c   :  { %4924 = vmatprep.subr.bf16.mxu0 %v7443_v44  ;;  %5483 = vmatprep.subr.bf16.mxu1 %v7445_v45  ;;  %v7541_v44 = vld [vmem:[%s11188_s1 + $0x34c] ss:$16 sps:$4 sm:$0xff]   ;;  %v7536_v45 = vld [vmem:[%s11188_s1 + $0x340] ss:$16 sps:$4 sm:$0xff]  }
  0x2f   :  { %4925 = vmatpush1.bf16.msra.mxu0 %v7447_v46  ;;  %5484 = vmatpush1.bf16.msra.mxu1 %v7448_v47  ;;  %v7539_v46 = vld [vmem:[%s11188_s1 + $0x348] ss:$16 sps:$4 sm:$0xff]   ;;  %v7544_v47 = vld [vmem:[%s11188_s1 + $0x364] ss:$16 sps:$4 sm:$0xff]  }
  0x30   :  { %4926 = vmatprep.subr.bf16.mxu0 %v7449_v49  ;;  %5485 = vmatprep.subr.bf16.mxu1 %v7451_v50  ;;  %v7542_v49 = vld [vmem:[%s11188_s1 + $0x360] ss:$16 sps:$4 sm:$0xff]   ;;  %v7545_v50 = vld [vmem:[%s11188_s1 + $0x368] ss:$16 sps:$4 sm:$0xff]  }
  0x33   :  { %4927 = vmatpush1.bf16.msra.mxu0 %v7453_v51  ;;  %5486 = vmatpush1.bf16.msra.mxu1 %v7454_v52  ;;  %v7550_v51 = vld [vmem:[%s11188_s1 + $0x384] ss:$16 sps:$4 sm:$0xff]   ;;  %v7553_v52 = vld [vmem:[%s11188_s1 + $0x38c] ss:$16 sps:$4 sm:$0xff]  }
  0x34   :  { %4928 = vmatprep.subr.bf16.mxu0 %v7455_v53  ;;  %5487 = vmatprep.subr.bf16.mxu1 %v7457_v54  ;;  %v7548_v53 = vld [vmem:[%s11188_s1 + $0x380] ss:$16 sps:$4 sm:$0xff]   ;;  %v7551_v54 = vld [vmem:[%s11188_s1 + $0x388] ss:$16 sps:$4 sm:$0xff]  }
  0x37   :  { %4929 = vmatpush1.bf16.msra.mxu0 %v7459_v55  ;;  %5488 = vmatpush1.bf16.msra.mxu1 %v7460_v56  ;;  %v7556_v55 = vld [vmem:[%s11188_s1 + $0x3a4] ss:$16 sps:$4 sm:$0xff]   ;;  %v7559_v56 = vld [vmem:[%s11188_s1 + $0x3ac] ss:$16 sps:$4 sm:$0xff]  }
  0x38   :  { %4930 = vmatprep.subr.bf16.mxu0 %v7461_v57  ;;  %5489 = vmatprep.subr.bf16.mxu1 %v7463_v58  ;;  %v7554_v57 = vld [vmem:[%s11188_s1 + $0x3a0] ss:$16 sps:$4 sm:$0xff]   ;;  %v7557_v58 = vld [vmem:[%s11188_s1 + $0x3a8] ss:$16 sps:$4 sm:$0xff]  }
  0x3b   :  { %4931 = vmatpush1.bf16.msra.mxu0 %v7465_v59  ;;  %5490 = vmatpush1.bf16.msra.mxu1 %v7466_v60  ;;  %v7562_v59 = vld [vmem:[%s11188_s1 + $0x3c4] ss:$16 sps:$4 sm:$0xff]   ;;  %v7565_v60 = vld [vmem:[%s11188_s1 + $0x3cc] ss:$16 sps:$4 sm:$0xff]  }
  0x3c   :  { %4932 = vmatprep.subr.bf16.mxu0 %v7467_v61  ;;  %5491 = vmatprep.subr.bf16.mxu1 %v7469_v62  ;;  %v7560_v61 = vld [vmem:[%s11188_s1 + $0x3c0] ss:$16 sps:$4 sm:$0xff]   ;;  %v7563_v62 = vld [vmem:[%s11188_s1 + $0x3c8] ss:$16 sps:$4 sm:$0xff]  }
  0x3f   :  { %4933 = vmatpush1.bf16.msra.mxu0 %v7471_v63  ;;  %5492 = vmatpush1.bf16.msra.mxu1 %v7472_v0  ;;  %v7568_v63 = vld [vmem:[%s11188_s1 + $0x3e4] ss:$16 sps:$4 sm:$0xff]   ;;  %v7571_v0 = vld [vmem:[%s11188_s1 + $0x3ec] ss:$16 sps:$4 sm:$0xff]  }
  0x40   :  { %4945 = vmatprep.subr.bf16.mxu0 %v7478_v1  ;;  %5504 = vmatprep.subr.bf16.mxu1 %v7481_v2  ;;  %v7566_v1 = vld [vmem:[%s11188_s1 + $0x3e0] ss:$16 sps:$4 sm:$0xff]   ;;  %v7569_v2 = vld [vmem:[%s11188_s1 + $0x3e8] ss:$16 sps:$4 sm:$0xff]  }
  0x42   :  { %4935 = vmatmul.mubr.bf16.vlgmr.msra.gmra.mrb[0].mxu0 %v7473_v3  ;;  %5494 = vmatmul.mubr.bf16.vlgmr.msra.gmra.mrb[0].mxu1 %v7473_v3  ;;  %v7577_v3 = vld [vmem:[%s11188_s1 + $0x404] ss:$16 sps:$4 sm:$0xff]  }
  0x43   :  { %4946 = vmatpush1.bf16.msra.mxu0 %v7476_v4  ;;  %5505 = vmatpush1.bf16.msra.mxu1 %v7479_v5  ;;  %v7580_v4 = vld [vmem:[%s11188_s1 + $0x40c] ss:$16 sps:$4 sm:$0xff]  }
  0x44   :  { %4947 = vmatprep.subr.bf16.mxu0 %v7484_v6  ;;  %5506 = vmatprep.subr.bf16.mxu1 %v7487_v7  ;;  %v7572_v5 = vld [vmem:[%s11189_s0 + $0x8] ss:$100 sps:$4 sm:$0xff]   ;;  %v7575_v6 = vld [vmem:[%s11188_s1 + $0x400] ss:$16 sps:$4 sm:$0xff]  }
  0x45   :  { %4977 = vmatprep.mubr.bf16.mxu0 %v7574_v30  ;;  %5536 = vmatprep.mubr.bf16.mxu1 %v7574_v30  ;;  %v7578_v7 = vld [vmem:[%s11188_s1 + $0x408] ss:$16 sps:$4 sm:$0xff]   ;;  %v7616_v30 = vld [vmem:[%s11188_s1 + $0x4cc] ss:$16 sps:$4 sm:$0xff]  }
  0x47   :  { %4948 = vmatpush1.bf16.msra.mxu0 %v7482_v8  ;;  %5507 = vmatpush1.bf16.msra.mxu1 %v7485_v9  ;;  %v7583_v8 = vld [vmem:[%s11188_s1 + $0x424] ss:$16 sps:$4 sm:$0xff]   ;;  %v7586_v9 = vld [vmem:[%s11188_s1 + $0x42c] ss:$16 sps:$4 sm:$0xff]  }
  0x48   :  { %4949 = vmatprep.subr.bf16.mxu0 %v7490_v10  ;;  %5508 = vmatprep.subr.bf16.mxu1 %v7493_v11  ;;  %v7581_v10 = vld [vmem:[%s11188_s1 + $0x420] ss:$16 sps:$4 sm:$0xff]   ;;  %v7584_v11 = vld [vmem:[%s11188_s1 + $0x428] ss:$16 sps:$4 sm:$0xff]  }
  0x4b   :  { %4950 = vmatpush1.bf16.msra.mxu0 %v7488_v12  ;;  %5509 = vmatpush1.bf16.msra.mxu1 %v7491_v13  ;;  %v7673_v12 = vld [vmem:[%s11189_s0 + $0x14] ss:$100 sps:$4 sm:$0xff]  }
  0x4c   :  { %4951 = vmatprep.subr.bf16.mxu0 %v7496_v14  ;;  %5510 = vmatprep.subr.bf16.mxu1 %v7499_v15  ;;  %v7589_v13 = vld [vmem:[%s11188_s1 + $0x444] ss:$16 sps:$4 sm:$0xff]   ;;  %v7592_v14 = vld [vmem:[%s11188_s1 + $0x44c] ss:$16 sps:$4 sm:$0xff]   ;;  %v7587_v15 = vld [vmem:[%s11188_s1 + $0x440] ss:$16 sps:$4 sm:$0xff]  }
  0x4f   :  { %4952 = vmatpush1.bf16.msra.mxu0 %v7494_v16  ;;  %5511 = vmatpush1.bf16.msra.mxu1 %v7497_v17  ;;  %v7590_v16 = vld [vmem:[%s11188_s1 + $0x448] ss:$16 sps:$4 sm:$0xff]   ;;  %v7595_v17 = vld [vmem:[%s11188_s1 + $0x464] ss:$16 sps:$4 sm:$0xff]  }
  0x50   :  { %4953 = vmatprep.subr.bf16.mxu0 %v7502_v18  ;;  %5512 = vmatprep.subr.bf16.mxu1 %v7505_v19  ;;  %v7598_v18 = vld [vmem:[%s11188_s1 + $0x46c] ss:$16 sps:$4 sm:$0xff]   ;;  %v7593_v19 = vld [vmem:[%s11188_s1 + $0x460] ss:$16 sps:$4 sm:$0xff]  }
  0x53   :  { %4954 = vmatpush1.bf16.msra.mxu0 %v7500_v20  ;;  %5513 = vmatpush1.bf16.msra.mxu1 %v7503_v21  ;;  %v7596_v20 = vld [vmem:[%s11188_s1 + $0x468] ss:$16 sps:$4 sm:$0xff]   ;;  %v7601_v21 = vld [vmem:[%s11188_s1 + $0x484] ss:$16 sps:$4 sm:$0xff]  }
  0x54   :  { %4955 = vmatprep.subr.bf16.mxu0 %v7508_v22  ;;  %5514 = vmatprep.subr.bf16.mxu1 %v7511_v23  ;;  %v7604_v22 = vld [vmem:[%s11188_s1 + $0x48c] ss:$16 sps:$4 sm:$0xff]   ;;  %v7599_v23 = vld [vmem:[%s11188_s1 + $0x480] ss:$16 sps:$4 sm:$0xff]  }
  0x57   :  { %4956 = vmatpush1.bf16.msra.mxu0 %v7506_v24  ;;  %5515 = vmatpush1.bf16.msra.mxu1 %v7509_v25  ;;  %v7602_v24 = vld [vmem:[%s11188_s1 + $0x488] ss:$16 sps:$4 sm:$0xff]   ;;  %v7607_v25 = vld [vmem:[%s11188_s1 + $0x4a4] ss:$16 sps:$4 sm:$0xff]  }
  0x58   :  { %4957 = vmatprep.subr.bf16.mxu0 %v7514_v26  ;;  %5516 = vmatprep.subr.bf16.mxu1 %v7517_v27  ;;  %v7610_v26 = vld [vmem:[%s11188_s1 + $0x4ac] ss:$16 sps:$4 sm:$0xff]   ;;  %v7605_v27 = vld [vmem:[%s11188_s1 + $0x4a0] ss:$16 sps:$4 sm:$0xff]  }
  0x5b   :  { %4958 = vmatpush1.bf16.msra.mxu0 %v7512_v28  ;;  %5517 = vmatpush1.bf16.msra.mxu1 %v7515_v29  ;;  %v7608_v28 = vld [vmem:[%s11188_s1 + $0x4a8] ss:$16 sps:$4 sm:$0xff]   ;;  %v7613_v29 = vld [vmem:[%s11188_s1 + $0x4c4] ss:$16 sps:$4 sm:$0xff]  }
  0x5c   :  { %4959 = vmatprep.subr.bf16.mxu0 %v7520_v31  ;;  %5518 = vmatprep.subr.bf16.mxu1 %v7523_v32  ;;  %v7611_v31 = vld [vmem:[%s11188_s1 + $0x4c0] ss:$16 sps:$4 sm:$0xff]   ;;  %v7614_v32 = vld [vmem:[%s11188_s1 + $0x4c8] ss:$16 sps:$4 sm:$0xff]  }
  0x5f   :  { %4960 = vmatpush1.bf16.msra.mxu0 %v7518_v33  ;;  %5519 = vmatpush1.bf16.msra.mxu1 %v7521_v34  ;;  %v7619_v33 = vld [vmem:[%s11188_s1 + $0x4e4] ss:$16 sps:$4 sm:$0xff]   ;;  %v7622_v34 = vld [vmem:[%s11188_s1 + $0x4ec] ss:$16 sps:$4 sm:$0xff]  }
  0x60   :  { %4961 = vmatprep.subr.bf16.mxu0 %v7526_v35  ;;  %5520 = vmatprep.subr.bf16.mxu1 %v7529_v36  ;;  %v7617_v35 = vld [vmem:[%s11188_s1 + $0x4e0] ss:$16 sps:$4 sm:$0xff]   ;;  %v7620_v36 = vld [vmem:[%s11188_s1 + $0x4e8] ss:$16 sps:$4 sm:$0xff]  }
  0x63   :  { %4962 = vmatpush1.bf16.msra.mxu0 %v7524_v37  ;;  %5521 = vmatpush1.bf16.msra.mxu1 %v7527_v38  ;;  %v7625_v37 = vld [vmem:[%s11188_s1 + $0x504] ss:$16 sps:$4 sm:$0xff]   ;;  %v7628_v38 = vld [vmem:[%s11188_s1 + $0x50c] ss:$16 sps:$4 sm:$0xff]  }
  0x64   :  { %4963 = vmatprep.subr.bf16.mxu0 %v7532_v39  ;;  %5522 = vmatprep.subr.bf16.mxu1 %v7535_v40  ;;  %v7623_v39 = vld [vmem:[%s11188_s1 + $0x500] ss:$16 sps:$4 sm:$0xff]   ;;  %v7626_v40 = vld [vmem:[%s11188_s1 + $0x508] ss:$16 sps:$4 sm:$0xff]  }
  0x67   :  { %4964 = vmatpush1.bf16.msra.mxu0 %v7530_v41  ;;  %5523 = vmatpush1.bf16.msra.mxu1 %v7533_v42  ;;  %v7631_v41 = vld [vmem:[%s11188_s1 + $0x524] ss:$16 sps:$4 sm:$0xff]   ;;  %v7634_v42 = vld [vmem:[%s11188_s1 + $0x52c] ss:$16 sps:$4 sm:$0xff]  }
  0x68   :  { %4965 = vmatprep.subr.bf16.mxu0 %v7538_v43  ;;  %5524 = vmatprep.subr.bf16.mxu1 %v7541_v44  ;;  %v7629_v43 = vld [vmem:[%s11188_s1 + $0x520] ss:$16 sps:$4 sm:$0xff]   ;;  %v7632_v44 = vld [vmem:[%s11188_s1 + $0x528] ss:$16 sps:$4 sm:$0xff]  }
  0x6b   :  { %4966 = vmatpush1.bf16.msra.mxu0 %v7536_v45  ;;  %5525 = vmatpush1.bf16.msra.mxu1 %v7539_v46  ;;  %v7637_v45 = vld [vmem:[%s11188_s1 + $0x544] ss:$16 sps:$4 sm:$0xff]   ;;  %v7640_v46 = vld [vmem:[%s11188_s1 + $0x54c] ss:$16 sps:$4 sm:$0xff]  }
  0x6c   :  { %4967 = vmatprep.subr.bf16.mxu0 %v7544_v47  ;;  %5526 = vmatprep.subr.bf16.mxu1 %v7547_v48  ;;  %v7635_v47 = vld [vmem:[%s11188_s1 + $0x540] ss:$16 sps:$4 sm:$0xff]   ;;  %v7638_v48 = vld [vmem:[%s11188_s1 + $0x548] ss:$16 sps:$4 sm:$0xff]  }
  0x6f   :  { %4968 = vmatpush1.bf16.msra.mxu0 %v7542_v49  ;;  %5527 = vmatpush1.bf16.msra.mxu1 %v7545_v50  ;;  %v7643_v49 = vld [vmem:[%s11188_s1 + $0x564] ss:$16 sps:$4 sm:$0xff]   ;;  %v7646_v50 = vld [vmem:[%s11188_s1 + $0x56c] ss:$16 sps:$4 sm:$0xff]  }
  0x70   :  { %4969 = vmatprep.subr.bf16.mxu0 %v7550_v51  ;;  %5528 = vmatprep.subr.bf16.mxu1 %v7553_v52  ;;  %v7641_v51 = vld [vmem:[%s11188_s1 + $0x560] ss:$16 sps:$4 sm:$0xff]   ;;  %v7644_v52 = vld [vmem:[%s11188_s1 + $0x568] ss:$16 sps:$4 sm:$0xff]  }
  0x73   :  { %4970 = vmatpush1.bf16.msra.mxu0 %v7548_v53  ;;  %5529 = vmatpush1.bf16.msra.mxu1 %v7551_v54  ;;  %v7649_v53 = vld [vmem:[%s11188_s1 + $0x584] ss:$16 sps:$4 sm:$0xff]   ;;  %v7652_v54 = vld [vmem:[%s11188_s1 + $0x58c] ss:$16 sps:$4 sm:$0xff]  }
  0x74   :  { %4971 = vmatprep.subr.bf16.mxu0 %v7556_v55  ;;  %5530 = vmatprep.subr.bf16.mxu1 %v7559_v56  ;;  %v7647_v55 = vld [vmem:[%s11188_s1 + $0x580] ss:$16 sps:$4 sm:$0xff]   ;;  %v7650_v56 = vld [vmem:[%s11188_s1 + $0x588] ss:$16 sps:$4 sm:$0xff]  }
  0x77   :  { %4972 = vmatpush1.bf16.msra.mxu0 %v7554_v57  ;;  %5531 = vmatpush1.bf16.msra.mxu1 %v7557_v58  ;;  %v7655_v57 = vld [vmem:[%s11188_s1 + $0x5a4] ss:$16 sps:$4 sm:$0xff]   ;;  %v7658_v58 = vld [vmem:[%s11188_s1 + $0x5ac] ss:$16 sps:$4 sm:$0xff]  }
  0x78   :  { %4973 = vmatprep.subr.bf16.mxu0 %v7562_v59  ;;  %5532 = vmatprep.subr.bf16.mxu1 %v7565_v60  ;;  %v7653_v59 = vld [vmem:[%s11188_s1 + $0x5a0] ss:$16 sps:$4 sm:$0xff]   ;;  %v7656_v60 = vld [vmem:[%s11188_s1 + $0x5a8] ss:$16 sps:$4 sm:$0xff]  }
  0x7b   :  { %4974 = vmatpush1.bf16.msra.mxu0 %v7560_v61  ;;  %5533 = vmatpush1.bf16.msra.mxu1 %v7563_v62  ;;  %v7661_v61 = vld [vmem:[%s11188_s1 + $0x5c4] ss:$16 sps:$4 sm:$0xff]   ;;  %v7664_v62 = vld [vmem:[%s11188_s1 + $0x5cc] ss:$16 sps:$4 sm:$0xff]  }
  0x7c   :  { %4975 = vmatprep.subr.bf16.mxu0 %v7568_v63  ;;  %5534 = vmatprep.subr.bf16.mxu1 %v7571_v0  ;;  %v7659_v63 = vld [vmem:[%s11188_s1 + $0x5c0] ss:$16 sps:$4 sm:$0xff]   ;;  %v7662_v0 = vld [vmem:[%s11188_s1 + $0x5c8] ss:$16 sps:$4 sm:$0xff]  }
  0x7f   :  { %4976 = vmatpush1.bf16.msra.mxu0 %v7566_v1  ;;  %5535 = vmatpush1.bf16.msra.mxu1 %v7569_v2  ;;  %v7667_v1 = vld [vmem:[%s11188_s1 + $0x5e4] ss:$16 sps:$4 sm:$0xff]   ;;  %v7670_v2 = vld [vmem:[%s11188_s1 + $0x5ec] ss:$16 sps:$4 sm:$0xff]  }
  0x80   :  { %4988 = vmatprep.subr.bf16.mxu0 %v7577_v3  ;;  %5547 = vmatprep.subr.bf16.mxu1 %v7580_v4  ;;  %v7665_v3 = vld [vmem:[%s11188_s1 + $0x5e0] ss:$16 sps:$4 sm:$0xff]   ;;  %v7668_v4 = vld [vmem:[%s11188_s1 + $0x5e8] ss:$16 sps:$4 sm:$0xff]  }
  0x82   :  { %4978 = vmatmul.mubr.bf16.vlgmr.msra.gmra.mrb[0].mxu0 %v7572_v5  ;;  %5537 = vmatmul.mubr.bf16.vlgmr.msra.gmra.mrb[0].mxu1 %v7572_v5  ;;  %v7676_v5 = vld [vmem:[%s11188_s1 + $0x604] ss:$16 sps:$4 sm:$0xff]  }
  0x83   :  { %4989 = vmatpush1.bf16.msra.mxu0 %v7575_v6  ;;  %5548 = vmatpush1.bf16.msra.mxu1 %v7578_v7  ;;  %v7679_v6 = vld [vmem:[%s11188_s1 + $0x60c] ss:$16 sps:$4 sm:$0xff]   ;;  %v7671_v7 = vld [vmem:[%s11189_s0 + $0x10] ss:$100 sps:$4 sm:$0xff]  }
  0x84   :  { %4990 = vmatprep.subr.bf16.mxu0 %v7583_v8  ;;  %5549 = vmatprep.subr.bf16.mxu1 %v7586_v9  ;;  %v7674_v8 = vld [vmem:[%s11188_s1 + $0x600] ss:$16 sps:$4 sm:$0xff]   ;;  %v7677_v9 = vld [vmem:[%s11188_s1 + $0x608] ss:$16 sps:$4 sm:$0xff]  }
  0x85   :  { %5020 = vmatprep.mubr.bf16.mxu0 %v7673_v12  ;;  %5579 = vmatprep.mubr.bf16.mxu1 %v7673_v12  ;;  %v7772_v12 = vld [vmem:[%s11189_s0 + $0x1c] ss:$100 sps:$4 sm:$0xff]  }
  0x87   :  { %4991 = vmatpush1.bf16.msra.mxu0 %v7581_v10  ;;  %5550 = vmatpush1.bf16.msra.mxu1 %v7584_v11  ;;  %v7682_v10 = vld [vmem:[%s11188_s1 + $0x624] ss:$16 sps:$4 sm:$0xff]   ;;  %v7685_v11 = vld [vmem:[%s11188_s1 + $0x62c] ss:$16 sps:$4 sm:$0xff]  }
  0x88   :  { %4992 = vmatprep.subr.bf16.mxu0 %v7589_v13  ;;  %5551 = vmatprep.subr.bf16.mxu1 %v7592_v14  ;;  %v7680_v13 = vld [vmem:[%s11188_s1 + $0x620] ss:$16 sps:$4 sm:$0xff]   ;;  %v7683_v14 = vld [vmem:[%s11188_s1 + $0x628] ss:$16 sps:$4 sm:$0xff]  }
  0x8b   :  { %4993 = vmatpush1.bf16.msra.mxu0 %v7587_v15  ;;  %5552 = vmatpush1.bf16.msra.mxu1 %v7590_v16  ;;  %v7688_v15 = vld [vmem:[%s11188_s1 + $0x644] ss:$16 sps:$4 sm:$0xff]   ;;  %v7691_v16 = vld [vmem:[%s11188_s1 + $0x64c] ss:$16 sps:$4 sm:$0xff]  }
  0x8c   :  { %4994 = vmatprep.subr.bf16.mxu0 %v7595_v17  ;;  %5553 = vmatprep.subr.bf16.mxu1 %v7598_v18  ;;  %v7686_v17 = vld [vmem:[%s11188_s1 + $0x640] ss:$16 sps:$4 sm:$0xff]   ;;  %v7689_v18 = vld [vmem:[%s11188_s1 + $0x648] ss:$16 sps:$4 sm:$0xff]  }
  0x8f   :  { %4995 = vmatpush1.bf16.msra.mxu0 %v7593_v19  ;;  %5554 = vmatpush1.bf16.msra.mxu1 %v7596_v20  ;;  %v7694_v19 = vld [vmem:[%s11188_s1 + $0x664] ss:$16 sps:$4 sm:$0xff]   ;;  %v7697_v20 = vld [vmem:[%s11188_s1 + $0x66c] ss:$16 sps:$4 sm:$0xff]  }
  0x90   :  { %4996 = vmatprep.subr.bf16.mxu0 %v7601_v21  ;;  %5555 = vmatprep.subr.bf16.mxu1 %v7604_v22  ;;  %v7692_v21 = vld [vmem:[%s11188_s1 + $0x660] ss:$16 sps:$4 sm:$0xff]   ;;  %v7695_v22 = vld [vmem:[%s11188_s1 + $0x668] ss:$16 sps:$4 sm:$0xff]  }
  0x93   :  { %4997 = vmatpush1.bf16.msra.mxu0 %v7599_v23  ;;  %5556 = vmatpush1.bf16.msra.mxu1 %v7602_v24  ;;  %v7700_v23 = vld [vmem:[%s11188_s1 + $0x684] ss:$16 sps:$4 sm:$0xff]   ;;  %v7703_v24 = vld [vmem:[%s11188_s1 + $0x68c] ss:$16 sps:$4 sm:$0xff]  }
  0x94   :  { %4998 = vmatprep.subr.bf16.mxu0 %v7607_v25  ;;  %5557 = vmatprep.subr.bf16.mxu1 %v7610_v26  ;;  %v7698_v25 = vld [vmem:[%s11188_s1 + $0x680] ss:$16 sps:$4 sm:$0xff]   ;;  %v7701_v26 = vld [vmem:[%s11188_s1 + $0x688] ss:$16 sps:$4 sm:$0xff]  }
  0x97   :  { %4999 = vmatpush1.bf16.msra.mxu0 %v7605_v27  ;;  %5558 = vmatpush1.bf16.msra.mxu1 %v7608_v28  ;;  %v7706_v27 = vld [vmem:[%s11188_s1 + $0x6a4] ss:$16 sps:$4 sm:$0xff]   ;;  %v7709_v28 = vld [vmem:[%s11188_s1 + $0x6ac] ss:$16 sps:$4 sm:$0xff]  }
  0x98   :  { %5000 = vmatprep.subr.bf16.mxu0 %v7613_v29  ;;  %5559 = vmatprep.subr.bf16.mxu1 %v7616_v30  ;;  %v7704_v29 = vld [vmem:[%s11188_s1 + $0x6a0] ss:$16 sps:$4 sm:$0xff]   ;;  %v7707_v30 = vld [vmem:[%s11188_s1 + $0x6a8] ss:$16 sps:$4 sm:$0xff]  }
  0x9b   :  { %5001 = vmatpush1.bf16.msra.mxu0 %v7611_v31  ;;  %5560 = vmatpush1.bf16.msra.mxu1 %v7614_v32  ;;  %v7712_v31 = vld [vmem:[%s11188_s1 + $0x6c4] ss:$16 sps:$4 sm:$0xff]   ;;  %v7715_v32 = vld [vmem:[%s11188_s1 + $0x6cc] ss:$16 sps:$4 sm:$0xff]  }
  0x9c   :  { %5002 = vmatprep.subr.bf16.mxu0 %v7619_v33  ;;  %5561 = vmatprep.subr.bf16.mxu1 %v7622_v34  ;;  %v7710_v33 = vld [vmem:[%s11188_s1 + $0x6c0] ss:$16 sps:$4 sm:$0xff]   ;;  %v7713_v34 = vld [vmem:[%s11188_s1 + $0x6c8] ss:$16 sps:$4 sm:$0xff]  }
  0x9f   :  { %5003 = vmatpush1.bf16.msra.mxu0 %v7617_v35  ;;  %5562 = vmatpush1.bf16.msra.mxu1 %v7620_v36  ;;  %v7718_v35 = vld [vmem:[%s11188_s1 + $0x6e4] ss:$16 sps:$4 sm:$0xff]   ;;  %v7721_v36 = vld [vmem:[%s11188_s1 + $0x6ec] ss:$16 sps:$4 sm:$0xff]  }
  0xa0   :  { %5004 = vmatprep.subr.bf16.mxu0 %v7625_v37  ;;  %5563 = vmatprep.subr.bf16.mxu1 %v7628_v38  ;;  %v7716_v37 = vld [vmem:[%s11188_s1 + $0x6e0] ss:$16 sps:$4 sm:$0xff]   ;;  %v7719_v38 = vld [vmem:[%s11188_s1 + $0x6e8] ss:$16 sps:$4 sm:$0xff]  }
  0xa3   :  { %5005 = vmatpush1.bf16.msra.mxu0 %v7623_v39  ;;  %5564 = vmatpush1.bf16.msra.mxu1 %v7626_v40  ;;  %v7724_v39 = vld [vmem:[%s11188_s1 + $0x704] ss:$16 sps:$4 sm:$0xff]   ;;  %v7727_v40 = vld [vmem:[%s11188_s1 + $0x70c] ss:$16 sps:$4 sm:$0xff]  }
  0xa4   :  { %5006 = vmatprep.subr.bf16.mxu0 %v7631_v41  ;;  %5565 = vmatprep.subr.bf16.mxu1 %v7634_v42  ;;  %v7722_v41 = vld [vmem:[%s11188_s1 + $0x700] ss:$16 sps:$4 sm:$0xff]   ;;  %v7725_v42 = vld [vmem:[%s11188_s1 + $0x708] ss:$16 sps:$4 sm:$0xff]  }
  0xa7   :  { %5007 = vmatpush1.bf16.msra.mxu0 %v7629_v43  ;;  %5566 = vmatpush1.bf16.msra.mxu1 %v7632_v44  ;;  %v7730_v43 = vld [vmem:[%s11188_s1 + $0x724] ss:$16 sps:$4 sm:$0xff]   ;;  %v7733_v44 = vld [vmem:[%s11188_s1 + $0x72c] ss:$16 sps:$4 sm:$0xff]  }
  0xa8   :  { %5008 = vmatprep.subr.bf16.mxu0 %v7637_v45  ;;  %5567 = vmatprep.subr.bf16.mxu1 %v7640_v46  ;;  %v7728_v45 = vld [vmem:[%s11188_s1 + $0x720] ss:$16 sps:$4 sm:$0xff]   ;;  %v7731_v46 = vld [vmem:[%s11188_s1 + $0x728] ss:$16 sps:$4 sm:$0xff]  }
  0xab   :  { %5009 = vmatpush1.bf16.msra.mxu0 %v7635_v47  ;;  %5568 = vmatpush1.bf16.msra.mxu1 %v7638_v48  ;;  %v7736_v47 = vld [vmem:[%s11188_s1 + $0x744] ss:$16 sps:$4 sm:$0xff]   ;;  %v7739_v48 = vld [vmem:[%s11188_s1 + $0x74c] ss:$16 sps:$4 sm:$0xff]  }
  0xac   :  { %5010 = vmatprep.subr.bf16.mxu0 %v7643_v49  ;;  %5569 = vmatprep.subr.bf16.mxu1 %v7646_v50  ;;  %v7734_v49 = vld [vmem:[%s11188_s1 + $0x740] ss:$16 sps:$4 sm:$0xff]   ;;  %v7737_v50 = vld [vmem:[%s11188_s1 + $0x748] ss:$16 sps:$4 sm:$0xff]  }
  0xaf   :  { %5011 = vmatpush1.bf16.msra.mxu0 %v7641_v51  ;;  %5570 = vmatpush1.bf16.msra.mxu1 %v7644_v52  ;;  %v7742_v51 = vld [vmem:[%s11188_s1 + $0x764] ss:$16 sps:$4 sm:$0xff]   ;;  %v7745_v52 = vld [vmem:[%s11188_s1 + $0x76c] ss:$16 sps:$4 sm:$0xff]  }
  0xb0   :  { %5012 = vmatprep.subr.bf16.mxu0 %v7649_v53  ;;  %5571 = vmatprep.subr.bf16.mxu1 %v7652_v54  ;;  %v7740_v53 = vld [vmem:[%s11188_s1 + $0x760] ss:$16 sps:$4 sm:$0xff]   ;;  %v7743_v54 = vld [vmem:[%s11188_s1 + $0x768] ss:$16 sps:$4 sm:$0xff]  }
  0xb3   :  { %5013 = vmatpush1.bf16.msra.mxu0 %v7647_v55  ;;  %5572 = vmatpush1.bf16.msra.mxu1 %v7650_v56  ;;  %v7748_v55 = vld [vmem:[%s11188_s1 + $0x784] ss:$16 sps:$4 sm:$0xff]   ;;  %v7751_v56 = vld [vmem:[%s11188_s1 + $0x78c] ss:$16 sps:$4 sm:$0xff]  }
  0xb4   :  { %5014 = vmatprep.subr.bf16.mxu0 %v7655_v57  ;;  %5573 = vmatprep.subr.bf16.mxu1 %v7658_v58  ;;  %v7746_v57 = vld [vmem:[%s11188_s1 + $0x780] ss:$16 sps:$4 sm:$0xff]   ;;  %v7749_v58 = vld [vmem:[%s11188_s1 + $0x788] ss:$16 sps:$4 sm:$0xff]  }
  0xb7   :  { %5015 = vmatpush1.bf16.msra.mxu0 %v7653_v59  ;;  %5574 = vmatpush1.bf16.msra.mxu1 %v7656_v60  ;;  %v7754_v59 = vld [vmem:[%s11188_s1 + $0x7a4] ss:$16 sps:$4 sm:$0xff]   ;;  %v7757_v60 = vld [vmem:[%s11188_s1 + $0x7ac] ss:$16 sps:$4 sm:$0xff]  }
  0xb8   :  { %5016 = vmatprep.subr.bf16.mxu0 %v7661_v61  ;;  %5575 = vmatprep.subr.bf16.mxu1 %v7664_v62  ;;  %v7752_v61 = vld [vmem:[%s11188_s1 + $0x7a0] ss:$16 sps:$4 sm:$0xff]   ;;  %v7755_v62 = vld [vmem:[%s11188_s1 + $0x7a8] ss:$16 sps:$4 sm:$0xff]  }
  0xbb   :  { %5017 = vmatpush1.bf16.msra.mxu0 %v7659_v63  ;;  %5576 = vmatpush1.bf16.msra.mxu1 %v7662_v0  ;;  %v7760_v63 = vld [vmem:[%s11188_s1 + $0x7c4] ss:$16 sps:$4 sm:$0xff]   ;;  %v7763_v0 = vld [vmem:[%s11188_s1 + $0x7cc] ss:$16 sps:$4 sm:$0xff]  }
  0xbc   :  { %5018 = vmatprep.subr.bf16.mxu0 %v7667_v1  ;;  %5577 = vmatprep.subr.bf16.mxu1 %v7670_v2  ;;  %v7758_v1 = vld [vmem:[%s11188_s1 + $0x7c0] ss:$16 sps:$4 sm:$0xff]   ;;  %v7761_v2 = vld [vmem:[%s11188_s1 + $0x7c8] ss:$16 sps:$4 sm:$0xff]  }
  0xbf   :  { %5019 = vmatpush1.bf16.msra.mxu0 %v7665_v3  ;;  %5578 = vmatpush1.bf16.msra.mxu1 %v7668_v4  ;;  %v7766_v3 = vld [vmem:[%s11188_s1 + $0x7e4] ss:$16 sps:$4 sm:$0xff]   ;;  %v7769_v4 = vld [vmem:[%s11188_s1 + $0x7ec] ss:$16 sps:$4 sm:$0xff]  }
  0xc0   :  { %5031 = vmatprep.subr.bf16.mxu0 %v7676_v5  ;;  %5590 = vmatprep.subr.bf16.mxu1 %v7679_v6  ;;  %v7764_v5 = vld [vmem:[%s11188_s1 + $0x7e0] ss:$16 sps:$4 sm:$0xff]   ;;  %v7767_v6 = vld [vmem:[%s11188_s1 + $0x7e8] ss:$16 sps:$4 sm:$0xff]  }
  0xc2   :  { %5021 = vmatmul.mubr.bf16.vlgmr.msra.gmra.mrb[0].mxu0 %v7671_v7  ;;  %5580 = vmatmul.mubr.bf16.vlgmr.msra.gmra.mrb[0].mxu1 %v7671_v7  ;;  %v7775_v7 = vld [vmem:[%s11188_s1 + $0x804] ss:$16 sps:$4 sm:$0xff]  }
  0xc3   :  { %5032 = vmatpush1.bf16.msra.mxu0 %v7674_v8  ;;  %5591 = vmatpush1.bf16.msra.mxu1 %v7677_v9  ;;  %v7778_v8 = vld [vmem:[%s11188_s1 + $0x80c] ss:$16 sps:$4 sm:$0xff]  }
  0xc4   :  { %5033 = vmatprep.subr.bf16.mxu0 %v7682_v10  ;;  %5592 = vmatprep.subr.bf16.mxu1 %v7685_v11  ;;  %v7770_v9 = vld [vmem:[%s11189_s0 + $0x18] ss:$100 sps:$4 sm:$0xff]   ;;  %v7773_v10 = vld [vmem:[%s11188_s1 + $0x800] ss:$16 sps:$4 sm:$0xff]  }
  0xc5   :  { %5063 = vmatprep.mubr.bf16.mxu0 %v7772_v12  ;;  %5622 = vmatprep.mubr.bf16.mxu1 %v7772_v12  ;;  %v7776_v11 = vld [vmem:[%s11188_s1 + $0x808] ss:$16 sps:$4 sm:$0xff]   ;;  %v7781_v12 = vld [vmem:[%s11188_s1 + $0x824] ss:$16 sps:$4 sm:$0xff]  }
  0xc7   :  { %5034 = vmatpush1.bf16.msra.mxu0 %v7680_v13  ;;  %5593 = vmatpush1.bf16.msra.mxu1 %v7683_v14  ;;  %v7784_v13 = vld [vmem:[%s11188_s1 + $0x82c] ss:$16 sps:$4 sm:$0xff]   ;;  %v7871_v14 = vld [vmem:[%s11189_s0 + $0x24] ss:$100 sps:$4 sm:$0xff]  }
  0xc8   :  { %5035 = vmatprep.subr.bf16.mxu0 %v7688_v15  ;;  %5594 = vmatprep.subr.bf16.mxu1 %v7691_v16  ;;  %v7779_v15 = vld [vmem:[%s11188_s1 + $0x820] ss:$16 sps:$4 sm:$0xff]   ;;  %v7782_v16 = vld [vmem:[%s11188_s1 + $0x828] ss:$16 sps:$4 sm:$0xff]  }
  0xcb   :  { %5036 = vmatpush1.bf16.msra.mxu0 %v7686_v17  ;;  %5595 = vmatpush1.bf16.msra.mxu1 %v7689_v18  ;;  %v7787_v17 = vld [vmem:[%s11188_s1 + $0x844] ss:$16 sps:$4 sm:$0xff]   ;;  %v7790_v18 = vld [vmem:[%s11188_s1 + $0x84c] ss:$16 sps:$4 sm:$0xff]  }
  0xcc   :  { %5037 = vmatprep.subr.bf16.mxu0 %v7694_v19  ;;  %5596 = vmatprep.subr.bf16.mxu1 %v7697_v20  ;;  %v7785_v19 = vld [vmem:[%s11188_s1 + $0x840] ss:$16 sps:$4 sm:$0xff]   ;;  %v7788_v20 = vld [vmem:[%s11188_s1 + $0x848] ss:$16 sps:$4 sm:$0xff]  }
  0xcf   :  { %5038 = vmatpush1.bf16.msra.mxu0 %v7692_v21  ;;  %5597 = vmatpush1.bf16.msra.mxu1 %v7695_v22  ;;  %v7793_v21 = vld [vmem:[%s11188_s1 + $0x864] ss:$16 sps:$4 sm:$0xff]   ;;  %v7796_v22 = vld [vmem:[%s11188_s1 + $0x86c] ss:$16 sps:$4 sm:$0xff]  }
  0xd0   :  { %5039 = vmatprep.subr.bf16.mxu0 %v7700_v23  ;;  %5598 = vmatprep.subr.bf16.mxu1 %v7703_v24  ;;  %v7791_v23 = vld [vmem:[%s11188_s1 + $0x860] ss:$16 sps:$4 sm:$0xff]   ;;  %v7794_v24 = vld [vmem:[%s11188_s1 + $0x868] ss:$16 sps:$4 sm:$0xff]  }
  0xd3   :  { %5040 = vmatpush1.bf16.msra.mxu0 %v7698_v25  ;;  %5599 = vmatpush1.bf16.msra.mxu1 %v7701_v26  ;;  %v7799_v25 = vld [vmem:[%s11188_s1 + $0x884] ss:$16 sps:$4 sm:$0xff]   ;;  %v7802_v26 = vld [vmem:[%s11188_s1 + $0x88c] ss:$16 sps:$4 sm:$0xff]  }
  0xd4   :  { %5041 = vmatprep.subr.bf16.mxu0 %v7706_v27  ;;  %5600 = vmatprep.subr.bf16.mxu1 %v7709_v28  ;;  %v7797_v27 = vld [vmem:[%s11188_s1 + $0x880] ss:$16 sps:$4 sm:$0xff]   ;;  %v7800_v28 = vld [vmem:[%s11188_s1 + $0x888] ss:$16 sps:$4 sm:$0xff]  }
  0xd7   :  { %5042 = vmatpush1.bf16.msra.mxu0 %v7704_v29  ;;  %5601 = vmatpush1.bf16.msra.mxu1 %v7707_v30  ;;  %v7805_v29 = vld [vmem:[%s11188_s1 + $0x8a4] ss:$16 sps:$4 sm:$0xff]   ;;  %v7808_v30 = vld [vmem:[%s11188_s1 + $0x8ac] ss:$16 sps:$4 sm:$0xff]  }
  0xd8   :  { %5043 = vmatprep.subr.bf16.mxu0 %v7712_v31  ;;  %5602 = vmatprep.subr.bf16.mxu1 %v7715_v32  ;;  %v7803_v31 = vld [vmem:[%s11188_s1 + $0x8a0] ss:$16 sps:$4 sm:$0xff]   ;;  %v7806_v32 = vld [vmem:[%s11188_s1 + $0x8a8] ss:$16 sps:$4 sm:$0xff]  }
  0xdb   :  { %5044 = vmatpush1.bf16.msra.mxu0 %v7710_v33  ;;  %5603 = vmatpush1.bf16.msra.mxu1 %v7713_v34  ;;  %v7811_v33 = vld [vmem:[%s11188_s1 + $0x8c4] ss:$16 sps:$4 sm:$0xff]   ;;  %v7814_v34 = vld [vmem:[%s11188_s1 + $0x8cc] ss:$16 sps:$4 sm:$0xff]  }
  0xdc   :  { %5045 = vmatprep.subr.bf16.mxu0 %v7718_v35  ;;  %5604 = vmatprep.subr.bf16.mxu1 %v7721_v36  ;;  %v7809_v35 = vld [vmem:[%s11188_s1 + $0x8c0] ss:$16 sps:$4 sm:$0xff]   ;;  %v7812_v36 = vld [vmem:[%s11188_s1 + $0x8c8] ss:$16 sps:$4 sm:$0xff]  }
  0xdf   :  { %5046 = vmatpush1.bf16.msra.mxu0 %v7716_v37  ;;  %5605 = vmatpush1.bf16.msra.mxu1 %v7719_v38  ;;  %v7817_v37 = vld [vmem:[%s11188_s1 + $0x8e4] ss:$16 sps:$4 sm:$0xff]   ;;  %v7820_v38 = vld [vmem:[%s11188_s1 + $0x8ec] ss:$16 sps:$4 sm:$0xff]  }
  0xe0   :  { %5047 = vmatprep.subr.bf16.mxu0 %v7724_v39  ;;  %5606 = vmatprep.subr.bf16.mxu1 %v7727_v40  ;;  %v7815_v39 = vld [vmem:[%s11188_s1 + $0x8e0] ss:$16 sps:$4 sm:$0xff]   ;;  %v7818_v40 = vld [vmem:[%s11188_s1 + $0x8e8] ss:$16 sps:$4 sm:$0xff]  }
  0xe3   :  { %5048 = vmatpush1.bf16.msra.mxu0 %v7722_v41  ;;  %5607 = vmatpush1.bf16.msra.mxu1 %v7725_v42  ;;  %v7823_v41 = vld [vmem:[%s11188_s1 + $0x904] ss:$16 sps:$4 sm:$0xff]   ;;  %v7826_v42 = vld [vmem:[%s11188_s1 + $0x90c] ss:$16 sps:$4 sm:$0xff]  }
  0xe4   :  { %5049 = vmatprep.subr.bf16.mxu0 %v7730_v43  ;;  %5608 = vmatprep.subr.bf16.mxu1 %v7733_v44  ;;  %v7821_v43 = vld [vmem:[%s11188_s1 + $0x900] ss:$16 sps:$4 sm:$0xff]   ;;  %v7824_v44 = vld [vmem:[%s11188_s1 + $0x908] ss:$16 sps:$4 sm:$0xff]  }
  0xe7   :  { %5050 = vmatpush1.bf16.msra.mxu0 %v7728_v45  ;;  %5609 = vmatpush1.bf16.msra.mxu1 %v7731_v46  ;;  %v7829_v45 = vld [vmem:[%s11188_s1 + $0x924] ss:$16 sps:$4 sm:$0xff]   ;;  %v7832_v46 = vld [vmem:[%s11188_s1 + $0x92c] ss:$16 sps:$4 sm:$0xff]  }
  0xe8   :  { %5051 = vmatprep.subr.bf16.mxu0 %v7736_v47  ;;  %5610 = vmatprep.subr.bf16.mxu1 %v7739_v48  ;;  %v7827_v47 = vld [vmem:[%s11188_s1 + $0x920] ss:$16 sps:$4 sm:$0xff]   ;;  %v7830_v48 = vld [vmem:[%s11188_s1 + $0x928] ss:$16 sps:$4 sm:$0xff]  }
  0xeb   :  { %5052 = vmatpush1.bf16.msra.mxu0 %v7734_v49  ;;  %5611 = vmatpush1.bf16.msra.mxu1 %v7737_v50  ;;  %v7835_v49 = vld [vmem:[%s11188_s1 + $0x944] ss:$16 sps:$4 sm:$0xff]   ;;  %v7838_v50 = vld [vmem:[%s11188_s1 + $0x94c] ss:$16 sps:$4 sm:$0xff]  }
  0xec   :  { %5053 = vmatprep.subr.bf16.mxu0 %v7742_v51  ;;  %5612 = vmatprep.subr.bf16.mxu1 %v7745_v52  ;;  %v7833_v51 = vld [vmem:[%s11188_s1 + $0x940] ss:$16 sps:$4 sm:$0xff]   ;;  %v7836_v52 = vld [vmem:[%s11188_s1 + $0x948] ss:$16 sps:$4 sm:$0xff]  }
  0xef   :  { %5054 = vmatpush1.bf16.msra.mxu0 %v7740_v53  ;;  %5613 = vmatpush1.bf16.msra.mxu1 %v7743_v54  ;;  %v7841_v53 = vld [vmem:[%s11188_s1 + $0x964] ss:$16 sps:$4 sm:$0xff]   ;;  %v7844_v54 = vld [vmem:[%s11188_s1 + $0x96c] ss:$16 sps:$4 sm:$0xff]  }
  0xf0   :  { %5055 = vmatprep.subr.bf16.mxu0 %v7748_v55  ;;  %5614 = vmatprep.subr.bf16.mxu1 %v7751_v56  ;;  %v7839_v55 = vld [vmem:[%s11188_s1 + $0x960] ss:$16 sps:$4 sm:$0xff]   ;;  %v7842_v56 = vld [vmem:[%s11188_s1 + $0x968] ss:$16 sps:$4 sm:$0xff]  }
  0xf3   :  { %5056 = vmatpush1.bf16.msra.mxu0 %v7746_v57  ;;  %5615 = vmatpush1.bf16.msra.mxu1 %v7749_v58  ;;  %v7847_v57 = vld [vmem:[%s11188_s1 + $0x984] ss:$16 sps:$4 sm:$0xff]   ;;  %v7850_v58 = vld [vmem:[%s11188_s1 + $0x98c] ss:$16 sps:$4 sm:$0xff]  }
  0xf4   :  { %5057 = vmatprep.subr.bf16.mxu0 %v7754_v59  ;;  %5616 = vmatprep.subr.bf16.mxu1 %v7757_v60  ;;  %v7845_v59 = vld [vmem:[%s11188_s1 + $0x980] ss:$16 sps:$4 sm:$0xff]   ;;  %v7848_v60 = vld [vmem:[%s11188_s1 + $0x988] ss:$16 sps:$4 sm:$0xff]  }
  0xf7   :  { %5058 = vmatpush1.bf16.msra.mxu0 %v7752_v61  ;;  %5617 = vmatpush1.bf16.msra.mxu1 %v7755_v62  ;;  %v7853_v61 = vld [vmem:[%s11188_s1 + $0x9a4] ss:$16 sps:$4 sm:$0xff]   ;;  %v7856_v62 = vld [vmem:[%s11188_s1 + $0x9ac] ss:$16 sps:$4 sm:$0xff]  }
  0xf8   :  { %5059 = vmatprep.subr.bf16.mxu0 %v7760_v63  ;;  %5618 = vmatprep.subr.bf16.mxu1 %v7763_v0  ;;  %v7851_v63 = vld [vmem:[%s11188_s1 + $0x9a0] ss:$16 sps:$4 sm:$0xff]   ;;  %v7854_v0 = vld [vmem:[%s11188_s1 + $0x9a8] ss:$16 sps:$4 sm:$0xff]  }
  0xfb   :  { %5060 = vmatpush1.bf16.msra.mxu0 %v7758_v1  ;;  %5619 = vmatpush1.bf16.msra.mxu1 %v7761_v2  ;;  %v7859_v1 = vld [vmem:[%s11188_s1 + $0x9c4] ss:$16 sps:$4 sm:$0xff]   ;;  %v7862_v2 = vld [vmem:[%s11188_s1 + $0x9cc] ss:$16 sps:$4 sm:$0xff]  }
  0xfc   :  { %5061 = vmatprep.subr.bf16.mxu0 %v7766_v3  ;;  %5620 = vmatprep.subr.bf16.mxu1 %v7769_v4  ;;  %v7857_v3 = vld [vmem:[%s11188_s1 + $0x9c0] ss:$16 sps:$4 sm:$0xff]   ;;  %v7860_v4 = vld [vmem:[%s11188_s1 + $0x9c8] ss:$16 sps:$4 sm:$0xff]  }
  0xff   :  { %5062 = vmatpush1.bf16.msra.mxu0 %v7764_v5  ;;  %5621 = vmatpush1.bf16.msra.mxu1 %v7767_v6  ;;  %v7865_v5 = vld [vmem:[%s11188_s1 + $0x9e4] ss:$16 sps:$4 sm:$0xff]   ;;  %v7868_v6 = vld [vmem:[%s11188_s1 + $0x9ec] ss:$16 sps:$4 sm:$0xff]  }
 0x100   :  { %5074 = vmatprep.subr.bf16.mxu0 %v7775_v7  ;;  %5633 = vmatprep.subr.bf16.mxu1 %v7778_v8  ;;  %v7863_v7 = vld [vmem:[%s11188_s1 + $0x9e0] ss:$16 sps:$4 sm:$0xff]   ;;  %v7866_v8 = vld [vmem:[%s11188_s1 + $0x9e8] ss:$16 sps:$4 sm:$0xff]  }
 0x102   :  { %5064 = vmatmul.mubr.bf16.vlgmr.msra.gmra.mrb[0].mxu0 %v7770_v9  ;;  %5623 = vmatmul.mubr.bf16.vlgmr.msra.gmra.mrb[0].mxu1 %v7770_v9  ;;  %v7869_v9 = vld [vmem:[%s11189_s0 + $0x20] ss:$100 sps:$4 sm:$0xff]  }
 0x103   :  { %5075 = vmatpush1.bf16.msra.mxu0 %v7773_v10  ;;  %5634 = vmatpush1.bf16.msra.mxu1 %v7776_v11  ;;  %v7874_v10 = vld [vmem:[%s11188_s1 + $0xa04] ss:$16 sps:$4 sm:$0xff]   ;;  %v7877_v11 = vld [vmem:[%s11188_s1 + $0xa0c] ss:$16 sps:$4 sm:$0xff]  }
 0x104   :  { %5076 = vmatprep.subr.bf16.mxu0 %v7781_v12  ;;  %5635 = vmatprep.subr.bf16.mxu1 %v7784_v13  ;;  %v7872_v12 = vld [vmem:[%s11188_s1 + $0xa00] ss:$16 sps:$4 sm:$0xff]   ;;  %v7875_v13 = vld [vmem:[%s11188_s1 + $0xa08] ss:$16 sps:$4 sm:$0xff]  }
 0x105   :  { %5106 = vmatprep.mubr.bf16.mxu0 %v7871_v14  ;;  %5665 = vmatprep.mubr.bf16.mxu1 %v7871_v14  ;;  %v7880_v14 = vld [vmem:[%s11188_s1 + $0xa24] ss:$16 sps:$4 sm:$0xff]  }
 0x107   :  { %5077 = vmatpush1.bf16.msra.mxu0 %v7779_v15  ;;  %5636 = vmatpush1.bf16.msra.mxu1 %v7782_v16  ;;  %v7883_v15 = vld [vmem:[%s11188_s1 + $0xa2c] ss:$16 sps:$4 sm:$0xff]  }
 0x108   :  { %5078 = vmatprep.subr.bf16.mxu0 %v7787_v17  ;;  %5637 = vmatprep.subr.bf16.mxu1 %v7790_v18  ;;  %v7970_v16 = vld [vmem:[%s11189_s0 + $0x2c] ss:$100 sps:$4 sm:$0xff]   ;;  %v7881_v18 = vld [vmem:[%s11188_s1 + $0xa28] ss:$16 sps:$4 sm:$0xff]  }
 0x109   :  { %v7878_v17 = vld [vmem:[%s11188_s1 + $0xa20] ss:$16 sps:$4 sm:$0xff]  }
 0x10b   :  { %5079 = vmatpush1.bf16.msra.mxu0 %v7785_v19  ;;  %5638 = vmatpush1.bf16.msra.mxu1 %v7788_v20  ;;  %v7886_v19 = vld [vmem:[%s11188_s1 + $0xa44] ss:$16 sps:$4 sm:$0xff]   ;;  %v7889_v20 = vld [vmem:[%s11188_s1 + $0xa4c] ss:$16 sps:$4 sm:$0xff]  }
 0x10c   :  { %5080 = vmatprep.subr.bf16.mxu0 %v7793_v21  ;;  %5639 = vmatprep.subr.bf16.mxu1 %v7796_v22  ;;  %v7884_v21 = vld [vmem:[%s11188_s1 + $0xa40] ss:$16 sps:$4 sm:$0xff]   ;;  %v7887_v22 = vld [vmem:[%s11188_s1 + $0xa48] ss:$16 sps:$4 sm:$0xff]  }
 0x10f   :  { %5081 = vmatpush1.bf16.msra.mxu0 %v7791_v23  ;;  %5640 = vmatpush1.bf16.msra.mxu1 %v7794_v24  ;;  %v7892_v23 = vld [vmem:[%s11188_s1 + $0xa64] ss:$16 sps:$4 sm:$0xff]   ;;  %v7895_v24 = vld [vmem:[%s11188_s1 + $0xa6c] ss:$16 sps:$4 sm:$0xff]  }
 0x110   :  { %5082 = vmatprep.subr.bf16.mxu0 %v7799_v25  ;;  %5641 = vmatprep.subr.bf16.mxu1 %v7802_v26  ;;  %v7890_v25 = vld [vmem:[%s11188_s1 + $0xa60] ss:$16 sps:$4 sm:$0xff]   ;;  %v7893_v26 = vld [vmem:[%s11188_s1 + $0xa68] ss:$16 sps:$4 sm:$0xff]  }
 0x113   :  { %5083 = vmatpush1.bf16.msra.mxu0 %v7797_v27  ;;  %5642 = vmatpush1.bf16.msra.mxu1 %v7800_v28  ;;  %v7898_v27 = vld [vmem:[%s11188_s1 + $0xa84] ss:$16 sps:$4 sm:$0xff]   ;;  %v7901_v28 = vld [vmem:[%s11188_s1 + $0xa8c] ss:$16 sps:$4 sm:$0xff]  }
 0x114   :  { %5084 = vmatprep.subr.bf16.mxu0 %v7805_v29  ;;  %5643 = vmatprep.subr.bf16.mxu1 %v7808_v30  ;;  %v7896_v29 = vld [vmem:[%s11188_s1 + $0xa80] ss:$16 sps:$4 sm:$0xff]   ;;  %v7899_v30 = vld [vmem:[%s11188_s1 + $0xa88] ss:$16 sps:$4 sm:$0xff]  }
 0x117   :  { %5085 = vmatpush1.bf16.msra.mxu0 %v7803_v31  ;;  %5644 = vmatpush1.bf16.msra.mxu1 %v7806_v32  ;;  %v7904_v31 = vld [vmem:[%s11188_s1 + $0xaa4] ss:$16 sps:$4 sm:$0xff]   ;;  %v7907_v32 = vld [vmem:[%s11188_s1 + $0xaac] ss:$16 sps:$4 sm:$0xff]  }
 0x118   :  { %5086 = vmatprep.subr.bf16.mxu0 %v7811_v33  ;;  %5645 = vmatprep.subr.bf16.mxu1 %v7814_v34  ;;  %v7902_v33 = vld [vmem:[%s11188_s1 + $0xaa0] ss:$16 sps:$4 sm:$0xff]   ;;  %v7905_v34 = vld [vmem:[%s11188_s1 + $0xaa8] ss:$16 sps:$4 sm:$0xff]  }
 0x11b   :  { %5087 = vmatpush1.bf16.msra.mxu0 %v7809_v35  ;;  %5646 = vmatpush1.bf16.msra.mxu1 %v7812_v36  ;;  %v7910_v35 = vld [vmem:[%s11188_s1 + $0xac4] ss:$16 sps:$4 sm:$0xff]   ;;  %v7913_v36 = vld [vmem:[%s11188_s1 + $0xacc] ss:$16 sps:$4 sm:$0xff]  }
 0x11c   :  { %5088 = vmatprep.subr.bf16.mxu0 %v7817_v37  ;;  %5647 = vmatprep.subr.bf16.mxu1 %v7820_v38  ;;  %v7908_v37 = vld [vmem:[%s11188_s1 + $0xac0] ss:$16 sps:$4 sm:$0xff]   ;;  %v7911_v38 = vld [vmem:[%s11188_s1 + $0xac8] ss:$16 sps:$4 sm:$0xff]  }
 0x11f   :  { %5089 = vmatpush1.bf16.msra.mxu0 %v7815_v39  ;;  %5648 = vmatpush1.bf16.msra.mxu1 %v7818_v40  ;;  %v7916_v39 = vld [vmem:[%s11188_s1 + $0xae4] ss:$16 sps:$4 sm:$0xff]   ;;  %v7919_v40 = vld [vmem:[%s11188_s1 + $0xaec] ss:$16 sps:$4 sm:$0xff]  }
 0x120   :  { %5090 = vmatprep.subr.bf16.mxu0 %v7823_v41  ;;  %5649 = vmatprep.subr.bf16.mxu1 %v7826_v42  ;;  %v7914_v41 = vld [vmem:[%s11188_s1 + $0xae0] ss:$16 sps:$4 sm:$0xff]   ;;  %v7917_v42 = vld [vmem:[%s11188_s1 + $0xae8] ss:$16 sps:$4 sm:$0xff]  }
 0x123   :  { %5091 = vmatpush1.bf16.msra.mxu0 %v7821_v43  ;;  %5650 = vmatpush1.bf16.msra.mxu1 %v7824_v44  ;;  %v7922_v43 = vld [vmem:[%s11188_s1 + $0xb04] ss:$16 sps:$4 sm:$0xff]   ;;  %v7925_v44 = vld [vmem:[%s11188_s1 + $0xb0c] ss:$16 sps:$4 sm:$0xff]  }
 0x124   :  { %5092 = vmatprep.subr.bf16.mxu0 %v7829_v45  ;;  %5651 = vmatprep.subr.bf16.mxu1 %v7832_v46  ;;  %v7920_v45 = vld [vmem:[%s11188_s1 + $0xb00] ss:$16 sps:$4 sm:$0xff]   ;;  %v7923_v46 = vld [vmem:[%s11188_s1 + $0xb08] ss:$16 sps:$4 sm:$0xff]  }
 0x127   :  { %5093 = vmatpush1.bf16.msra.mxu0 %v7827_v47  ;;  %5652 = vmatpush1.bf16.msra.mxu1 %v7830_v48  ;;  %v7928_v47 = vld [vmem:[%s11188_s1 + $0xb24] ss:$16 sps:$4 sm:$0xff]   ;;  %v7931_v48 = vld [vmem:[%s11188_s1 + $0xb2c] ss:$16 sps:$4 sm:$0xff]  }
 0x128   :  { %5094 = vmatprep.subr.bf16.mxu0 %v7835_v49  ;;  %5653 = vmatprep.subr.bf16.mxu1 %v7838_v50  ;;  %v7926_v49 = vld [vmem:[%s11188_s1 + $0xb20] ss:$16 sps:$4 sm:$0xff]   ;;  %v7929_v50 = vld [vmem:[%s11188_s1 + $0xb28] ss:$16 sps:$4 sm:$0xff]  }
 0x12b   :  { %5095 = vmatpush1.bf16.msra.mxu0 %v7833_v51  ;;  %5654 = vmatpush1.bf16.msra.mxu1 %v7836_v52  ;;  %v7934_v51 = vld [vmem:[%s11188_s1 + $0xb44] ss:$16 sps:$4 sm:$0xff]   ;;  %v7937_v52 = vld [vmem:[%s11188_s1 + $0xb4c] ss:$16 sps:$4 sm:$0xff]  }
 0x12c   :  { %5096 = vmatprep.subr.bf16.mxu0 %v7841_v53  ;;  %5655 = vmatprep.subr.bf16.mxu1 %v7844_v54  ;;  %v7932_v53 = vld [vmem:[%s11188_s1 + $0xb40] ss:$16 sps:$4 sm:$0xff]   ;;  %v7935_v54 = vld [vmem:[%s11188_s1 + $0xb48] ss:$16 sps:$4 sm:$0xff]  }
 0x12f   :  { %5097 = vmatpush1.bf16.msra.mxu0 %v7839_v55  ;;  %5656 = vmatpush1.bf16.msra.mxu1 %v7842_v56  ;;  %v7940_v55 = vld [vmem:[%s11188_s1 + $0xb64] ss:$16 sps:$4 sm:$0xff]   ;;  %v7943_v56 = vld [vmem:[%s11188_s1 + $0xb6c] ss:$16 sps:$4 sm:$0xff]  }
 0x130   :  { %5098 = vmatprep.subr.bf16.mxu0 %v7847_v57  ;;  %5657 = vmatprep.subr.bf16.mxu1 %v7850_v58  ;;  %v7938_v57 = vld [vmem:[%s11188_s1 + $0xb60] ss:$16 sps:$4 sm:$0xff]   ;;  %v7941_v58 = vld [vmem:[%s11188_s1 + $0xb68] ss:$16 sps:$4 sm:$0xff]  }
 0x133   :  { %5099 = vmatpush1.bf16.msra.mxu0 %v7845_v59  ;;  %5658 = vmatpush1.bf16.msra.mxu1 %v7848_v60  ;;  %v7946_v59 = vld [vmem:[%s11188_s1 + $0xb84] ss:$16 sps:$4 sm:$0xff]   ;;  %v7949_v60 = vld [vmem:[%s11188_s1 + $0xb8c] ss:$16 sps:$4 sm:$0xff]  }
 0x134   :  { %5100 = vmatprep.subr.bf16.mxu0 %v7853_v61  ;;  %5659 = vmatprep.subr.bf16.mxu1 %v7856_v62  ;;  %v7944_v61 = vld [vmem:[%s11188_s1 + $0xb80] ss:$16 sps:$4 sm:$0xff]   ;;  %v7947_v62 = vld [vmem:[%s11188_s1 + $0xb88] ss:$16 sps:$4 sm:$0xff]  }
 0x137   :  { %5101 = vmatpush1.bf16.msra.mxu0 %v7851_v63  ;;  %5660 = vmatpush1.bf16.msra.mxu1 %v7854_v0  ;;  %v7952_v63 = vld [vmem:[%s11188_s1 + $0xba4] ss:$16 sps:$4 sm:$0xff]   ;;  %v7955_v0 = vld [vmem:[%s11188_s1 + $0xbac] ss:$16 sps:$4 sm:$0xff]  }
 0x138   :  { %5102 = vmatprep.subr.bf16.mxu0 %v7859_v1  ;;  %5661 = vmatprep.subr.bf16.mxu1 %v7862_v2  ;;  %v7950_v1 = vld [vmem:[%s11188_s1 + $0xba0] ss:$16 sps:$4 sm:$0xff]   ;;  %v7953_v2 = vld [vmem:[%s11188_s1 + $0xba8] ss:$16 sps:$4 sm:$0xff]  }
 0x13b   :  { %5103 = vmatpush1.bf16.msra.mxu0 %v7857_v3  ;;  %5662 = vmatpush1.bf16.msra.mxu1 %v7860_v4  ;;  %v7958_v3 = vld [vmem:[%s11188_s1 + $0xbc4] ss:$16 sps:$4 sm:$0xff]   ;;  %v7961_v4 = vld [vmem:[%s11188_s1 + $0xbcc] ss:$16 sps:$4 sm:$0xff]  }
 0x13c   :  { %5104 = vmatprep.subr.bf16.mxu0 %v7865_v5  ;;  %5663 = vmatprep.subr.bf16.mxu1 %v7868_v6  ;;  %v7956_v5 = vld [vmem:[%s11188_s1 + $0xbc0] ss:$16 sps:$4 sm:$0xff]   ;;  %v7959_v6 = vld [vmem:[%s11188_s1 + $0xbc8] ss:$16 sps:$4 sm:$0xff]  }
 0x13f   :  { %5105 = vmatpush1.bf16.msra.mxu0 %v7863_v7  ;;  %5664 = vmatpush1.bf16.msra.mxu1 %v7866_v8  ;;  %v7964_v7 = vld [vmem:[%s11188_s1 + $0xbe4] ss:$16 sps:$4 sm:$0xff]   ;;  %v7967_v8 = vld [vmem:[%s11188_s1 + $0xbec] ss:$16 sps:$4 sm:$0xff]  }
 0x140   :  { %5117 = vmatprep.subr.bf16.mxu0 %v7874_v10  ;;  %5676 = vmatprep.subr.bf16.mxu1 %v7877_v11  ;;  %v7965_v10 = vld [vmem:[%s11188_s1 + $0xbe8] ss:$16 sps:$4 sm:$0xff]  }
 0x141   :  { %v7968_v11 = vld [vmem:[%s11189_s0 + $0x28] ss:$100 sps:$4 sm:$0xff]  }
 0x142   :  { %5107 = vmatmul.mubr.bf16.vlgmr.msra.gmra.mrb[0].mxu0 %v7869_v9  ;;  %5666 = vmatmul.mubr.bf16.vlgmr.msra.gmra.mrb[0].mxu1 %v7869_v9  ;;  %v7962_v9 = vld [vmem:[%s11188_s1 + $0xbe0] ss:$16 sps:$4 sm:$0xff]  }
 0x143   :  { %5118 = vmatpush1.bf16.msra.mxu0 %v7872_v12  ;;  %5677 = vmatpush1.bf16.msra.mxu1 %v7875_v13  ;;  %v7973_v12 = vld [vmem:[%s11188_s1 + $0xc04] ss:$16 sps:$4 sm:$0xff]   ;;  %v7976_v13 = vld [vmem:[%s11188_s1 + $0xc0c] ss:$16 sps:$4 sm:$0xff]  }
 0x144   :  { %5119 = vmatprep.subr.bf16.mxu0 %v7880_v14  ;;  %5678 = vmatprep.subr.bf16.mxu1 %v7883_v15  ;;  %v7971_v14 = vld [vmem:[%s11188_s1 + $0xc00] ss:$16 sps:$4 sm:$0xff]   ;;  %v7974_v15 = vld [vmem:[%s11188_s1 + $0xc08] ss:$16 sps:$4 sm:$0xff]  }
 0x145   :  { %5149 = vmatprep.mubr.bf16.mxu0 %v7970_v16  ;;  %5708 = vmatprep.mubr.bf16.mxu1 %v7970_v16  ;;  %v7979_v16 = vld [vmem:[%s11188_s1 + $0xc24] ss:$16 sps:$4 sm:$0xff]  }
 0x147   :  { %5120 = vmatpush1.bf16.msra.mxu0 %v7878_v17  ;;  %5679 = vmatpush1.bf16.msra.mxu1 %v7881_v18  ;;  %v7982_v17 = vld [vmem:[%s11188_s1 + $0xc2c] ss:$16 sps:$4 sm:$0xff]   ;;  %v8069_v18 = vld [vmem:[%s11189_s0 + $0x34] ss:$100 sps:$4 sm:$0xff]  }
 0x148   :  { %5121 = vmatprep.subr.bf16.mxu0 %v7886_v19  ;;  %5680 = vmatprep.subr.bf16.mxu1 %v7889_v20  ;;  %v7977_v19 = vld [vmem:[%s11188_s1 + $0xc20] ss:$16 sps:$4 sm:$0xff]   ;;  %v7980_v20 = vld [vmem:[%s11188_s1 + $0xc28] ss:$16 sps:$4 sm:$0xff]  }
 0x14b   :  { %5122 = vmatpush1.bf16.msra.mxu0 %v7884_v21  ;;  %5681 = vmatpush1.bf16.msra.mxu1 %v7887_v22  ;;  %v7985_v21 = vld [vmem:[%s11188_s1 + $0xc44] ss:$16 sps:$4 sm:$0xff]   ;;  %v7988_v22 = vld [vmem:[%s11188_s1 + $0xc4c] ss:$16 sps:$4 sm:$0xff]  }
 0x14c   :  { %5123 = vmatprep.subr.bf16.mxu0 %v7892_v23  ;;  %5682 = vmatprep.subr.bf16.mxu1 %v7895_v24  ;;  %v7983_v23 = vld [vmem:[%s11188_s1 + $0xc40] ss:$16 sps:$4 sm:$0xff]   ;;  %v7986_v24 = vld [vmem:[%s11188_s1 + $0xc48] ss:$16 sps:$4 sm:$0xff]  }
 0x14f   :  { %5124 = vmatpush1.bf16.msra.mxu0 %v7890_v25  ;;  %5683 = vmatpush1.bf16.msra.mxu1 %v7893_v26  ;;  %v7991_v25 = vld [vmem:[%s11188_s1 + $0xc64] ss:$16 sps:$4 sm:$0xff]   ;;  %v7994_v26 = vld [vmem:[%s11188_s1 + $0xc6c] ss:$16 sps:$4 sm:$0xff]  }
 0x150   :  { %5125 = vmatprep.subr.bf16.mxu0 %v7898_v27  ;;  %5684 = vmatprep.subr.bf16.mxu1 %v7901_v28  ;;  %v7989_v27 = vld [vmem:[%s11188_s1 + $0xc60] ss:$16 sps:$4 sm:$0xff]   ;;  %v7992_v28 = vld [vmem:[%s11188_s1 + $0xc68] ss:$16 sps:$4 sm:$0xff]  }
 0x153   :  { %5126 = vmatpush1.bf16.msra.mxu0 %v7896_v29  ;;  %5685 = vmatpush1.bf16.msra.mxu1 %v7899_v30  ;;  %v7997_v29 = vld [vmem:[%s11188_s1 + $0xc84] ss:$16 sps:$4 sm:$0xff]   ;;  %v8000_v30 = vld [vmem:[%s11188_s1 + $0xc8c] ss:$16 sps:$4 sm:$0xff]  }
 0x154   :  { %5127 = vmatprep.subr.bf16.mxu0 %v7904_v31  ;;  %5686 = vmatprep.subr.bf16.mxu1 %v7907_v32  ;;  %v7995_v31 = vld [vmem:[%s11188_s1 + $0xc80] ss:$16 sps:$4 sm:$0xff]   ;;  %v7998_v32 = vld [vmem:[%s11188_s1 + $0xc88] ss:$16 sps:$4 sm:$0xff]  }
 0x157   :  { %5128 = vmatpush1.bf16.msra.mxu0 %v7902_v33  ;;  %5687 = vmatpush1.bf16.msra.mxu1 %v7905_v34  ;;  %v8003_v33 = vld [vmem:[%s11188_s1 + $0xca4] ss:$16 sps:$4 sm:$0xff]   ;;  %v8006_v34 = vld [vmem:[%s11188_s1 + $0xcac] ss:$16 sps:$4 sm:$0xff]  }
 0x158   :  { %5129 = vmatprep.subr.bf16.mxu0 %v7910_v35  ;;  %5688 = vmatprep.subr.bf16.mxu1 %v7913_v36  ;;  %v8001_v35 = vld [vmem:[%s11188_s1 + $0xca0] ss:$16 sps:$4 sm:$0xff]   ;;  %v8004_v36 = vld [vmem:[%s11188_s1 + $0xca8] ss:$16 sps:$4 sm:$0xff]  }
 0x15b   :  { %5130 = vmatpush1.bf16.msra.mxu0 %v7908_v37  ;;  %5689 = vmatpush1.bf16.msra.mxu1 %v7911_v38  ;;  %v8009_v37 = vld [vmem:[%s11188_s1 + $0xcc4] ss:$16 sps:$4 sm:$0xff]   ;;  %v8012_v38 = vld [vmem:[%s11188_s1 + $0xccc] ss:$16 sps:$4 sm:$0xff]  }
 0x15c   :  { %5131 = vmatprep.subr.bf16.mxu0 %v7916_v39  ;;  %5690 = vmatprep.subr.bf16.mxu1 %v7919_v40  ;;  %v8007_v39 = vld [vmem:[%s11188_s1 + $0xcc0] ss:$16 sps:$4 sm:$0xff]   ;;  %v8010_v40 = vld [vmem:[%s11188_s1 + $0xcc8] ss:$16 sps:$4 sm:$0xff]  }
 0x15f   :  { %5132 = vmatpush1.bf16.msra.mxu0 %v7914_v41  ;;  %5691 = vmatpush1.bf16.msra.mxu1 %v7917_v42  ;;  %v8015_v41 = vld [vmem:[%s11188_s1 + $0xce4] ss:$16 sps:$4 sm:$0xff]   ;;  %v8018_v42 = vld [vmem:[%s11188_s1 + $0xcec] ss:$16 sps:$4 sm:$0xff]  }
 0x160   :  { %5133 = vmatprep.subr.bf16.mxu0 %v7922_v43  ;;  %5692 = vmatprep.subr.bf16.mxu1 %v7925_v44  ;;  %v8013_v43 = vld [vmem:[%s11188_s1 + $0xce0] ss:$16 sps:$4 sm:$0xff]   ;;  %v8016_v44 = vld [vmem:[%s11188_s1 + $0xce8] ss:$16 sps:$4 sm:$0xff]  }
 0x163   :  { %5134 = vmatpush1.bf16.msra.mxu0 %v7920_v45  ;;  %5693 = vmatpush1.bf16.msra.mxu1 %v7923_v46  ;;  %v8021_v45 = vld [vmem:[%s11188_s1 + $0xd04] ss:$16 sps:$4 sm:$0xff]   ;;  %v8024_v46 = vld [vmem:[%s11188_s1 + $0xd0c] ss:$16 sps:$4 sm:$0xff]  }
 0x164   :  { %5135 = vmatprep.subr.bf16.mxu0 %v7928_v47  ;;  %5694 = vmatprep.subr.bf16.mxu1 %v7931_v48  ;;  %v8019_v47 = vld [vmem:[%s11188_s1 + $0xd00] ss:$16 sps:$4 sm:$0xff]   ;;  %v8022_v48 = vld [vmem:[%s11188_s1 + $0xd08] ss:$16 sps:$4 sm:$0xff]  }
 0x167   :  { %5136 = vmatpush1.bf16.msra.mxu0 %v7926_v49  ;;  %5695 = vmatpush1.bf16.msra.mxu1 %v7929_v50  ;;  %v8027_v49 = vld [vmem:[%s11188_s1 + $0xd24] ss:$16 sps:$4 sm:$0xff]   ;;  %v8030_v50 = vld [vmem:[%s11188_s1 + $0xd2c] ss:$16 sps:$4 sm:$0xff]  }
 0x168   :  { %5137 = vmatprep.subr.bf16.mxu0 %v7934_v51  ;;  %5696 = vmatprep.subr.bf16.mxu1 %v7937_v52  ;;  %v8025_v51 = vld [vmem:[%s11188_s1 + $0xd20] ss:$16 sps:$4 sm:$0xff]   ;;  %v8028_v52 = vld [vmem:[%s11188_s1 + $0xd28] ss:$16 sps:$4 sm:$0xff]  }
 0x16b   :  { %5138 = vmatpush1.bf16.msra.mxu0 %v7932_v53  ;;  %5697 = vmatpush1.bf16.msra.mxu1 %v7935_v54  ;;  %v8033_v53 = vld [vmem:[%s11188_s1 + $0xd44] ss:$16 sps:$4 sm:$0xff]   ;;  %v8036_v54 = vld [vmem:[%s11188_s1 + $0xd4c] ss:$16 sps:$4 sm:$0xff]  }
 0x16c   :  { %5139 = vmatprep.subr.bf16.mxu0 %v7940_v55  ;;  %5698 = vmatprep.subr.bf16.mxu1 %v7943_v56  ;;  %v8031_v55 = vld [vmem:[%s11188_s1 + $0xd40] ss:$16 sps:$4 sm:$0xff]   ;;  %v8034_v56 = vld [vmem:[%s11188_s1 + $0xd48] ss:$16 sps:$4 sm:$0xff]  }
 0x16f   :  { %5140 = vmatpush1.bf16.msra.mxu0 %v7938_v57  ;;  %5699 = vmatpush1.bf16.msra.mxu1 %v7941_v58  ;;  %v8039_v57 = vld [vmem:[%s11188_s1 + $0xd64] ss:$16 sps:$4 sm:$0xff]   ;;  %v8042_v58 = vld [vmem:[%s11188_s1 + $0xd6c] ss:$16 sps:$4 sm:$0xff]  }
 0x170   :  { %5141 = vmatprep.subr.bf16.mxu0 %v7946_v59  ;;  %5700 = vmatprep.subr.bf16.mxu1 %v7949_v60  ;;  %v8037_v59 = vld [vmem:[%s11188_s1 + $0xd60] ss:$16 sps:$4 sm:$0xff]   ;;  %v8040_v60 = vld [vmem:[%s11188_s1 + $0xd68] ss:$16 sps:$4 sm:$0xff]  }
 0x173   :  { %5142 = vmatpush1.bf16.msra.mxu0 %v7944_v61  ;;  %5701 = vmatpush1.bf16.msra.mxu1 %v7947_v62  ;;  %v8045_v61 = vld [vmem:[%s11188_s1 + $0xd84] ss:$16 sps:$4 sm:$0xff]   ;;  %v8048_v62 = vld [vmem:[%s11188_s1 + $0xd8c] ss:$16 sps:$4 sm:$0xff]  }
 0x174   :  { %5143 = vmatprep.subr.bf16.mxu0 %v7952_v63  ;;  %5702 = vmatprep.subr.bf16.mxu1 %v7955_v0  ;;  %v8043_v63 = vld [vmem:[%s11188_s1 + $0xd80] ss:$16 sps:$4 sm:$0xff]   ;;  %v8046_v0 = vld [vmem:[%s11188_s1 + $0xd88] ss:$16 sps:$4 sm:$0xff]  }
 0x177   :  { %5144 = vmatpush1.bf16.msra.mxu0 %v7950_v1  ;;  %5703 = vmatpush1.bf16.msra.mxu1 %v7953_v2  ;;  %v8051_v1 = vld [vmem:[%s11188_s1 + $0xda4] ss:$16 sps:$4 sm:$0xff]   ;;  %v8054_v2 = vld [vmem:[%s11188_s1 + $0xdac] ss:$16 sps:$4 sm:$0xff]  }
 0x178   :  { %5145 = vmatprep.subr.bf16.mxu0 %v7958_v3  ;;  %5704 = vmatprep.subr.bf16.mxu1 %v7961_v4  ;;  %v8049_v3 = vld [vmem:[%s11188_s1 + $0xda0] ss:$16 sps:$4 sm:$0xff]   ;;  %v8052_v4 = vld [vmem:[%s11188_s1 + $0xda8] ss:$16 sps:$4 sm:$0xff]  }
 0x17b   :  { %5146 = vmatpush1.bf16.msra.mxu0 %v7956_v5  ;;  %5705 = vmatpush1.bf16.msra.mxu1 %v7959_v6  ;;  %v8057_v5 = vld [vmem:[%s11188_s1 + $0xdc4] ss:$16 sps:$4 sm:$0xff]   ;;  %v8060_v6 = vld [vmem:[%s11188_s1 + $0xdcc] ss:$16 sps:$4 sm:$0xff]  }
 0x17c   :  { %5147 = vmatprep.subr.bf16.mxu0 %v7964_v7  ;;  %5706 = vmatprep.subr.bf16.mxu1 %v7967_v8  ;;  %v8055_v7 = vld [vmem:[%s11188_s1 + $0xdc0] ss:$16 sps:$4 sm:$0xff]   ;;  %v8058_v8 = vld [vmem:[%s11188_s1 + $0xdc8] ss:$16 sps:$4 sm:$0xff]  }
 0x17f   :  { %5148 = vmatpush1.bf16.msra.mxu0 %v7962_v9  ;;  %5707 = vmatpush1.bf16.msra.mxu1 %v7965_v10  ;;  %v8063_v9 = vld [vmem:[%s11188_s1 + $0xde4] ss:$16 sps:$4 sm:$0xff]   ;;  %v8066_v10 = vld [vmem:[%s11188_s1 + $0xdec] ss:$16 sps:$4 sm:$0xff]  }
 0x180   :  { %5160 = vmatprep.subr.bf16.mxu0 %v7973_v12  ;;  %5719 = vmatprep.subr.bf16.mxu1 %v7976_v13  ;;  %v8064_v12 = vld [vmem:[%s11188_s1 + $0xde8] ss:$16 sps:$4 sm:$0xff]   ;;  %v8067_v13 = vld [vmem:[%s11189_s0 + $0x30] ss:$100 sps:$4 sm:$0xff]  }
 0x182   :  { %5150 = vmatmul.mubr.bf16.vlgmr.msra.gmra.mrb[0].mxu0 %v7968_v11  ;;  %5709 = vmatmul.mubr.bf16.vlgmr.msra.gmra.mrb[0].mxu1 %v7968_v11  ;;  %v8061_v11 = vld [vmem:[%s11188_s1 + $0xde0] ss:$16 sps:$4 sm:$0xff]  }
 0x183   :  { %5161 = vmatpush1.bf16.msra.mxu0 %v7971_v14  ;;  %5720 = vmatpush1.bf16.msra.mxu1 %v7974_v15  ;;  %v8072_v14 = vld [vmem:[%s11188_s1 + $0xe04] ss:$16 sps:$4 sm:$0xff]   ;;  %v8075_v15 = vld [vmem:[%s11188_s1 + $0xe0c] ss:$16 sps:$4 sm:$0xff]  }
 0x184   :  { %5162 = vmatprep.subr.bf16.mxu0 %v7979_v16  ;;  %5721 = vmatprep.subr.bf16.mxu1 %v7982_v17  ;;  %v8070_v16 = vld [vmem:[%s11188_s1 + $0xe00] ss:$16 sps:$4 sm:$0xff]   ;;  %v8073_v17 = vld [vmem:[%s11188_s1 + $0xe08] ss:$16 sps:$4 sm:$0xff]  }
 0x185   :  { %5192 = vmatprep.mubr.bf16.mxu0 %v8069_v18  ;;  %5751 = vmatprep.mubr.bf16.mxu1 %v8069_v18  ;;  %v8078_v18 = vld [vmem:[%s11188_s1 + $0xe24] ss:$16 sps:$4 sm:$0xff]  }
 0x187   :  { %5163 = vmatpush1.bf16.msra.mxu0 %v7977_v19  ;;  %5722 = vmatpush1.bf16.msra.mxu1 %v7980_v20  ;;  %v8081_v19 = vld [vmem:[%s11188_s1 + $0xe2c] ss:$16 sps:$4 sm:$0xff]  }
 0x188   :  { %5164 = vmatprep.subr.bf16.mxu0 %v7985_v21  ;;  %5723 = vmatprep.subr.bf16.mxu1 %v7988_v22  ;;  %v8168_v20 = vld [vmem:[%s11189_s0 + $0x3c] ss:$100 sps:$4 sm:$0xff]   ;;  %v8079_v22 = vld [vmem:[%s11188_s1 + $0xe28] ss:$16 sps:$4 sm:$0xff]  }
 0x189   :  { %v8076_v21 = vld [vmem:[%s11188_s1 + $0xe20] ss:$16 sps:$4 sm:$0xff]  }
 0x18b   :  { %5165 = vmatpush1.bf16.msra.mxu0 %v7983_v23  ;;  %5724 = vmatpush1.bf16.msra.mxu1 %v7986_v24  ;;  %v8084_v23 = vld [vmem:[%s11188_s1 + $0xe44] ss:$16 sps:$4 sm:$0xff]   ;;  %v8087_v24 = vld [vmem:[%s11188_s1 + $0xe4c] ss:$16 sps:$4 sm:$0xff]  }
 0x18c   :  { %5166 = vmatprep.subr.bf16.mxu0 %v7991_v25  ;;  %5725 = vmatprep.subr.bf16.mxu1 %v7994_v26  ;;  %v8082_v25 = vld [vmem:[%s11188_s1 + $0xe40] ss:$16 sps:$4 sm:$0xff]   ;;  %v8085_v26 = vld [vmem:[%s11188_s1 + $0xe48] ss:$16 sps:$4 sm:$0xff]  }
 0x18f   :  { %5167 = vmatpush1.bf16.msra.mxu0 %v7989_v27  ;;  %5726 = vmatpush1.bf16.msra.mxu1 %v7992_v28  ;;  %v8090_v27 = vld [vmem:[%s11188_s1 + $0xe64] ss:$16 sps:$4 sm:$0xff]   ;;  %v8093_v28 = vld [vmem:[%s11188_s1 + $0xe6c] ss:$16 sps:$4 sm:$0xff]  }
 0x190   :  { %5168 = vmatprep.subr.bf16.mxu0 %v7997_v29  ;;  %5727 = vmatprep.subr.bf16.mxu1 %v8000_v30  ;;  %v8088_v29 = vld [vmem:[%s11188_s1 + $0xe60] ss:$16 sps:$4 sm:$0xff]   ;;  %v8091_v30 = vld [vmem:[%s11188_s1 + $0xe68] ss:$16 sps:$4 sm:$0xff]  }
 0x193   :  { %5169 = vmatpush1.bf16.msra.mxu0 %v7995_v31  ;;  %5728 = vmatpush1.bf16.msra.mxu1 %v7998_v32  ;;  %v8096_v31 = vld [vmem:[%s11188_s1 + $0xe84] ss:$16 sps:$4 sm:$0xff]   ;;  %v8099_v32 = vld [vmem:[%s11188_s1 + $0xe8c] ss:$16 sps:$4 sm:$0xff]  }
 0x194   :  { %5170 = vmatprep.subr.bf16.mxu0 %v8003_v33  ;;  %5729 = vmatprep.subr.bf16.mxu1 %v8006_v34  ;;  %v8094_v33 = vld [vmem:[%s11188_s1 + $0xe80] ss:$16 sps:$4 sm:$0xff]   ;;  %v8097_v34 = vld [vmem:[%s11188_s1 + $0xe88] ss:$16 sps:$4 sm:$0xff]  }
 0x197   :  { %5171 = vmatpush1.bf16.msra.mxu0 %v8001_v35  ;;  %5730 = vmatpush1.bf16.msra.mxu1 %v8004_v36  ;;  %v8102_v35 = vld [vmem:[%s11188_s1 + $0xea4] ss:$16 sps:$4 sm:$0xff]   ;;  %v8105_v36 = vld [vmem:[%s11188_s1 + $0xeac] ss:$16 sps:$4 sm:$0xff]  }
 0x198   :  { %5172 = vmatprep.subr.bf16.mxu0 %v8009_v37  ;;  %5731 = vmatprep.subr.bf16.mxu1 %v8012_v38  ;;  %v8100_v37 = vld [vmem:[%s11188_s1 + $0xea0] ss:$16 sps:$4 sm:$0xff]   ;;  %v8103_v38 = vld [vmem:[%s11188_s1 + $0xea8] ss:$16 sps:$4 sm:$0xff]  }
 0x19b   :  { %5173 = vmatpush1.bf16.msra.mxu0 %v8007_v39  ;;  %5732 = vmatpush1.bf16.msra.mxu1 %v8010_v40  ;;  %v8108_v39 = vld [vmem:[%s11188_s1 + $0xec4] ss:$16 sps:$4 sm:$0xff]   ;;  %v8111_v40 = vld [vmem:[%s11188_s1 + $0xecc] ss:$16 sps:$4 sm:$0xff]  }
 0x19c   :  { %5174 = vmatprep.subr.bf16.mxu0 %v8015_v41  ;;  %5733 = vmatprep.subr.bf16.mxu1 %v8018_v42  ;;  %v8106_v41 = vld [vmem:[%s11188_s1 + $0xec0] ss:$16 sps:$4 sm:$0xff]   ;;  %v8109_v42 = vld [vmem:[%s11188_s1 + $0xec8] ss:$16 sps:$4 sm:$0xff]  }
 0x19f   :  { %5175 = vmatpush1.bf16.msra.mxu0 %v8013_v43  ;;  %5734 = vmatpush1.bf16.msra.mxu1 %v8016_v44  ;;  %v8114_v43 = vld [vmem:[%s11188_s1 + $0xee4] ss:$16 sps:$4 sm:$0xff]   ;;  %v8117_v44 = vld [vmem:[%s11188_s1 + $0xeec] ss:$16 sps:$4 sm:$0xff]  }
 0x1a0   :  { %5176 = vmatprep.subr.bf16.mxu0 %v8021_v45  ;;  %5735 = vmatprep.subr.bf16.mxu1 %v8024_v46  ;;  %v8112_v45 = vld [vmem:[%s11188_s1 + $0xee0] ss:$16 sps:$4 sm:$0xff]   ;;  %v8115_v46 = vld [vmem:[%s11188_s1 + $0xee8] ss:$16 sps:$4 sm:$0xff]  }
 0x1a3   :  { %5177 = vmatpush1.bf16.msra.mxu0 %v8019_v47  ;;  %5736 = vmatpush1.bf16.msra.mxu1 %v8022_v48  ;;  %v8120_v47 = vld [vmem:[%s11188_s1 + $0xf04] ss:$16 sps:$4 sm:$0xff]   ;;  %v8123_v48 = vld [vmem:[%s11188_s1 + $0xf0c] ss:$16 sps:$4 sm:$0xff]  }
 0x1a4   :  { %5178 = vmatprep.subr.bf16.mxu0 %v8027_v49  ;;  %5737 = vmatprep.subr.bf16.mxu1 %v8030_v50  ;;  %v8118_v49 = vld [vmem:[%s11188_s1 + $0xf00] ss:$16 sps:$4 sm:$0xff]   ;;  %v8121_v50 = vld [vmem:[%s11188_s1 + $0xf08] ss:$16 sps:$4 sm:$0xff]  }
 0x1a7   :  { %5179 = vmatpush1.bf16.msra.mxu0 %v8025_v51  ;;  %5738 = vmatpush1.bf16.msra.mxu1 %v8028_v52  ;;  %v8126_v51 = vld [vmem:[%s11188_s1 + $0xf24] ss:$16 sps:$4 sm:$0xff]   ;;  %v8129_v52 = vld [vmem:[%s11188_s1 + $0xf2c] ss:$16 sps:$4 sm:$0xff]  }
 0x1a8   :  { %5180 = vmatprep.subr.bf16.mxu0 %v8033_v53  ;;  %5739 = vmatprep.subr.bf16.mxu1 %v8036_v54  ;;  %v8124_v53 = vld [vmem:[%s11188_s1 + $0xf20] ss:$16 sps:$4 sm:$0xff]   ;;  %v8127_v54 = vld [vmem:[%s11188_s1 + $0xf28] ss:$16 sps:$4 sm:$0xff]  }
 0x1ab   :  { %5181 = vmatpush1.bf16.msra.mxu0 %v8031_v55  ;;  %5740 = vmatpush1.bf16.msra.mxu1 %v8034_v56  ;;  %v8132_v55 = vld [vmem:[%s11188_s1 + $0xf44] ss:$16 sps:$4 sm:$0xff]   ;;  %v8135_v56 = vld [vmem:[%s11188_s1 + $0xf4c] ss:$16 sps:$4 sm:$0xff]  }
 0x1ac   :  { %5182 = vmatprep.subr.bf16.mxu0 %v8039_v57  ;;  %5741 = vmatprep.subr.bf16.mxu1 %v8042_v58  ;;  %v8130_v57 = vld [vmem:[%s11188_s1 + $0xf40] ss:$16 sps:$4 sm:$0xff]   ;;  %v8133_v58 = vld [vmem:[%s11188_s1 + $0xf48] ss:$16 sps:$4 sm:$0xff]  }
 0x1af   :  { %5183 = vmatpush1.bf16.msra.mxu0 %v8037_v59  ;;  %5742 = vmatpush1.bf16.msra.mxu1 %v8040_v60  ;;  %v8138_v59 = vld [vmem:[%s11188_s1 + $0xf64] ss:$16 sps:$4 sm:$0xff]   ;;  %v8141_v60 = vld [vmem:[%s11188_s1 + $0xf6c] ss:$16 sps:$4 sm:$0xff]  }
 0x1b0   :  { %5184 = vmatprep.subr.bf16.mxu0 %v8045_v61  ;;  %5743 = vmatprep.subr.bf16.mxu1 %v8048_v62  ;;  %v8136_v61 = vld [vmem:[%s11188_s1 + $0xf60] ss:$16 sps:$4 sm:$0xff]   ;;  %v8139_v62 = vld [vmem:[%s11188_s1 + $0xf68] ss:$16 sps:$4 sm:$0xff]  }
 0x1b3   :  { %5185 = vmatpush1.bf16.msra.mxu0 %v8043_v63  ;;  %5744 = vmatpush1.bf16.msra.mxu1 %v8046_v0  ;;  %v8144_v63 = vld [vmem:[%s11188_s1 + $0xf84] ss:$16 sps:$4 sm:$0xff]   ;;  %v8147_v0 = vld [vmem:[%s11188_s1 + $0xf8c] ss:$16 sps:$4 sm:$0xff]  }
 0x1b4   :  { %5186 = vmatprep.subr.bf16.mxu0 %v8051_v1  ;;  %5745 = vmatprep.subr.bf16.mxu1 %v8054_v2  ;;  %v8142_v1 = vld [vmem:[%s11188_s1 + $0xf80] ss:$16 sps:$4 sm:$0xff]   ;;  %v8145_v2 = vld [vmem:[%s11188_s1 + $0xf88] ss:$16 sps:$4 sm:$0xff]  }
 0x1b7   :  { %5187 = vmatpush1.bf16.msra.mxu0 %v8049_v3  ;;  %5746 = vmatpush1.bf16.msra.mxu1 %v8052_v4  ;;  %v8150_v3 = vld [vmem:[%s11188_s1 + $0xfa4] ss:$16 sps:$4 sm:$0xff]   ;;  %v8153_v4 = vld [vmem:[%s11188_s1 + $0xfac] ss:$16 sps:$4 sm:$0xff]  }
 0x1b8   :  { %5188 = vmatprep.subr.bf16.mxu0 %v8057_v5  ;;  %5747 = vmatprep.subr.bf16.mxu1 %v8060_v6  ;;  %v8148_v5 = vld [vmem:[%s11188_s1 + $0xfa0] ss:$16 sps:$4 sm:$0xff]   ;;  %v8151_v6 = vld [vmem:[%s11188_s1 + $0xfa8] ss:$16 sps:$4 sm:$0xff]  }
 0x1bb   :  { %5189 = vmatpush1.bf16.msra.mxu0 %v8055_v7  ;;  %5748 = vmatpush1.bf16.msra.mxu1 %v8058_v8  ;;  %v8156_v7 = vld [vmem:[%s11188_s1 + $0xfc4] ss:$16 sps:$4 sm:$0xff]   ;;  %v8159_v8 = vld [vmem:[%s11188_s1 + $0xfcc] ss:$16 sps:$4 sm:$0xff]  }
 0x1bc   :  { %5190 = vmatprep.subr.bf16.mxu0 %v8063_v9  ;;  %5749 = vmatprep.subr.bf16.mxu1 %v8066_v10  ;;  %v8154_v9 = vld [vmem:[%s11188_s1 + $0xfc0] ss:$16 sps:$4 sm:$0xff]   ;;  %v8157_v10 = vld [vmem:[%s11188_s1 + $0xfc8] ss:$16 sps:$4 sm:$0xff]  }
 0x1bf   :  { %5191 = vmatpush1.bf16.msra.mxu0 %v8061_v11  ;;  %5750 = vmatpush1.bf16.msra.mxu1 %v8064_v12  ;;  %v8162_v11 = vld [vmem:[%s11188_s1 + $0xfe4] ss:$16 sps:$4 sm:$0xff]   ;;  %v8165_v12 = vld [vmem:[%s11188_s1 + $0xfec] ss:$16 sps:$4 sm:$0xff]  }
 0x1c0   :  { %5203 = vmatprep.subr.bf16.mxu0 %v8072_v14  ;;  %5762 = vmatprep.subr.bf16.mxu1 %v8075_v15  ;;  %v8163_v14 = vld [vmem:[%s11188_s1 + $0xfe8] ss:$16 sps:$4 sm:$0xff]   ;;  %v8171_v15 = vld [vmem:[%s11188_s1 + $0x1004] ss:$16 sps:$4 sm:$0xff]  }
 0x1c2   :  { %5193 = vmatmul.mubr.bf16.vlgmr.msra.gmra.mrb[0].mxu0 %v8067_v13  ;;  %5752 = vmatmul.mubr.bf16.vlgmr.msra.gmra.mrb[0].mxu1 %v8067_v13  ;;  %v8160_v13 = vld [vmem:[%s11188_s1 + $0xfe0] ss:$16 sps:$4 sm:$0xff]  }
 0x1c3   :  { %5204 = vmatpush1.bf16.msra.mxu0 %v8070_v16  ;;  %5763 = vmatpush1.bf16.msra.mxu1 %v8073_v17  ;;  %v8174_v16 = vld [vmem:[%s11188_s1 + $0x100c] ss:$16 sps:$4 sm:$0xff]  }
 0x1c4   :  { %5205 = vmatprep.subr.bf16.mxu0 %v8078_v18  ;;  %5764 = vmatprep.subr.bf16.mxu1 %v8081_v19  ;;  %v8166_v17 = vld [vmem:[%s11189_s0 + $0x38] ss:$100 sps:$4 sm:$0xff]   ;;  %v8169_v18 = vld [vmem:[%s11188_s1 + $0x1000] ss:$16 sps:$4 sm:$0xff]  }
 0x1c5   :  { %5235 = vmatprep.mubr.bf16.mxu0 %v8168_v20  ;;  %5794 = vmatprep.mubr.bf16.mxu1 %v8168_v20  ;;  %v8172_v19 = vld [vmem:[%s11188_s1 + $0x1008] ss:$16 sps:$4 sm:$0xff]   ;;  %v8177_v20 = vld [vmem:[%s11188_s1 + $0x1024] ss:$16 sps:$4 sm:$0xff]  }
 0x1c7   :  { %5206 = vmatpush1.bf16.msra.mxu0 %v8076_v21  ;;  %5765 = vmatpush1.bf16.msra.mxu1 %v8079_v22  ;;  %v8180_v21 = vld [vmem:[%s11188_s1 + $0x102c] ss:$16 sps:$4 sm:$0xff]   ;;  %v8267_v22 = vld [vmem:[%s11189_s0 + $0x44] ss:$100 sps:$4 sm:$0xff]  }
 0x1c8   :  { %5207 = vmatprep.subr.bf16.mxu0 %v8084_v23  ;;  %5766 = vmatprep.subr.bf16.mxu1 %v8087_v24  ;;  %v8175_v23 = vld [vmem:[%s11188_s1 + $0x1020] ss:$16 sps:$4 sm:$0xff]   ;;  %v8178_v24 = vld [vmem:[%s11188_s1 + $0x1028] ss:$16 sps:$4 sm:$0xff]  }
 0x1cb   :  { %5208 = vmatpush1.bf16.msra.mxu0 %v8082_v25  ;;  %5767 = vmatpush1.bf16.msra.mxu1 %v8085_v26  ;;  %v8183_v25 = vld [vmem:[%s11188_s1 + $0x1044] ss:$16 sps:$4 sm:$0xff]   ;;  %v8186_v26 = vld [vmem:[%s11188_s1 + $0x104c] ss:$16 sps:$4 sm:$0xff]  }
 0x1cc   :  { %5209 = vmatprep.subr.bf16.mxu0 %v8090_v27  ;;  %5768 = vmatprep.subr.bf16.mxu1 %v8093_v28  ;;  %v8181_v27 = vld [vmem:[%s11188_s1 + $0x1040] ss:$16 sps:$4 sm:$0xff]   ;;  %v8184_v28 = vld [vmem:[%s11188_s1 + $0x1048] ss:$16 sps:$4 sm:$0xff]  }
 0x1cf   :  { %5210 = vmatpush1.bf16.msra.mxu0 %v8088_v29  ;;  %5769 = vmatpush1.bf16.msra.mxu1 %v8091_v30  ;;  %v8189_v29 = vld [vmem:[%s11188_s1 + $0x1064] ss:$16 sps:$4 sm:$0xff]   ;;  %v8192_v30 = vld [vmem:[%s11188_s1 + $0x106c] ss:$16 sps:$4 sm:$0xff]  }
 0x1d0   :  { %5211 = vmatprep.subr.bf16.mxu0 %v8096_v31  ;;  %5770 = vmatprep.subr.bf16.mxu1 %v8099_v32  ;;  %v8187_v31 = vld [vmem:[%s11188_s1 + $0x1060] ss:$16 sps:$4 sm:$0xff]   ;;  %v8190_v32 = vld [vmem:[%s11188_s1 + $0x1068] ss:$16 sps:$4 sm:$0xff]  }
 0x1d3   :  { %5212 = vmatpush1.bf16.msra.mxu0 %v8094_v33  ;;  %5771 = vmatpush1.bf16.msra.mxu1 %v8097_v34  ;;  %v8195_v33 = vld [vmem:[%s11188_s1 + $0x1084] ss:$16 sps:$4 sm:$0xff]   ;;  %v8198_v34 = vld [vmem:[%s11188_s1 + $0x108c] ss:$16 sps:$4 sm:$0xff]  }
 0x1d4   :  { %5213 = vmatprep.subr.bf16.mxu0 %v8102_v35  ;;  %5772 = vmatprep.subr.bf16.mxu1 %v8105_v36  ;;  %v8193_v35 = vld [vmem:[%s11188_s1 + $0x1080] ss:$16 sps:$4 sm:$0xff]   ;;  %v8196_v36 = vld [vmem:[%s11188_s1 + $0x1088] ss:$16 sps:$4 sm:$0xff]  }
 0x1d7   :  { %5214 = vmatpush1.bf16.msra.mxu0 %v8100_v37  ;;  %5773 = vmatpush1.bf16.msra.mxu1 %v8103_v38  ;;  %v8201_v37 = vld [vmem:[%s11188_s1 + $0x10a4] ss:$16 sps:$4 sm:$0xff]   ;;  %v8204_v38 = vld [vmem:[%s11188_s1 + $0x10ac] ss:$16 sps:$4 sm:$0xff]  }
 0x1d8   :  { %5215 = vmatprep.subr.bf16.mxu0 %v8108_v39  ;;  %5774 = vmatprep.subr.bf16.mxu1 %v8111_v40  ;;  %v8199_v39 = vld [vmem:[%s11188_s1 + $0x10a0] ss:$16 sps:$4 sm:$0xff]   ;;  %v8202_v40 = vld [vmem:[%s11188_s1 + $0x10a8] ss:$16 sps:$4 sm:$0xff]  }
 0x1db   :  { %5216 = vmatpush1.bf16.msra.mxu0 %v8106_v41  ;;  %5775 = vmatpush1.bf16.msra.mxu1 %v8109_v42  ;;  %v8207_v41 = vld [vmem:[%s11188_s1 + $0x10c4] ss:$16 sps:$4 sm:$0xff]   ;;  %v8210_v42 = vld [vmem:[%s11188_s1 + $0x10cc] ss:$16 sps:$4 sm:$0xff]  }
 0x1dc   :  { %5217 = vmatprep.subr.bf16.mxu0 %v8114_v43  ;;  %5776 = vmatprep.subr.bf16.mxu1 %v8117_v44  ;;  %v8205_v43 = vld [vmem:[%s11188_s1 + $0x10c0] ss:$16 sps:$4 sm:$0xff]   ;;  %v8208_v44 = vld [vmem:[%s11188_s1 + $0x10c8] ss:$16 sps:$4 sm:$0xff]  }
 0x1df   :  { %5218 = vmatpush1.bf16.msra.mxu0 %v8112_v45  ;;  %5777 = vmatpush1.bf16.msra.mxu1 %v8115_v46  ;;  %v8213_v45 = vld [vmem:[%s11188_s1 + $0x10e4] ss:$16 sps:$4 sm:$0xff]   ;;  %v8216_v46 = vld [vmem:[%s11188_s1 + $0x10ec] ss:$16 sps:$4 sm:$0xff]  }
 0x1e0   :  { %5219 = vmatprep.subr.bf16.mxu0 %v8120_v47  ;;  %5778 = vmatprep.subr.bf16.mxu1 %v8123_v48  ;;  %v8211_v47 = vld [vmem:[%s11188_s1 + $0x10e0] ss:$16 sps:$4 sm:$0xff]   ;;  %v8214_v48 = vld [vmem:[%s11188_s1 + $0x10e8] ss:$16 sps:$4 sm:$0xff]  }
 0x1e3   :  { %5220 = vmatpush1.bf16.msra.mxu0 %v8118_v49  ;;  %5779 = vmatpush1.bf16.msra.mxu1 %v8121_v50  ;;  %v8219_v49 = vld [vmem:[%s11188_s1 + $0x1104] ss:$16 sps:$4 sm:$0xff]   ;;  %v8222_v50 = vld [vmem:[%s11188_s1 + $0x110c] ss:$16 sps:$4 sm:$0xff]  }
 0x1e4   :  { %5221 = vmatprep.subr.bf16.mxu0 %v8126_v51  ;;  %5780 = vmatprep.subr.bf16.mxu1 %v8129_v52  ;;  %v8217_v51 = vld [vmem:[%s11188_s1 + $0x1100] ss:$16 sps:$4 sm:$0xff]   ;;  %v8220_v52 = vld [vmem:[%s11188_s1 + $0x1108] ss:$16 sps:$4 sm:$0xff]  }
 0x1e7   :  { %5222 = vmatpush1.bf16.msra.mxu0 %v8124_v53  ;;  %5781 = vmatpush1.bf16.msra.mxu1 %v8127_v54  ;;  %v8225_v53 = vld [vmem:[%s11188_s1 + $0x1124] ss:$16 sps:$4 sm:$0xff]   ;;  %v8228_v54 = vld [vmem:[%s11188_s1 + $0x112c] ss:$16 sps:$4 sm:$0xff]  }
 0x1e8   :  { %5223 = vmatprep.subr.bf16.mxu0 %v8132_v55  ;;  %5782 = vmatprep.subr.bf16.mxu1 %v8135_v56  ;;  %v8223_v55 = vld [vmem:[%s11188_s1 + $0x1120] ss:$16 sps:$4 sm:$0xff]   ;;  %v8226_v56 = vld [vmem:[%s11188_s1 + $0x1128] ss:$16 sps:$4 sm:$0xff]  }
 0x1eb   :  { %5224 = vmatpush1.bf16.msra.mxu0 %v8130_v57  ;;  %5783 = vmatpush1.bf16.msra.mxu1 %v8133_v58  ;;  %v8231_v57 = vld [vmem:[%s11188_s1 + $0x1144] ss:$16 sps:$4 sm:$0xff]   ;;  %v8234_v58 = vld [vmem:[%s11188_s1 + $0x114c] ss:$16 sps:$4 sm:$0xff]  }
 0x1ec   :  { %5225 = vmatprep.subr.bf16.mxu0 %v8138_v59  ;;  %5784 = vmatprep.subr.bf16.mxu1 %v8141_v60  ;;  %v8229_v59 = vld [vmem:[%s11188_s1 + $0x1140] ss:$16 sps:$4 sm:$0xff]   ;;  %v8232_v60 = vld [vmem:[%s11188_s1 + $0x1148] ss:$16 sps:$4 sm:$0xff]  }
 0x1ef   :  { %5226 = vmatpush1.bf16.msra.mxu0 %v8136_v61  ;;  %5785 = vmatpush1.bf16.msra.mxu1 %v8139_v62  ;;  %v8237_v61 = vld [vmem:[%s11188_s1 + $0x1164] ss:$16 sps:$4 sm:$0xff]   ;;  %v8240_v62 = vld [vmem:[%s11188_s1 + $0x116c] ss:$16 sps:$4 sm:$0xff]  }
 0x1f0   :  { %5227 = vmatprep.subr.bf16.mxu0 %v8144_v63  ;;  %5786 = vmatprep.subr.bf16.mxu1 %v8147_v0  ;;  %v8235_v63 = vld [vmem:[%s11188_s1 + $0x1160] ss:$16 sps:$4 sm:$0xff]   ;;  %v8238_v0 = vld [vmem:[%s11188_s1 + $0x1168] ss:$16 sps:$4 sm:$0xff]  }
 0x1f3   :  { %5228 = vmatpush1.bf16.msra.mxu0 %v8142_v1  ;;  %5787 = vmatpush1.bf16.msra.mxu1 %v8145_v2  ;;  %v8243_v1 = vld [vmem:[%s11188_s1 + $0x1184] ss:$16 sps:$4 sm:$0xff]   ;;  %v8246_v2 = vld [vmem:[%s11188_s1 + $0x118c] ss:$16 sps:$4 sm:$0xff]  }
 0x1f4   :  { %5229 = vmatprep.subr.bf16.mxu0 %v8150_v3  ;;  %5788 = vmatprep.subr.bf16.mxu1 %v8153_v4  ;;  %v8241_v3 = vld [vmem:[%s11188_s1 + $0x1180] ss:$16 sps:$4 sm:$0xff]   ;;  %v8244_v4 = vld [vmem:[%s11188_s1 + $0x1188] ss:$16 sps:$4 sm:$0xff]  }
 0x1f7   :  { %5230 = vmatpush1.bf16.msra.mxu0 %v8148_v5  ;;  %5789 = vmatpush1.bf16.msra.mxu1 %v8151_v6  ;;  %v8249_v5 = vld [vmem:[%s11188_s1 + $0x11a4] ss:$16 sps:$4 sm:$0xff]   ;;  %v8252_v6 = vld [vmem:[%s11188_s1 + $0x11ac] ss:$16 sps:$4 sm:$0xff]  }
 0x1f8   :  { %5231 = vmatprep.subr.bf16.mxu0 %v8156_v7  ;;  %5790 = vmatprep.subr.bf16.mxu1 %v8159_v8  ;;  %v8247_v7 = vld [vmem:[%s11188_s1 + $0x11a0] ss:$16 sps:$4 sm:$0xff]   ;;  %v8250_v8 = vld [vmem:[%s11188_s1 + $0x11a8] ss:$16 sps:$4 sm:$0xff]  }
 0x1fb   :  { %5232 = vmatpush1.bf16.msra.mxu0 %v8154_v9  ;;  %5791 = vmatpush1.bf16.msra.mxu1 %v8157_v10  ;;  %v8255_v9 = vld [vmem:[%s11188_s1 + $0x11c4] ss:$16 sps:$4 sm:$0xff]   ;;  %v8258_v10 = vld [vmem:[%s11188_s1 + $0x11cc] ss:$16 sps:$4 sm:$0xff]  }
 0x1fc   :  { %5233 = vmatprep.subr.bf16.mxu0 %v8162_v11  ;;  %5792 = vmatprep.subr.bf16.mxu1 %v8165_v12  ;;  %v8253_v11 = vld [vmem:[%s11188_s1 + $0x11c0] ss:$16 sps:$4 sm:$0xff]   ;;  %v8256_v12 = vld [vmem:[%s11188_s1 + $0x11c8] ss:$16 sps:$4 sm:$0xff]  }
 0x1ff   :  { %5234 = vmatpush1.bf16.msra.mxu0 %v8160_v13  ;;  %5793 = vmatpush1.bf16.msra.mxu1 %v8163_v14  ;;  %v8261_v13 = vld [vmem:[%s11188_s1 + $0x11e4] ss:$16 sps:$4 sm:$0xff]   ;;  %v8264_v14 = vld [vmem:[%s11188_s1 + $0x11ec] ss:$16 sps:$4 sm:$0xff]  }
 0x200   :  { %5246 = vmatprep.subr.bf16.mxu0 %v8171_v15  ;;  %5805 = vmatprep.subr.bf16.mxu1 %v8174_v16  ;;  %v8259_v15 = vld [vmem:[%s11188_s1 + $0x11e0] ss:$16 sps:$4 sm:$0xff]   ;;  %v8262_v16 = vld [vmem:[%s11188_s1 + $0x11e8] ss:$16 sps:$4 sm:$0xff]  }
 0x202   :  { %5236 = vmatmul.mubr.bf16.vlgmr.msra.gmra.mrb[0].mxu0 %v8166_v17  ;;  %5795 = vmatmul.mubr.bf16.vlgmr.msra.gmra.mrb[0].mxu1 %v8166_v17  ;;  %v8270_v17 = vld [vmem:[%s11188_s1 + $0x1204] ss:$16 sps:$4 sm:$0xff]  }
 0x203   :  { %5247 = vmatpush1.bf16.msra.mxu0 %v8169_v18  ;;  %5806 = vmatpush1.bf16.msra.mxu1 %v8172_v19  ;;  %v8273_v18 = vld [vmem:[%s11188_s1 + $0x120c] ss:$16 sps:$4 sm:$0xff]   ;;  %v8265_v19 = vld [vmem:[%s11189_s0 + $0x40] ss:$100 sps:$4 sm:$0xff]  }
 0x204   :  { %5248 = vmatprep.subr.bf16.mxu0 %v8177_v20  ;;  %5807 = vmatprep.subr.bf16.mxu1 %v8180_v21  ;;  %v8268_v20 = vld [vmem:[%s11188_s1 + $0x1200] ss:$16 sps:$4 sm:$0xff]   ;;  %v8271_v21 = vld [vmem:[%s11188_s1 + $0x1208] ss:$16 sps:$4 sm:$0xff]  }
 0x205   :  { %5278 = vmatprep.mubr.bf16.mxu0 %v8267_v22  ;;  %5837 = vmatprep.mubr.bf16.mxu1 %v8267_v22  ;;  %v8276_v22 = vld [vmem:[%s11188_s1 + $0x1224] ss:$16 sps:$4 sm:$0xff]  }
 0x207   :  { %5249 = vmatpush1.bf16.msra.mxu0 %v8175_v23  ;;  %5808 = vmatpush1.bf16.msra.mxu1 %v8178_v24  ;;  %v8279_v23 = vld [vmem:[%s11188_s1 + $0x122c] ss:$16 sps:$4 sm:$0xff]  }
 0x208   :  { %5250 = vmatprep.subr.bf16.mxu0 %v8183_v25  ;;  %5809 = vmatprep.subr.bf16.mxu1 %v8186_v26  ;;  %v8366_v24 = vld [vmem:[%s11189_s0 + $0x4c] ss:$100 sps:$4 sm:$0xff]   ;;  %v8277_v26 = vld [vmem:[%s11188_s1 + $0x1228] ss:$16 sps:$4 sm:$0xff]  }
 0x209   :  { %v8274_v25 = vld [vmem:[%s11188_s1 + $0x1220] ss:$16 sps:$4 sm:$0xff]  }
 0x20b   :  { %5251 = vmatpush1.bf16.msra.mxu0 %v8181_v27  ;;  %5810 = vmatpush1.bf16.msra.mxu1 %v8184_v28  ;;  %v8282_v27 = vld [vmem:[%s11188_s1 + $0x1244] ss:$16 sps:$4 sm:$0xff]   ;;  %v8285_v28 = vld [vmem:[%s11188_s1 + $0x124c] ss:$16 sps:$4 sm:$0xff]  }
 0x20c   :  { %5252 = vmatprep.subr.bf16.mxu0 %v8189_v29  ;;  %5811 = vmatprep.subr.bf16.mxu1 %v8192_v30  ;;  %v8280_v29 = vld [vmem:[%s11188_s1 + $0x1240] ss:$16 sps:$4 sm:$0xff]   ;;  %v8283_v30 = vld [vmem:[%s11188_s1 + $0x1248] ss:$16 sps:$4 sm:$0xff]  }
 0x20f   :  { %5253 = vmatpush1.bf16.msra.mxu0 %v8187_v31  ;;  %5812 = vmatpush1.bf16.msra.mxu1 %v8190_v32  ;;  %v8288_v31 = vld [vmem:[%s11188_s1 + $0x1264] ss:$16 sps:$4 sm:$0xff]   ;;  %v8291_v32 = vld [vmem:[%s11188_s1 + $0x126c] ss:$16 sps:$4 sm:$0xff]  }
 0x210   :  { %5254 = vmatprep.subr.bf16.mxu0 %v8195_v33  ;;  %5813 = vmatprep.subr.bf16.mxu1 %v8198_v34  ;;  %v8286_v33 = vld [vmem:[%s11188_s1 + $0x1260] ss:$16 sps:$4 sm:$0xff]   ;;  %v8289_v34 = vld [vmem:[%s11188_s1 + $0x1268] ss:$16 sps:$4 sm:$0xff]  }
 0x213   :  { %5255 = vmatpush1.bf16.msra.mxu0 %v8193_v35  ;;  %5814 = vmatpush1.bf16.msra.mxu1 %v8196_v36  ;;  %v8294_v35 = vld [vmem:[%s11188_s1 + $0x1284] ss:$16 sps:$4 sm:$0xff]   ;;  %v8297_v36 = vld [vmem:[%s11188_s1 + $0x128c] ss:$16 sps:$4 sm:$0xff]  }
 0x214   :  { %5256 = vmatprep.subr.bf16.mxu0 %v8201_v37  ;;  %5815 = vmatprep.subr.bf16.mxu1 %v8204_v38  ;;  %v8292_v37 = vld [vmem:[%s11188_s1 + $0x1280] ss:$16 sps:$4 sm:$0xff]   ;;  %v8295_v38 = vld [vmem:[%s11188_s1 + $0x1288] ss:$16 sps:$4 sm:$0xff]  }
 0x217   :  { %5257 = vmatpush1.bf16.msra.mxu0 %v8199_v39  ;;  %5816 = vmatpush1.bf16.msra.mxu1 %v8202_v40  ;;  %v8300_v39 = vld [vmem:[%s11188_s1 + $0x12a4] ss:$16 sps:$4 sm:$0xff]   ;;  %v8303_v40 = vld [vmem:[%s11188_s1 + $0x12ac] ss:$16 sps:$4 sm:$0xff]  }
 0x218   :  { %5258 = vmatprep.subr.bf16.mxu0 %v8207_v41  ;;  %5817 = vmatprep.subr.bf16.mxu1 %v8210_v42  ;;  %v8298_v41 = vld [vmem:[%s11188_s1 + $0x12a0] ss:$16 sps:$4 sm:$0xff]   ;;  %v8301_v42 = vld [vmem:[%s11188_s1 + $0x12a8] ss:$16 sps:$4 sm:$0xff]  }
 0x21b   :  { %5259 = vmatpush1.bf16.msra.mxu0 %v8205_v43  ;;  %5818 = vmatpush1.bf16.msra.mxu1 %v8208_v44  ;;  %v8306_v43 = vld [vmem:[%s11188_s1 + $0x12c4] ss:$16 sps:$4 sm:$0xff]   ;;  %v8309_v44 = vld [vmem:[%s11188_s1 + $0x12cc] ss:$16 sps:$4 sm:$0xff]  }
 0x21c   :  { %5260 = vmatprep.subr.bf16.mxu0 %v8213_v45  ;;  %5819 = vmatprep.subr.bf16.mxu1 %v8216_v46  ;;  %v8304_v45 = vld [vmem:[%s11188_s1 + $0x12c0] ss:$16 sps:$4 sm:$0xff]   ;;  %v8307_v46 = vld [vmem:[%s11188_s1 + $0x12c8] ss:$16 sps:$4 sm:$0xff]  }
 0x21f   :  { %5261 = vmatpush1.bf16.msra.mxu0 %v8211_v47  ;;  %5820 = vmatpush1.bf16.msra.mxu1 %v8214_v48  ;;  %v8312_v47 = vld [vmem:[%s11188_s1 + $0x12e4] ss:$16 sps:$4 sm:$0xff]   ;;  %v8315_v48 = vld [vmem:[%s11188_s1 + $0x12ec] ss:$16 sps:$4 sm:$0xff]  }
 0x220   :  { %5262 = vmatprep.subr.bf16.mxu0 %v8219_v49  ;;  %5821 = vmatprep.subr.bf16.mxu1 %v8222_v50  ;;  %v8310_v49 = vld [vmem:[%s11188_s1 + $0x12e0] ss:$16 sps:$4 sm:$0xff]   ;;  %v8313_v50 = vld [vmem:[%s11188_s1 + $0x12e8] ss:$16 sps:$4 sm:$0xff]  }
 0x223   :  { %5263 = vmatpush1.bf16.msra.mxu0 %v8217_v51  ;;  %5822 = vmatpush1.bf16.msra.mxu1 %v8220_v52  ;;  %v8318_v51 = vld [vmem:[%s11188_s1 + $0x1304] ss:$16 sps:$4 sm:$0xff]   ;;  %v8321_v52 = vld [vmem:[%s11188_s1 + $0x130c] ss:$16 sps:$4 sm:$0xff]  }
 0x224   :  { %5264 = vmatprep.subr.bf16.mxu0 %v8225_v53  ;;  %5823 = vmatprep.subr.bf16.mxu1 %v8228_v54  ;;  %v8316_v53 = vld [vmem:[%s11188_s1 + $0x1300] ss:$16 sps:$4 sm:$0xff]   ;;  %v8319_v54 = vld [vmem:[%s11188_s1 + $0x1308] ss:$16 sps:$4 sm:$0xff]  }
 0x227   :  { %5265 = vmatpush1.bf16.msra.mxu0 %v8223_v55  ;;  %5824 = vmatpush1.bf16.msra.mxu1 %v8226_v56  ;;  %v8324_v55 = vld [vmem:[%s11188_s1 + $0x1324] ss:$16 sps:$4 sm:$0xff]   ;;  %v8327_v56 = vld [vmem:[%s11188_s1 + $0x132c] ss:$16 sps:$4 sm:$0xff]  }
 0x228   :  { %5266 = vmatprep.subr.bf16.mxu0 %v8231_v57  ;;  %5825 = vmatprep.subr.bf16.mxu1 %v8234_v58  ;;  %v8322_v57 = vld [vmem:[%s11188_s1 + $0x1320] ss:$16 sps:$4 sm:$0xff]   ;;  %v8325_v58 = vld [vmem:[%s11188_s1 + $0x1328] ss:$16 sps:$4 sm:$0xff]  }
 0x22b   :  { %5267 = vmatpush1.bf16.msra.mxu0 %v8229_v59  ;;  %5826 = vmatpush1.bf16.msra.mxu1 %v8232_v60  ;;  %v8330_v59 = vld [vmem:[%s11188_s1 + $0x1344] ss:$16 sps:$4 sm:$0xff]   ;;  %v8333_v60 = vld [vmem:[%s11188_s1 + $0x134c] ss:$16 sps:$4 sm:$0xff]  }
 0x22c   :  { %5268 = vmatprep.subr.bf16.mxu0 %v8237_v61  ;;  %5827 = vmatprep.subr.bf16.mxu1 %v8240_v62  ;;  %v8328_v61 = vld [vmem:[%s11188_s1 + $0x1340] ss:$16 sps:$4 sm:$0xff]   ;;  %v8331_v62 = vld [vmem:[%s11188_s1 + $0x1348] ss:$16 sps:$4 sm:$0xff]  }
 0x22f   :  { %5269 = vmatpush1.bf16.msra.mxu0 %v8235_v63  ;;  %5828 = vmatpush1.bf16.msra.mxu1 %v8238_v0  ;;  %v8336_v63 = vld [vmem:[%s11188_s1 + $0x1364] ss:$16 sps:$4 sm:$0xff]   ;;  %v8339_v0 = vld [vmem:[%s11188_s1 + $0x136c] ss:$16 sps:$4 sm:$0xff]  }
 0x230   :  { %5270 = vmatprep.subr.bf16.mxu0 %v8243_v1  ;;  %5829 = vmatprep.subr.bf16.mxu1 %v8246_v2  ;;  %v8334_v1 = vld [vmem:[%s11188_s1 + $0x1360] ss:$16 sps:$4 sm:$0xff]   ;;  %v8337_v2 = vld [vmem:[%s11188_s1 + $0x1368] ss:$16 sps:$4 sm:$0xff]  }
 0x233   :  { %5271 = vmatpush1.bf16.msra.mxu0 %v8241_v3  ;;  %5830 = vmatpush1.bf16.msra.mxu1 %v8244_v4  ;;  %v8342_v3 = vld [vmem:[%s11188_s1 + $0x1384] ss:$16 sps:$4 sm:$0xff]   ;;  %v8345_v4 = vld [vmem:[%s11188_s1 + $0x138c] ss:$16 sps:$4 sm:$0xff]  }
 0x234   :  { %5272 = vmatprep.subr.bf16.mxu0 %v8249_v5  ;;  %5831 = vmatprep.subr.bf16.mxu1 %v8252_v6  ;;  %v8340_v5 = vld [vmem:[%s11188_s1 + $0x1380] ss:$16 sps:$4 sm:$0xff]   ;;  %v8343_v6 = vld [vmem:[%s11188_s1 + $0x1388] ss:$16 sps:$4 sm:$0xff]  }
 0x237   :  { %5273 = vmatpush1.bf16.msra.mxu0 %v8247_v7  ;;  %5832 = vmatpush1.bf16.msra.mxu1 %v8250_v8  ;;  %v8348_v7 = vld [vmem:[%s11188_s1 + $0x13a4] ss:$16 sps:$4 sm:$0xff]   ;;  %v8351_v8 = vld [vmem:[%s11188_s1 + $0x13ac] ss:$16 sps:$4 sm:$0xff]  }
 0x238   :  { %5274 = vmatprep.subr.bf16.mxu0 %v8255_v9  ;;  %5833 = vmatprep.subr.bf16.mxu1 %v8258_v10  ;;  %v8346_v9 = vld [vmem:[%s11188_s1 + $0x13a0] ss:$16 sps:$4 sm:$0xff]   ;;  %v8349_v10 = vld [vmem:[%s11188_s1 + $0x13a8] ss:$16 sps:$4 sm:$0xff]  }
 0x23b   :  { %5275 = vmatpush1.bf16.msra.mxu0 %v8253_v11  ;;  %5834 = vmatpush1.bf16.msra.mxu1 %v8256_v12  ;;  %v8354_v11 = vld [vmem:[%s11188_s1 + $0x13c4] ss:$16 sps:$4 sm:$0xff]   ;;  %v8357_v12 = vld [vmem:[%s11188_s1 + $0x13cc] ss:$16 sps:$4 sm:$0xff]  }
 0x23c   :  { %5276 = vmatprep.subr.bf16.mxu0 %v8261_v13  ;;  %5835 = vmatprep.subr.bf16.mxu1 %v8264_v14  ;;  %v8352_v13 = vld [vmem:[%s11188_s1 + $0x13c0] ss:$16 sps:$4 sm:$0xff]   ;;  %v8355_v14 = vld [vmem:[%s11188_s1 + $0x13c8] ss:$16 sps:$4 sm:$0xff]  }
 0x23f   :  { %5277 = vmatpush1.bf16.msra.mxu0 %v8259_v15  ;;  %5836 = vmatpush1.bf16.msra.mxu1 %v8262_v16  ;;  %v8360_v15 = vld [vmem:[%s11188_s1 + $0x13e4] ss:$16 sps:$4 sm:$0xff]   ;;  %v8363_v16 = vld [vmem:[%s11188_s1 + $0x13ec] ss:$16 sps:$4 sm:$0xff]  }
 0x240   :  { %5289 = vmatprep.subr.bf16.mxu0 %v8270_v17  ;;  %5848 = vmatprep.subr.bf16.mxu1 %v8273_v18  ;;  %v8358_v17 = vld [vmem:[%s11188_s1 + $0x13e0] ss:$16 sps:$4 sm:$0xff]   ;;  %v8361_v18 = vld [vmem:[%s11188_s1 + $0x13e8] ss:$16 sps:$4 sm:$0xff]  }
 0x242   :  { %5279 = vmatmul.mubr.bf16.vlgmr.msra.gmra.mrb[0].mxu0 %v8265_v19  ;;  %5838 = vmatmul.mubr.bf16.vlgmr.msra.gmra.mrb[0].mxu1 %v8265_v19  ;;  %v8369_v19 = vld [vmem:[%s11188_s1 + $0x1404] ss:$16 sps:$4 sm:$0xff]  }
 0x243   :  { %5290 = vmatpush1.bf16.msra.mxu0 %v8268_v20  ;;  %5849 = vmatpush1.bf16.msra.mxu1 %v8271_v21  ;;  %v8372_v20 = vld [vmem:[%s11188_s1 + $0x140c] ss:$16 sps:$4 sm:$0xff]  }
 0x244   :  { %5291 = vmatprep.subr.bf16.mxu0 %v8276_v22  ;;  %5850 = vmatprep.subr.bf16.mxu1 %v8279_v23  ;;  %v8364_v21 = vld [vmem:[%s11189_s0 + $0x48] ss:$100 sps:$4 sm:$0xff]   ;;  %v8367_v22 = vld [vmem:[%s11188_s1 + $0x1400] ss:$16 sps:$4 sm:$0xff]  }
 0x245   :  { %5321 = vmatprep.mubr.bf16.mxu0 %v8366_v24  ;;  %5880 = vmatprep.mubr.bf16.mxu1 %v8366_v24  ;;  %v8370_v23 = vld [vmem:[%s11188_s1 + $0x1408] ss:$16 sps:$4 sm:$0xff]   ;;  %v8375_v24 = vld [vmem:[%s11188_s1 + $0x1424] ss:$16 sps:$4 sm:$0xff]  }
 0x247   :  { %5292 = vmatpush1.bf16.msra.mxu0 %v8274_v25  ;;  %5851 = vmatpush1.bf16.msra.mxu1 %v8277_v26  ;;  %v8378_v25 = vld [vmem:[%s11188_s1 + $0x142c] ss:$16 sps:$4 sm:$0xff]   ;;  %v8465_v26 = vld [vmem:[%s11189_s0 + $0x54] ss:$100 sps:$4 sm:$0xff]  }
 0x248   :  { %5293 = vmatprep.subr.bf16.mxu0 %v8282_v27  ;;  %5852 = vmatprep.subr.bf16.mxu1 %v8285_v28  ;;  %v8373_v27 = vld [vmem:[%s11188_s1 + $0x1420] ss:$16 sps:$4 sm:$0xff]   ;;  %v8376_v28 = vld [vmem:[%s11188_s1 + $0x1428] ss:$16 sps:$4 sm:$0xff]  }
 0x24b   :  { %5294 = vmatpush1.bf16.msra.mxu0 %v8280_v29  ;;  %5853 = vmatpush1.bf16.msra.mxu1 %v8283_v30  ;;  %v8381_v29 = vld [vmem:[%s11188_s1 + $0x1444] ss:$16 sps:$4 sm:$0xff]   ;;  %v8384_v30 = vld [vmem:[%s11188_s1 + $0x144c] ss:$16 sps:$4 sm:$0xff]  }
 0x24c   :  { %5295 = vmatprep.subr.bf16.mxu0 %v8288_v31  ;;  %5854 = vmatprep.subr.bf16.mxu1 %v8291_v32  ;;  %v8379_v31 = vld [vmem:[%s11188_s1 + $0x1440] ss:$16 sps:$4 sm:$0xff]   ;;  %v8382_v32 = vld [vmem:[%s11188_s1 + $0x1448] ss:$16 sps:$4 sm:$0xff]  }
 0x24f   :  { %5296 = vmatpush1.bf16.msra.mxu0 %v8286_v33  ;;  %5855 = vmatpush1.bf16.msra.mxu1 %v8289_v34  ;;  %v8387_v33 = vld [vmem:[%s11188_s1 + $0x1464] ss:$16 sps:$4 sm:$0xff]   ;;  %v8390_v34 = vld [vmem:[%s11188_s1 + $0x146c] ss:$16 sps:$4 sm:$0xff]  }
 0x250   :  { %5297 = vmatprep.subr.bf16.mxu0 %v8294_v35  ;;  %5856 = vmatprep.subr.bf16.mxu1 %v8297_v36  ;;  %v8385_v35 = vld [vmem:[%s11188_s1 + $0x1460] ss:$16 sps:$4 sm:$0xff]   ;;  %v8388_v36 = vld [vmem:[%s11188_s1 + $0x1468] ss:$16 sps:$4 sm:$0xff]  }
 0x253   :  { %5298 = vmatpush1.bf16.msra.mxu0 %v8292_v37  ;;  %5857 = vmatpush1.bf16.msra.mxu1 %v8295_v38  ;;  %v8393_v37 = vld [vmem:[%s11188_s1 + $0x1484] ss:$16 sps:$4 sm:$0xff]   ;;  %v8396_v38 = vld [vmem:[%s11188_s1 + $0x148c] ss:$16 sps:$4 sm:$0xff]  }
 0x254   :  { %5299 = vmatprep.subr.bf16.mxu0 %v8300_v39  ;;  %5858 = vmatprep.subr.bf16.mxu1 %v8303_v40  ;;  %v8391_v39 = vld [vmem:[%s11188_s1 + $0x1480] ss:$16 sps:$4 sm:$0xff]   ;;  %v8394_v40 = vld [vmem:[%s11188_s1 + $0x1488] ss:$16 sps:$4 sm:$0xff]  }
 0x257   :  { %5300 = vmatpush1.bf16.msra.mxu0 %v8298_v41  ;;  %5859 = vmatpush1.bf16.msra.mxu1 %v8301_v42  ;;  %v8399_v41 = vld [vmem:[%s11188_s1 + $0x14a4] ss:$16 sps:$4 sm:$0xff]   ;;  %v8402_v42 = vld [vmem:[%s11188_s1 + $0x14ac] ss:$16 sps:$4 sm:$0xff]  }
 0x258   :  { %5301 = vmatprep.subr.bf16.mxu0 %v8306_v43  ;;  %5860 = vmatprep.subr.bf16.mxu1 %v8309_v44  ;;  %v8397_v43 = vld [vmem:[%s11188_s1 + $0x14a0] ss:$16 sps:$4 sm:$0xff]   ;;  %v8400_v44 = vld [vmem:[%s11188_s1 + $0x14a8] ss:$16 sps:$4 sm:$0xff]  }
 0x25b   :  { %5302 = vmatpush1.bf16.msra.mxu0 %v8304_v45  ;;  %5861 = vmatpush1.bf16.msra.mxu1 %v8307_v46  ;;  %v8405_v45 = vld [vmem:[%s11188_s1 + $0x14c4] ss:$16 sps:$4 sm:$0xff]   ;;  %v8408_v46 = vld [vmem:[%s11188_s1 + $0x14cc] ss:$16 sps:$4 sm:$0xff]  }
 0x25c   :  { %5303 = vmatprep.subr.bf16.mxu0 %v8312_v47  ;;  %5862 = vmatprep.subr.bf16.mxu1 %v8315_v48  ;;  %v8403_v47 = vld [vmem:[%s11188_s1 + $0x14c0] ss:$16 sps:$4 sm:$0xff]   ;;  %v8406_v48 = vld [vmem:[%s11188_s1 + $0x14c8] ss:$16 sps:$4 sm:$0xff]  }
 0x25f   :  { %5304 = vmatpush1.bf16.msra.mxu0 %v8310_v49  ;;  %5863 = vmatpush1.bf16.msra.mxu1 %v8313_v50  ;;  %v8411_v49 = vld [vmem:[%s11188_s1 + $0x14e4] ss:$16 sps:$4 sm:$0xff]   ;;  %v8414_v50 = vld [vmem:[%s11188_s1 + $0x14ec] ss:$16 sps:$4 sm:$0xff]  }
 0x260   :  { %5305 = vmatprep.subr.bf16.mxu0 %v8318_v51  ;;  %5864 = vmatprep.subr.bf16.mxu1 %v8321_v52  ;;  %v8409_v51 = vld [vmem:[%s11188_s1 + $0x14e0] ss:$16 sps:$4 sm:$0xff]   ;;  %v8412_v52 = vld [vmem:[%s11188_s1 + $0x14e8] ss:$16 sps:$4 sm:$0xff]  }
 0x263   :  { %5306 = vmatpush1.bf16.msra.mxu0 %v8316_v53  ;;  %5865 = vmatpush1.bf16.msra.mxu1 %v8319_v54  ;;  %v8417_v53 = vld [vmem:[%s11188_s1 + $0x1504] ss:$16 sps:$4 sm:$0xff]   ;;  %v8420_v54 = vld [vmem:[%s11188_s1 + $0x150c] ss:$16 sps:$4 sm:$0xff]  }
 0x264   :  { %5307 = vmatprep.subr.bf16.mxu0 %v8324_v55  ;;  %5866 = vmatprep.subr.bf16.mxu1 %v8327_v56  ;;  %v8415_v55 = vld [vmem:[%s11188_s1 + $0x1500] ss:$16 sps:$4 sm:$0xff]   ;;  %v8418_v56 = vld [vmem:[%s11188_s1 + $0x1508] ss:$16 sps:$4 sm:$0xff]  }
 0x267   :  { %5308 = vmatpush1.bf16.msra.mxu0 %v8322_v57  ;;  %5867 = vmatpush1.bf16.msra.mxu1 %v8325_v58  ;;  %v8423_v57 = vld [vmem:[%s11188_s1 + $0x1524] ss:$16 sps:$4 sm:$0xff]   ;;  %v8426_v58 = vld [vmem:[%s11188_s1 + $0x152c] ss:$16 sps:$4 sm:$0xff]  }
 0x268   :  { %5309 = vmatprep.subr.bf16.mxu0 %v8330_v59  ;;  %5868 = vmatprep.subr.bf16.mxu1 %v8333_v60  ;;  %v8421_v59 = vld [vmem:[%s11188_s1 + $0x1520] ss:$16 sps:$4 sm:$0xff]   ;;  %v8424_v60 = vld [vmem:[%s11188_s1 + $0x1528] ss:$16 sps:$4 sm:$0xff]  }
 0x26b   :  { %5310 = vmatpush1.bf16.msra.mxu0 %v8328_v61  ;;  %5869 = vmatpush1.bf16.msra.mxu1 %v8331_v62  ;;  %v8429_v61 = vld [vmem:[%s11188_s1 + $0x1544] ss:$16 sps:$4 sm:$0xff]   ;;  %v8432_v62 = vld [vmem:[%s11188_s1 + $0x154c] ss:$16 sps:$4 sm:$0xff]  }
 0x26c   :  { %5311 = vmatprep.subr.bf16.mxu0 %v8336_v63  ;;  %5870 = vmatprep.subr.bf16.mxu1 %v8339_v0  ;;  %v8427_v63 = vld [vmem:[%s11188_s1 + $0x1540] ss:$16 sps:$4 sm:$0xff]   ;;  %v8430_v0 = vld [vmem:[%s11188_s1 + $0x1548] ss:$16 sps:$4 sm:$0xff]  }
 0x26f   :  { %5312 = vmatpush1.bf16.msra.mxu0 %v8334_v1  ;;  %5871 = vmatpush1.bf16.msra.mxu1 %v8337_v2  ;;  %v8435_v1 = vld [vmem:[%s11188_s1 + $0x1564] ss:$16 sps:$4 sm:$0xff]   ;;  %v8438_v2 = vld [vmem:[%s11188_s1 + $0x156c] ss:$16 sps:$4 sm:$0xff]  }
 0x270   :  { %5313 = vmatprep.subr.bf16.mxu0 %v8342_v3  ;;  %5872 = vmatprep.subr.bf16.mxu1 %v8345_v4  ;;  %v8433_v3 = vld [vmem:[%s11188_s1 + $0x1560] ss:$16 sps:$4 sm:$0xff]   ;;  %v8436_v4 = vld [vmem:[%s11188_s1 + $0x1568] ss:$16 sps:$4 sm:$0xff]  }
 0x273   :  { %5314 = vmatpush1.bf16.msra.mxu0 %v8340_v5  ;;  %5873 = vmatpush1.bf16.msra.mxu1 %v8343_v6  ;;  %v8441_v5 = vld [vmem:[%s11188_s1 + $0x1584] ss:$16 sps:$4 sm:$0xff]   ;;  %v8444_v6 = vld [vmem:[%s11188_s1 + $0x158c] ss:$16 sps:$4 sm:$0xff]  }
 0x274   :  { %5315 = vmatprep.subr.bf16.mxu0 %v8348_v7  ;;  %5874 = vmatprep.subr.bf16.mxu1 %v8351_v8  ;;  %v8439_v7 = vld [vmem:[%s11188_s1 + $0x1580] ss:$16 sps:$4 sm:$0xff]   ;;  %v8442_v8 = vld [vmem:[%s11188_s1 + $0x1588] ss:$16 sps:$4 sm:$0xff]  }
 0x277   :  { %5316 = vmatpush1.bf16.msra.mxu0 %v8346_v9  ;;  %5875 = vmatpush1.bf16.msra.mxu1 %v8349_v10  ;;  %v8447_v9 = vld [vmem:[%s11188_s1 + $0x15a4] ss:$16 sps:$4 sm:$0xff]   ;;  %v8450_v10 = vld [vmem:[%s11188_s1 + $0x15ac] ss:$16 sps:$4 sm:$0xff]  }
 0x278   :  { %5317 = vmatprep.subr.bf16.mxu0 %v8354_v11  ;;  %5876 = vmatprep.subr.bf16.mxu1 %v8357_v12  ;;  %v8445_v11 = vld [vmem:[%s11188_s1 + $0x15a0] ss:$16 sps:$4 sm:$0xff]   ;;  %v8448_v12 = vld [vmem:[%s11188_s1 + $0x15a8] ss:$16 sps:$4 sm:$0xff]  }
 0x27b   :  { %5318 = vmatpush1.bf16.msra.mxu0 %v8352_v13  ;;  %5877 = vmatpush1.bf16.msra.mxu1 %v8355_v14  ;;  %v8453_v13 = vld [vmem:[%s11188_s1 + $0x15c4] ss:$16 sps:$4 sm:$0xff]   ;;  %v8456_v14 = vld [vmem:[%s11188_s1 + $0x15cc] ss:$16 sps:$4 sm:$0xff]  }
 0x27c   :  { %5319 = vmatprep.subr.bf16.mxu0 %v8360_v15  ;;  %5878 = vmatprep.subr.bf16.mxu1 %v8363_v16  ;;  %v8451_v15 = vld [vmem:[%s11188_s1 + $0x15c0] ss:$16 sps:$4 sm:$0xff]   ;;  %v8454_v16 = vld [vmem:[%s11188_s1 + $0x15c8] ss:$16 sps:$4 sm:$0xff]  }
 0x27f   :  { %5320 = vmatpush1.bf16.msra.mxu0 %v8358_v17  ;;  %5879 = vmatpush1.bf16.msra.mxu1 %v8361_v18  ;;  %v8459_v17 = vld [vmem:[%s11188_s1 + $0x15e4] ss:$16 sps:$4 sm:$0xff]   ;;  %v8462_v18 = vld [vmem:[%s11188_s1 + $0x15ec] ss:$16 sps:$4 sm:$0xff]  }
 0x280   :  { %5332 = vmatprep.subr.bf16.mxu0 %v8369_v19  ;;  %5891 = vmatprep.subr.bf16.mxu1 %v8372_v20  ;;  %v8457_v19 = vld [vmem:[%s11188_s1 + $0x15e0] ss:$16 sps:$4 sm:$0xff]   ;;  %v8460_v20 = vld [vmem:[%s11188_s1 + $0x15e8] ss:$16 sps:$4 sm:$0xff]  }
 0x282   :  { %5322 = vmatmul.mubr.bf16.vlgmr.msra.gmra.mrb[0].mxu0 %v8364_v21  ;;  %5881 = vmatmul.mubr.bf16.vlgmr.msra.gmra.mrb[0].mxu1 %v8364_v21  ;;  %v8468_v21 = vld [vmem:[%s11188_s1 + $0x1604] ss:$16 sps:$4 sm:$0xff]  }
 0x283   :  { %5333 = vmatpush1.bf16.msra.mxu0 %v8367_v22  ;;  %5892 = vmatpush1.bf16.msra.mxu1 %v8370_v23  ;;  %v8471_v22 = vld [vmem:[%s11188_s1 + $0x160c] ss:$16 sps:$4 sm:$0xff]   ;;  %v8463_v23 = vld [vmem:[%s11189_s0 + $0x50] ss:$100 sps:$4 sm:$0xff]  }
 0x284   :  { %5334 = vmatprep.subr.bf16.mxu0 %v8375_v24  ;;  %5893 = vmatprep.subr.bf16.mxu1 %v8378_v25  ;;  %v8466_v24 = vld [vmem:[%s11188_s1 + $0x1600] ss:$16 sps:$4 sm:$0xff]   ;;  %v8469_v25 = vld [vmem:[%s11188_s1 + $0x1608] ss:$16 sps:$4 sm:$0xff]  }
 0x285   :  { %5364 = vmatprep.mubr.bf16.mxu0 %v8465_v26  ;;  %5923 = vmatprep.mubr.bf16.mxu1 %v8465_v26  ;;  %v8474_v26 = vld [vmem:[%s11188_s1 + $0x1624] ss:$16 sps:$4 sm:$0xff]  }
 0x287   :  { %5335 = vmatpush1.bf16.msra.mxu0 %v8373_v27  ;;  %5894 = vmatpush1.bf16.msra.mxu1 %v8376_v28  ;;  %v8477_v27 = vld [vmem:[%s11188_s1 + $0x162c] ss:$16 sps:$4 sm:$0xff]  }
 0x288   :  { %5336 = vmatprep.subr.bf16.mxu0 %v8381_v29  ;;  %5895 = vmatprep.subr.bf16.mxu1 %v8384_v30  ;;  %v8564_v28 = vld [vmem:[%s11189_s0 + $0x5c] ss:$100 sps:$4 sm:$0xff]   ;;  %v8475_v30 = vld [vmem:[%s11188_s1 + $0x1628] ss:$16 sps:$4 sm:$0xff]  }
 0x289   :  { %v8472_v29 = vld [vmem:[%s11188_s1 + $0x1620] ss:$16 sps:$4 sm:$0xff]  }
 0x28b   :  { %5337 = vmatpush1.bf16.msra.mxu0 %v8379_v31  ;;  %5896 = vmatpush1.bf16.msra.mxu1 %v8382_v32  ;;  %v8480_v31 = vld [vmem:[%s11188_s1 + $0x1644] ss:$16 sps:$4 sm:$0xff]   ;;  %v8483_v32 = vld [vmem:[%s11188_s1 + $0x164c] ss:$16 sps:$4 sm:$0xff]  }
 0x28c   :  { %5338 = vmatprep.subr.bf16.mxu0 %v8387_v33  ;;  %5897 = vmatprep.subr.bf16.mxu1 %v8390_v34  ;;  %v8478_v33 = vld [vmem:[%s11188_s1 + $0x1640] ss:$16 sps:$4 sm:$0xff]   ;;  %v8481_v34 = vld [vmem:[%s11188_s1 + $0x1648] ss:$16 sps:$4 sm:$0xff]  }
 0x28f   :  { %5339 = vmatpush1.bf16.msra.mxu0 %v8385_v35  ;;  %5898 = vmatpush1.bf16.msra.mxu1 %v8388_v36  ;;  %v8486_v35 = vld [vmem:[%s11188_s1 + $0x1664] ss:$16 sps:$4 sm:$0xff]   ;;  %v8489_v36 = vld [vmem:[%s11188_s1 + $0x166c] ss:$16 sps:$4 sm:$0xff]  }
 0x290   :  { %5340 = vmatprep.subr.bf16.mxu0 %v8393_v37  ;;  %5899 = vmatprep.subr.bf16.mxu1 %v8396_v38  ;;  %v8484_v37 = vld [vmem:[%s11188_s1 + $0x1660] ss:$16 sps:$4 sm:$0xff]   ;;  %v8487_v38 = vld [vmem:[%s11188_s1 + $0x1668] ss:$16 sps:$4 sm:$0xff]  }
 0x293   :  { %5341 = vmatpush1.bf16.msra.mxu0 %v8391_v39  ;;  %5900 = vmatpush1.bf16.msra.mxu1 %v8394_v40  ;;  %v8492_v39 = vld [vmem:[%s11188_s1 + $0x1684] ss:$16 sps:$4 sm:$0xff]   ;;  %v8495_v40 = vld [vmem:[%s11188_s1 + $0x168c] ss:$16 sps:$4 sm:$0xff]  }
 0x294   :  { %5342 = vmatprep.subr.bf16.mxu0 %v8399_v41  ;;  %5901 = vmatprep.subr.bf16.mxu1 %v8402_v42  ;;  %v8490_v41 = vld [vmem:[%s11188_s1 + $0x1680] ss:$16 sps:$4 sm:$0xff]   ;;  %v8493_v42 = vld [vmem:[%s11188_s1 + $0x1688] ss:$16 sps:$4 sm:$0xff]  }
 0x297   :  { %5343 = vmatpush1.bf16.msra.mxu0 %v8397_v43  ;;  %5902 = vmatpush1.bf16.msra.mxu1 %v8400_v44  ;;  %v8498_v43 = vld [vmem:[%s11188_s1 + $0x16a4] ss:$16 sps:$4 sm:$0xff]   ;;  %v8501_v44 = vld [vmem:[%s11188_s1 + $0x16ac] ss:$16 sps:$4 sm:$0xff]  }
 0x298   :  { %5344 = vmatprep.subr.bf16.mxu0 %v8405_v45  ;;  %5903 = vmatprep.subr.bf16.mxu1 %v8408_v46  ;;  %v8496_v45 = vld [vmem:[%s11188_s1 + $0x16a0] ss:$16 sps:$4 sm:$0xff]   ;;  %v8499_v46 = vld [vmem:[%s11188_s1 + $0x16a8] ss:$16 sps:$4 sm:$0xff]  }
 0x29b   :  { %5345 = vmatpush1.bf16.msra.mxu0 %v8403_v47  ;;  %5904 = vmatpush1.bf16.msra.mxu1 %v8406_v48  ;;  %v8504_v47 = vld [vmem:[%s11188_s1 + $0x16c4] ss:$16 sps:$4 sm:$0xff]   ;;  %v8507_v48 = vld [vmem:[%s11188_s1 + $0x16cc] ss:$16 sps:$4 sm:$0xff]  }
 0x29c   :  { %5346 = vmatprep.subr.bf16.mxu0 %v8411_v49  ;;  %5905 = vmatprep.subr.bf16.mxu1 %v8414_v50  ;;  %v8502_v49 = vld [vmem:[%s11188_s1 + $0x16c0] ss:$16 sps:$4 sm:$0xff]   ;;  %v8505_v50 = vld [vmem:[%s11188_s1 + $0x16c8] ss:$16 sps:$4 sm:$0xff]  }
 0x29f   :  { %5347 = vmatpush1.bf16.msra.mxu0 %v8409_v51  ;;  %5906 = vmatpush1.bf16.msra.mxu1 %v8412_v52  ;;  %v8510_v51 = vld [vmem:[%s11188_s1 + $0x16e4] ss:$16 sps:$4 sm:$0xff]   ;;  %v8513_v52 = vld [vmem:[%s11188_s1 + $0x16ec] ss:$16 sps:$4 sm:$0xff]  }
 0x2a0   :  { %5348 = vmatprep.subr.bf16.mxu0 %v8417_v53  ;;  %5907 = vmatprep.subr.bf16.mxu1 %v8420_v54  ;;  %v8508_v53 = vld [vmem:[%s11188_s1 + $0x16e0] ss:$16 sps:$4 sm:$0xff]   ;;  %v8511_v54 = vld [vmem:[%s11188_s1 + $0x16e8] ss:$16 sps:$4 sm:$0xff]  }
 0x2a3   :  { %5349 = vmatpush1.bf16.msra.mxu0 %v8415_v55  ;;  %5908 = vmatpush1.bf16.msra.mxu1 %v8418_v56  ;;  %v8516_v55 = vld [vmem:[%s11188_s1 + $0x1704] ss:$16 sps:$4 sm:$0xff]   ;;  %v8519_v56 = vld [vmem:[%s11188_s1 + $0x170c] ss:$16 sps:$4 sm:$0xff]  }
 0x2a4   :  { %5350 = vmatprep.subr.bf16.mxu0 %v8423_v57  ;;  %5909 = vmatprep.subr.bf16.mxu1 %v8426_v58  ;;  %v8514_v57 = vld [vmem:[%s11188_s1 + $0x1700] ss:$16 sps:$4 sm:$0xff]   ;;  %v8517_v58 = vld [vmem:[%s11188_s1 + $0x1708] ss:$16 sps:$4 sm:$0xff]  }
 0x2a7   :  { %5351 = vmatpush1.bf16.msra.mxu0 %v8421_v59  ;;  %5910 = vmatpush1.bf16.msra.mxu1 %v8424_v60  ;;  %v8522_v59 = vld [vmem:[%s11188_s1 + $0x1724] ss:$16 sps:$4 sm:$0xff]   ;;  %v8525_v60 = vld [vmem:[%s11188_s1 + $0x172c] ss:$16 sps:$4 sm:$0xff]  }
 0x2a8   :  { %5352 = vmatprep.subr.bf16.mxu0 %v8429_v61  ;;  %5911 = vmatprep.subr.bf16.mxu1 %v8432_v62  ;;  %v8520_v61 = vld [vmem:[%s11188_s1 + $0x1720] ss:$16 sps:$4 sm:$0xff]   ;;  %v8523_v62 = vld [vmem:[%s11188_s1 + $0x1728] ss:$16 sps:$4 sm:$0xff]  }
 0x2ab   :  { %5353 = vmatpush1.bf16.msra.mxu0 %v8427_v63  ;;  %5912 = vmatpush1.bf16.msra.mxu1 %v8430_v0  ;;  %v8528_v63 = vld [vmem:[%s11188_s1 + $0x1744] ss:$16 sps:$4 sm:$0xff]   ;;  %v8531_v0 = vld [vmem:[%s11188_s1 + $0x174c] ss:$16 sps:$4 sm:$0xff]  }
 0x2ac   :  { %5354 = vmatprep.subr.bf16.mxu0 %v8435_v1  ;;  %5913 = vmatprep.subr.bf16.mxu1 %v8438_v2  ;;  %v8526_v1 = vld [vmem:[%s11188_s1 + $0x1740] ss:$16 sps:$4 sm:$0xff]   ;;  %v8529_v2 = vld [vmem:[%s11188_s1 + $0x1748] ss:$16 sps:$4 sm:$0xff]  }
 0x2af   :  { %5355 = vmatpush1.bf16.msra.mxu0 %v8433_v3  ;;  %5914 = vmatpush1.bf16.msra.mxu1 %v8436_v4  ;;  %v8534_v3 = vld [vmem:[%s11188_s1 + $0x1764] ss:$16 sps:$4 sm:$0xff]   ;;  %v8537_v4 = vld [vmem:[%s11188_s1 + $0x176c] ss:$16 sps:$4 sm:$0xff]  }
 0x2b0   :  { %5356 = vmatprep.subr.bf16.mxu0 %v8441_v5  ;;  %5915 = vmatprep.subr.bf16.mxu1 %v8444_v6  ;;  %v8532_v5 = vld [vmem:[%s11188_s1 + $0x1760] ss:$16 sps:$4 sm:$0xff]   ;;  %v8535_v6 = vld [vmem:[%s11188_s1 + $0x1768] ss:$16 sps:$4 sm:$0xff]  }
 0x2b3   :  { %5357 = vmatpush1.bf16.msra.mxu0 %v8439_v7  ;;  %5916 = vmatpush1.bf16.msra.mxu1 %v8442_v8  ;;  %v8540_v7 = vld [vmem:[%s11188_s1 + $0x1784] ss:$16 sps:$4 sm:$0xff]   ;;  %v8543_v8 = vld [vmem:[%s11188_s1 + $0x178c] ss:$16 sps:$4 sm:$0xff]  }
 0x2b4   :  { %5358 = vmatprep.subr.bf16.mxu0 %v8447_v9  ;;  %5917 = vmatprep.subr.bf16.mxu1 %v8450_v10  ;;  %v8538_v9 = vld [vmem:[%s11188_s1 + $0x1780] ss:$16 sps:$4 sm:$0xff]   ;;  %v8541_v10 = vld [vmem:[%s11188_s1 + $0x1788] ss:$16 sps:$4 sm:$0xff]  }
 0x2b7   :  { %5359 = vmatpush1.bf16.msra.mxu0 %v8445_v11  ;;  %5918 = vmatpush1.bf16.msra.mxu1 %v8448_v12  ;;  %v8546_v11 = vld [vmem:[%s11188_s1 + $0x17a4] ss:$16 sps:$4 sm:$0xff]   ;;  %v8549_v12 = vld [vmem:[%s11188_s1 + $0x17ac] ss:$16 sps:$4 sm:$0xff]  }
 0x2b8   :  { %5360 = vmatprep.subr.bf16.mxu0 %v8453_v13  ;;  %5919 = vmatprep.subr.bf16.mxu1 %v8456_v14  ;;  %v8544_v13 = vld [vmem:[%s11188_s1 + $0x17a0] ss:$16 sps:$4 sm:$0xff]   ;;  %v8547_v14 = vld [vmem:[%s11188_s1 + $0x17a8] ss:$16 sps:$4 sm:$0xff]  }
 0x2bb   :  { %5361 = vmatpush1.bf16.msra.mxu0 %v8451_v15  ;;  %5920 = vmatpush1.bf16.msra.mxu1 %v8454_v16  ;;  %v8552_v15 = vld [vmem:[%s11188_s1 + $0x17c4] ss:$16 sps:$4 sm:$0xff]   ;;  %v8555_v16 = vld [vmem:[%s11188_s1 + $0x17cc] ss:$16 sps:$4 sm:$0xff]  }
 0x2bc   :  { %5362 = vmatprep.subr.bf16.mxu0 %v8459_v17  ;;  %5921 = vmatprep.subr.bf16.mxu1 %v8462_v18  ;;  %v8550_v17 = vld [vmem:[%s11188_s1 + $0x17c0] ss:$16 sps:$4 sm:$0xff]   ;;  %v8553_v18 = vld [vmem:[%s11188_s1 + $0x17c8] ss:$16 sps:$4 sm:$0xff]  }
 0x2bf   :  { %5363 = vmatpush1.bf16.msra.mxu0 %v8457_v19  ;;  %5922 = vmatpush1.bf16.msra.mxu1 %v8460_v20  ;;  %v8558_v19 = vld [vmem:[%s11188_s1 + $0x17e4] ss:$16 sps:$4 sm:$0xff]   ;;  %v8561_v20 = vld [vmem:[%s11188_s1 + $0x17ec] ss:$16 sps:$4 sm:$0xff]  }
 0x2c0   :  { %5375 = vmatprep.subr.bf16.mxu0 %v8468_v21  ;;  %5934 = vmatprep.subr.bf16.mxu1 %v8471_v22  ;;  %v8556_v21 = vld [vmem:[%s11188_s1 + $0x17e0] ss:$16 sps:$4 sm:$0xff]   ;;  %v8559_v22 = vld [vmem:[%s11188_s1 + $0x17e8] ss:$16 sps:$4 sm:$0xff]  }
 0x2c2   :  { %5365 = vmatmul.mubr.bf16.vlgmr.msra.gmra.mrb[0].mxu0 %v8463_v23  ;;  %5924 = vmatmul.mubr.bf16.vlgmr.msra.gmra.mrb[0].mxu1 %v8463_v23  ;;  %v8567_v23 = vld [vmem:[%s11188_s1 + $0x1804] ss:$16 sps:$4 sm:$0xff]  }
 0x2c3   :  { %5376 = vmatpush1.bf16.msra.mxu0 %v8466_v24  ;;  %5935 = vmatpush1.bf16.msra.mxu1 %v8469_v25  ;;  %v8570_v24 = vld [vmem:[%s11188_s1 + $0x180c] ss:$16 sps:$4 sm:$0xff]  }
 0x2c4   :  { %5377 = vmatprep.subr.bf16.mxu0 %v8474_v26  ;;  %5936 = vmatprep.subr.bf16.mxu1 %v8477_v27  ;;  %v8562_v25 = vld [vmem:[%s11189_s0 + $0x58] ss:$100 sps:$4 sm:$0xff]   ;;  %v8565_v26 = vld [vmem:[%s11188_s1 + $0x1800] ss:$16 sps:$4 sm:$0xff]  }
 0x2c5   :  { %5407 = vmatprep.mubr.bf16.mxu0 %v8564_v28  ;;  %5966 = vmatprep.mubr.bf16.mxu1 %v8564_v28  ;;  %v8568_v27 = vld [vmem:[%s11188_s1 + $0x1808] ss:$16 sps:$4 sm:$0xff]   ;;  %v8573_v28 = vld [vmem:[%s11188_s1 + $0x1824] ss:$16 sps:$4 sm:$0xff]  }
 0x2c7   :  { %5378 = vmatpush1.bf16.msra.mxu0 %v8472_v29  ;;  %5937 = vmatpush1.bf16.msra.mxu1 %v8475_v30  ;;  %v8576_v29 = vld [vmem:[%s11188_s1 + $0x182c] ss:$16 sps:$4 sm:$0xff]   ;;  %v8571_v30 = vld [vmem:[%s11188_s1 + $0x1820] ss:$16 sps:$4 sm:$0xff]  }
 0x2c8   :  { %5379 = vmatprep.subr.bf16.mxu0 %v8480_v31  ;;  %5938 = vmatprep.subr.bf16.mxu1 %v8483_v32  ;;  %v8574_v31 = vld [vmem:[%s11188_s1 + $0x1828] ss:$16 sps:$4 sm:$0xff]   ;;  %v8579_v32 = vld [vmem:[%s11188_s1 + $0x1844] ss:$16 sps:$4 sm:$0xff]  }
 0x2cb   :  { %5380 = vmatpush1.bf16.msra.mxu0 %v8478_v33  ;;  %5939 = vmatpush1.bf16.msra.mxu1 %v8481_v34  ;;  %v8582_v33 = vld [vmem:[%s11188_s1 + $0x184c] ss:$16 sps:$4 sm:$0xff]   ;;  %v8622_v34 = vmov 0  }
 0x2cc   :  { %5381 = vmatprep.subr.bf16.mxu0 %v8486_v35  ;;  %5940 = vmatprep.subr.bf16.mxu1 %v8489_v36  ;;  %v8577_v35 = vld [vmem:[%s11188_s1 + $0x1840] ss:$16 sps:$4 sm:$0xff]   ;;  %v8580_v36 = vld [vmem:[%s11188_s1 + $0x1848] ss:$16 sps:$4 sm:$0xff]  }
 0x2cf   :  { %5382 = vmatpush1.bf16.msra.mxu0 %v8484_v37  ;;  %5941 = vmatpush1.bf16.msra.mxu1 %v8487_v38  ;;  %v8585_v37 = vld [vmem:[%s11188_s1 + $0x1864] ss:$16 sps:$4 sm:$0xff]   ;;  %v8588_v38 = vld [vmem:[%s11188_s1 + $0x186c] ss:$16 sps:$4 sm:$0xff]  }
 0x2d0   :  { %5383 = vmatprep.subr.bf16.mxu0 %v8492_v39  ;;  %5942 = vmatprep.subr.bf16.mxu1 %v8495_v40  ;;  %v8583_v39 = vld [vmem:[%s11188_s1 + $0x1860] ss:$16 sps:$4 sm:$0xff]   ;;  %v8586_v40 = vld [vmem:[%s11188_s1 + $0x1868] ss:$16 sps:$4 sm:$0xff]  }
 0x2d3   :  { %5384 = vmatpush1.bf16.msra.mxu0 %v8490_v41  ;;  %5943 = vmatpush1.bf16.msra.mxu1 %v8493_v42  ;;  %v8590_v41 = vld [vmem:[%s11190_s3 + $0x40] sm:$0xff]  }
 0x2d4   :  { %5385 = vmatprep.subr.bf16.mxu0 %v8498_v43  ;;  %5944 = vmatprep.subr.bf16.mxu1 %v8501_v44  ;;  %v8591_v42 = vld [vmem:[%s11190_s3 + $0xc0] sm:$0xff]  }
 0x2d5   :  { %v8589_v43 = vld [vmem:[%s11189_s0 + $0x60] ss:$100 sps:$4 sm:$0xff]  }
 0x2d6   :  { %v8592_v44 = vld [vmem:[%s11190_s3] sm:$0xff]  }
 0x2d7   :  { %5386 = vmatpush1.bf16.msra.mxu0 %v8496_v45  ;;  %5945 = vmatpush1.bf16.msra.mxu1 %v8499_v46  ;;  %v8593_v45 = vld [vmem:[%s11190_s3 + $0x80] sm:$0xff]   ;;  %v8594_v46 = vld [vmem:[%s11190_s3 + $0x48] sm:$0xff]  }
 0x2d8   :  { %5387 = vmatprep.subr.bf16.mxu0 %v8504_v47  ;;  %5946 = vmatprep.subr.bf16.mxu1 %v8507_v48  ;;  %v8595_v47 = vld [vmem:[%s11190_s3 + $0xc8] sm:$0xff]  }
 0x2d9   :  { %v8596_v48 = vld [vmem:[%s11190_s3 + $0x8] sm:$0xff]  }
 0x2db   :  { %5388 = vmatpush1.bf16.msra.mxu0 %v8502_v49  ;;  %5947 = vmatpush1.bf16.msra.mxu1 %v8505_v50  ;;  %v8597_v49 = vld [vmem:[%s11190_s3 + $0x88] sm:$0xff]   ;;  %v8598_v50 = vld [vmem:[%s11190_s3 + $0x50] sm:$0xff]  }
 0x2dc   :  { %5389 = vmatprep.subr.bf16.mxu0 %v8510_v51  ;;  %5948 = vmatprep.subr.bf16.mxu1 %v8513_v52  ;;  %v8599_v51 = vld [vmem:[%s11190_s3 + $0xd0] sm:$0xff]  }
 0x2dd   :  { %v8600_v52 = vld [vmem:[%s11190_s3 + $0x10] sm:$0xff]  }
 0x2df   :  { %5390 = vmatpush1.bf16.msra.mxu0 %v8508_v53  ;;  %5949 = vmatpush1.bf16.msra.mxu1 %v8511_v54  ;;  %v8601_v53 = vld [vmem:[%s11190_s3 + $0x90] sm:$0xff]   ;;  %v8602_v54 = vld [vmem:[%s11190_s3 + $0x58] sm:$0xff]  }
 0x2e0   :  { %5391 = vmatprep.subr.bf16.mxu0 %v8516_v55  ;;  %5950 = vmatprep.subr.bf16.mxu1 %v8519_v56  ;;  %v8603_v55 = vld [vmem:[%s11190_s3 + $0xd8] sm:$0xff]  }
 0x2e1   :  { %v8604_v56 = vld [vmem:[%s11190_s3 + $0x18] sm:$0xff]  }
 0x2e3   :  { %5392 = vmatpush1.bf16.msra.mxu0 %v8514_v57  ;;  %5951 = vmatpush1.bf16.msra.mxu1 %v8517_v58  ;;  %v8605_v57 = vld [vmem:[%s11190_s3 + $0x98] sm:$0xff]   ;;  %v8606_v58 = vld [vmem:[%s11190_s3 + $0x60] sm:$0xff]  }
 0x2e4   :  { %5393 = vmatprep.subr.bf16.mxu0 %v8522_v59  ;;  %5952 = vmatprep.subr.bf16.mxu1 %v8525_v60  ;;  %v8607_v59 = vld [vmem:[%s11190_s3 + $0xe0] sm:$0xff]  }
 0x2e5   :  { %v8608_v60 = vld [vmem:[%s11190_s3 + $0x20] sm:$0xff]  }
 0x2e7   :  { %5394 = vmatpush1.bf16.msra.mxu0 %v8520_v61  ;;  %5953 = vmatpush1.bf16.msra.mxu1 %v8523_v62  ;;  %v8609_v61 = vld [vmem:[%s11190_s3 + $0xa0] sm:$0xff]   ;;  %v8610_v62 = vld [vmem:[%s11190_s3 + $0x68] sm:$0xff]  }
 0x2e8   :  { %5395 = vmatprep.subr.bf16.mxu0 %v8528_v63  ;;  %5954 = vmatprep.subr.bf16.mxu1 %v8531_v0  ;;  %v8611_v63 = vld [vmem:[%s11190_s3 + $0xe8] sm:$0xff]  }
 0x2e9   :  { %v8612_v0 = vld [vmem:[%s11190_s3 + $0x28] sm:$0xff]  }
 0x2eb   :  { %5396 = vmatpush1.bf16.msra.mxu0 %v8526_v1  ;;  %5955 = vmatpush1.bf16.msra.mxu1 %v8529_v2  ;;  %v8613_v1 = vld [vmem:[%s11190_s3 + $0xa8] sm:$0xff]   ;;  %v8614_v2 = vld [vmem:[%s11190_s3 + $0x70] sm:$0xff]  }
 0x2ec   :  { %5397 = vmatprep.subr.bf16.mxu0 %v8534_v3  ;;  %5956 = vmatprep.subr.bf16.mxu1 %v8537_v4  ;;  %v8615_v3 = vld [vmem:[%s11190_s3 + $0xf0] sm:$0xff]  }
 0x2ed   :  { %v8616_v4 = vld [vmem:[%s11190_s3 + $0x30] sm:$0xff]  }
 0x2ef   :  { %5398 = vmatpush1.bf16.msra.mxu0 %v8532_v5  ;;  %5957 = vmatpush1.bf16.msra.mxu1 %v8535_v6  ;;  %v8617_v5 = vld [vmem:[%s11190_s3 + $0xb0] sm:$0xff]   ;;  %v8618_v6 = vld [vmem:[%s11190_s3 + $0x78] sm:$0xff]  }
 0x2f0   :  { %5399 = vmatprep.subr.bf16.mxu0 %v8540_v7  ;;  %5958 = vmatprep.subr.bf16.mxu1 %v8543_v8  ;;  %v8619_v7 = vld [vmem:[%s11190_s3 + $0xf8] sm:$0xff]  }
 0x2f1   :  { %v8620_v8 = vld [vmem:[%s11190_s3 + $0x38] sm:$0xff]  }
 0x2f3   :  { %5400 = vmatpush1.bf16.msra.mxu0 %v8538_v9  ;;  %5959 = vmatpush1.bf16.msra.mxu1 %v8541_v10  ;;  %v8621_v9 = vld [vmem:[%s11190_s3 + $0xb8] sm:$0xff]   ;;  %v833_v10 = vlaneseq }
 0x2f4   :  { %5401 = vmatprep.subr.bf16.mxu0 %v8546_v11  ;;  %5960 = vmatprep.subr.bf16.mxu1 %v8549_v12 }
 0x2f5   :  { %v834_v11 = vshrl.u32 %v833_v10, 7 }
 0x2f7   :  { %5402 = vmatpush1.bf16.msra.mxu0 %v8544_v13  ;;  %5961 = vmatpush1.bf16.msra.mxu1 %v8547_v14  ;;  %v835_v12 = vsub.s32 0, %v834_v11  ;;  %v843_v13 = vsub.s32 2, %v834_v11  ;;  %v831_v14 = vld [vmem:[%s11191_s2] sm:$0xf] }
 0x2f8   :  { %5403 = vmatprep.subr.bf16.mxu0 %v8552_v15  ;;  %5962 = vmatprep.subr.bf16.mxu1 %v8555_v16  ;;  %v839_v15 = vsub.s32 1, %v834_v11  ;;  %v847_v16 = vsub.s32 3, %v834_v11 }
 0x2fb   :  { %5404 = vmatpush1.bf16.msra.mxu0 %v8550_v17  ;;  %5963 = vmatpush1.bf16.msra.mxu1 %v8553_v18  ;;  %v836_v17 = vrot.slane %v831_v14, %v835_v12  ;;  %v844_v18 = vrot.slane %v831_v14, %v843_v13 }
 0x2fc   :  { %5405 = vmatprep.subr.bf16.mxu0 %v8558_v19  ;;  %5964 = vmatprep.subr.bf16.mxu1 %v8561_v20  ;;  %v840_v19 = vrot.slane %v831_v14, %v839_v15  ;;  %v848_v20 = vrot.slane %v831_v14, %v847_v16 }
 0x2ff   :  { %5406 = vmatpush1.bf16.msra.mxu0 %v8556_v21  ;;  %5965 = vmatpush1.bf16.msra.mxu1 %v8559_v22 }
 0x300   :  { %5418 = vmatprep.subr.bf16.mxu0 %v8567_v23  ;;  %5977 = vmatprep.subr.bf16.mxu1 %v8570_v24 }
 0x302   :  { %5408 = vmatmul.mubr.bf16.vlgmr.msra.gmra.mrb[0].mxu0 %v8562_v25  ;;  %5967 = vmatmul.mubr.bf16.vlgmr.msra.gmra.mrb[0].mxu1 %v8562_v25 }
 0x303   :  { %5419 = vmatpush1.bf16.msra.mxu0 %v8565_v26  ;;  %5978 = vmatpush1.bf16.msra.mxu1 %v8568_v27 }
 0x304   :  { %5420 = vmatprep.subr.bf16.mxu0 %v8573_v28  ;;  %5979 = vmatprep.subr.bf16.mxu1 %v8576_v29 }
 0x305   :  { %5450 = vmatprep.mubr.bf16.mxu0 %v8622_v34  ;;  %6009 = vmatprep.mubr.bf16.mxu1 %v8622_v34 }
 0x307   :  { %5421 = vmatpush1.bf16.msra.mxu0 %v8571_v30  ;;  %5980 = vmatpush1.bf16.msra.mxu1 %v8574_v31 }
 0x308   :  { %5422 = vmatprep.subr.bf16.mxu0 %v8579_v32  ;;  %5981 = vmatprep.subr.bf16.mxu1 %v8582_v33 }
 0x30b   :  { %5423 = vmatpush1.bf16.msra.mxu0 %v8577_v35  ;;  %5982 = vmatpush1.bf16.msra.mxu1 %v8580_v36 }
 0x30c   :  { %5424 = vmatprep.subr.bf16.mxu0 %v8585_v37  ;;  %5983 = vmatprep.subr.bf16.mxu1 %v8588_v38 }
 0x30f   :  { %5425 = vmatpush1.bf16.msra.mxu0 %v8583_v39  ;;  %5984 = vmatpush1.bf16.msra.mxu1 %v8586_v40 }
 0x310   :  { %7228 = vmatprep.subr.bf16.mxu0 %v8590_v41  ;;  %7250 = vmatprep.subr.bf16.mxu1 %v8591_v42 }
 0x312   :  { %7193 = vmatmul.mubr.msk.bf16.vlgmr.msra.gmra.mrb[0].mxu0 %vm4898_vm0, %v8589_v43  ;;  %7194 = vmatmul.mubr.msk.bf16.vlgmr.msra.gmra.mrb[0].mxu1 %vm4898_vm0, %v8589_v43 }
 0x313   :  { %7229 = vmatpush3.bf16.msra.mxu0 %v8592_v44  ;;  %7251 = vmatpush3.bf16.msra.mxu1 %v8593_v45 }
 0x314   :  { %7230 = vmatprep.subr.bf16.mxu0 %v8594_v46  ;;  %7252 = vmatprep.subr.bf16.mxu1 %v8595_v47 }
 0x317   :  { %7231 = vmatpush3.bf16.msra.mxu0 %v8596_v48  ;;  %7253 = vmatpush3.bf16.msra.mxu1 %v8597_v49 }
 0x318   :  { %7232 = vmatprep.subr.bf16.mxu0 %v8598_v50  ;;  %7254 = vmatprep.subr.bf16.mxu1 %v8599_v51  ;;  %v7195_v51 = vld [vmem:[%s11192_s4] ss:$0 sm:$0xff] }
 0x31b   :  { %7233 = vmatpush3.bf16.msra.mxu0 %v8600_v52  ;;  %7255 = vmatpush3.bf16.msra.mxu1 %v8601_v53 }
 0x31c   :  { %7234 = vmatprep.subr.bf16.mxu0 %v8602_v54  ;;  %7256 = vmatprep.subr.bf16.mxu1 %v8603_v55 }
 0x31f   :  { %7235 = vmatpush3.bf16.msra.mxu0 %v8604_v56  ;;  %7257 = vmatpush3.bf16.msra.mxu1 %v8605_v57 }
 0x320   :  { %7236 = vmatprep.subr.bf16.mxu0 %v8606_v58  ;;  %7258 = vmatprep.subr.bf16.mxu1 %v8607_v59 }
 0x323   :  { %7237 = vmatpush3.bf16.msra.mxu0 %v8608_v60  ;;  %7259 = vmatpush3.bf16.msra.mxu1 %v8609_v61 }
 0x324   :  { %7238 = vmatprep.subr.bf16.mxu0 %v8610_v62  ;;  %7260 = vmatprep.subr.bf16.mxu1 %v8611_v63 }
 0x327   :  { %7239 = vmatpush3.bf16.msra.mxu0 %v8612_v0  ;;  %7261 = vmatpush3.bf16.msra.mxu1 %v8613_v1 }
 0x328   :  { %7240 = vmatprep.subr.bf16.mxu0 %v8614_v2  ;;  %7262 = vmatprep.subr.bf16.mxu1 %v8615_v3 }
 0x32b   :  { %7241 = vmatpush3.bf16.msra.mxu0 %v8616_v4  ;;  %7263 = vmatpush3.bf16.msra.mxu1 %v8617_v5 }
 0x32c   :  { %7242 = vmatprep.subr.bf16.mxu0 %v8618_v6  ;;  %7264 = vmatprep.subr.bf16.mxu1 %v8619_v7 }
 0x32f   :  { %7243 = vmatpush3.bf16.msra.mxu0 %v8620_v8  ;;  %7265 = vmatpush3.bf16.msra.mxu1 %v8621_v9 }
 0x3e5   :  { %v5452_v21 = vpop.f32.mrb[0].mxu0  ;;  %v6011_v22 = vpop.f32.mrb[0].mxu1 }
 0x3e6   :  { %v7272_v23 = vadd.f32 %v5452_v21, %v836_v17  ;;  %v7276_v24 = vadd.f32 %v6011_v22, %v844_v18  ;;  %v5454_v25 = vpop.f32.mrb[1].mxu0  ;;  %v6013_v26 = vpop.f32.mrb[1].mxu1 }
 0x3e7   :  { %v7273_v27 = vadd.f32 %v5454_v25, %v840_v19  ;;  %v7277_v28 = vadd.f32 %v6013_v26, %v848_v20  ;;  %v5456_v29 = vpop.f32.mrb[2].mxu0  ;;  %v6015_v30 = vpop.f32.mrb[2].mxu1 }
 0x3e8   :  { %v7274_v31 = vadd.f32 %v5456_v29, %v836_v17  ;;  %v7278_v32 = vadd.f32 %v6015_v30, %v844_v18  ;;  %v5458_v33 = vpop.f32.mrb[3].mxu0  ;;  %v6017_v34 = vpop.f32.mrb[3].mxu1  ;;  %v6020_v37 = vmax.f32 %v7272_v23, 0.0  ;;  %v6022_v38 = vmax.f32 %v7276_v24, 0.0 }
 0x3e9   :  { %v7275_v35 = vadd.f32 %v5458_v33, %v840_v19  ;;  %v7279_v36 = vadd.f32 %v6017_v34, %v848_v20  ;;  %v6021_v41 = vmax.f32 %v7273_v27, 0.0  ;;  %v6023_v42 = vmax.f32 %v7277_v28, 0.0 }
 0x3ea   :  { %v6024_v39 = vmax.f32 %v7274_v31, 0.0  ;;  %v6026_v40 = vmax.f32 %v7278_v32, 0.0 }
 0x3eb   :  { %v6025_v43 = vmax.f32 %v7275_v35, 0.0  ;;  %v6027_v44 = vmax.f32 %v7279_v36, 0.0 }
 0x3ec   :  { %v6028_v45 = vpack.c.bf16 %v6024_v39, %v6020_v37  ;;  %v6030_v46 = vpack.c.bf16 %v6026_v40, %v6022_v38 }
 0x3ed   :  { %v6029_v47 = vpack.c.bf16 %v6025_v43, %v6021_v41  ;;  %v6031_v48 = vpack.c.bf16 %v6027_v44, %v6023_v42 }
 0x3ef   :  { %6327 = vmatprep.mubr.bf16.mxu0 %v6029_v47  ;;  %6368 = vmatprep.mubr.bf16.mxu1 %v6031_v48 }
 0x3f0   :  { %6328 = vmatmul.mubr.bf16.vlgmr.msra.gmra.mrb[4].mxu0 %v6028_v45  ;;  %6369 = vmatmul.mubr.bf16.vlgmr.msra.gmra.mrb[4].mxu1 %v6030_v46 }
 0x4c3   :  { %v7244_v49 = vpop.f32.mrb[4].mxu0  ;;  %v7266_v50 = vpop.f32.mrb[4].mxu1 }
 0x4c4   :  { %v7245_v52 = vpop.f32.mrb[5].mxu0  ;;  %v7267_v53 = vpop.f32.mrb[5].mxu1 }
 0x4c5   :  { %v7246_v54 = vadd.f32 %v7245_v52, %v7244_v49  ;;  %v7268_v55 = vadd.f32 %v7267_v53, %v7266_v50  ;;  %v7247_v56 = vpop.f32.mrb[6].mxu0  ;;  %v7269_v57 = vpop.f32.mrb[6].mxu1 }
 0x4c6   :  { %v7248_v58 = vpop.f32.mrb[7].mxu0  ;;  %v7270_v59 = vpop.f32.mrb[7].mxu1 }
 0x4c7   :  { %v6330_v60 = vadd.f32 %v7246_v54, %v7195_v51  ;;  %v7249_v61 = vadd.f32 %v7248_v58, %v7247_v56  ;;  %v7271_v62 = vadd.f32 %v7270_v59, %v7269_v57 }
 0x4c9   :  { %v6371_v63 = vadd.f32 %v7268_v55, %v6330_v60  ;;  %v6333_v0 = vadd.f32 %v7249_v61, %v7195_v51 }
 0x4cb   :  { %6378 = vst.msk [vmem:[%s11193_s5] sm:$0xff] %vm6377_vm1, %v6371_v63  ;;  %v6374_v1 = vadd.f32 %v7271_v62, %v6333_v0 }
 0x4cd   :  { %6379 = vst.msk [vmem:[%s11193_s5 + $0x8] sm:$0xff] %vm6377_vm1, %v6374_v1 }

</bundles_post_ra>
